<compile_context>
chip_gen: v6e
topology: v6e:2x2x1
jax: 0.10.0
libtpu: 0.0.40
codegen_flags: <defaults>
</compile_context>

<pallas_src>
import functools

import jax
import jax.numpy as jnp
from jax import lax
from jax.experimental import pallas as pl
from jax.experimental.pallas import tpu as pltpu

BN_EPS = 1e-5
_VMEM_LIMIT = 40 * 1024 * 1024  # > 32 MiB default scoped, < v7x 64 MiB physical


# ----------------------------------------------------------------------------
# Kernels (channels-first: channels on sublanes, points on lanes)
# ----------------------------------------------------------------------------
def _bn1_stats_kernel(x_ref, w1_ref, s_ref, q_ref):
    """Pass 1: h1 = W1 @ x (conv bias skipped: cancelled by BN mean subtraction);
    accumulate per-channel sum / sum-of-squares along the N-tile (arbitrary) axis.
    h1 is NOT spilled to HBM (recomputed in pass 2)."""
    i = pl.program_id(1)

    @pl.when(i == 0)
    def _init():
        s_ref[...] = jnp.zeros_like(s_ref)
        q_ref[...] = jnp.zeros_like(q_ref)

    h = jnp.dot(w1_ref[...], x_ref[...], preferred_element_type=jnp.float32)
    # Padded lanes of x are exact zeros and the bias is skipped, so h == 0 there
    # and contributes nothing to the statistics -> no mask needed.
    # Channels-first makes these per-channel sums lane reductions (XLU slot);
    # only h*h stays on the VPU.
    s_ref[...] += jnp.sum(h, axis=1, keepdims=True)
    q_ref[...] += jnp.sum(h * h, axis=1, keepdims=True)


def _bn1_apply_l2_stats_kernel(x_ref, w1_ref, sc1_ref, sh1_ref, w2_ref,
                               h2_ref, s_ref, q_ref, *, tn, n_valid):
    """Pass 2: recompute h1 = W1 @ x, apply BN1 + ReLU, h2 = W2 @ a (bias skipped),
    spill h2 (bf16) and accumulate BN2 statistics."""
    i = pl.program_id(1)

    @pl.when(i == 0)
    def _init():
        s_ref[...] = jnp.zeros_like(s_ref)
        q_ref[...] = jnp.zeros_like(q_ref)

    h1 = jnp.dot(w1_ref[...], x_ref[...], preferred_element_type=jnp.float32)
    a = jnp.maximum(h1 * sc1_ref[...] + sh1_ref[...], 0.0)
    if n_valid % tn != 0:
        # Only emitted when N does not fill the last lane tile: padded lanes have
        # h1 == 0 but relu(shift) != 0 in general, which would pollute the BN2
        # statistics and the spilled h2.  One cheap full-tile select per step.
        col = i * tn + lax.broadcasted_iota(jnp.int32, (1, tn), 1)
        a = jnp.where(col < n_valid, a, 0.0)
    a = a.astype(jnp.bfloat16)
    h2 = jnp.dot(w2_ref[...], a, preferred_element_type=jnp.float32)
    h2_ref[...] = h2.astype(h2_ref.dtype)
    s_ref[...] += jnp.sum(h2, axis=1, keepdims=True)
    q_ref[...] += jnp.sum(h2 * h2, axis=1, keepdims=True)


def _bn2_apply_l3_kernel(h2_ref, sc2_ref, sh2_ref, w3_ref, b3_ref, o_ref):
    """Pass 3: out = W3 @ relu(BN2(h2)) + b3 — no cross-tile reduction; both grid
    axes parallel; output written channels-first so no wrapper transpose."""
    a = jnp.maximum(h2_ref[...].astype(jnp.float32) * sc2_ref[...] + sh2_ref[...], 0.0)
    a = a.astype(jnp.bfloat16)
    o = jnp.dot(w3_ref[...], a, preferred_element_type=jnp.float32) + b3_ref[...]
    o_ref[...] = o.astype(o_ref.dtype)


def _fused_nobn_kernel(x_ref, w1_ref, b1_ref, w2_ref, b2_ref, w3_ref, b3_ref, o_ref):
    """B == 1 path: the module skips BatchNorm entirely, so all three layers fuse
    into one fully parallel tiled pass (no cross-tile coupling)."""
    h = jnp.dot(w1_ref[...], x_ref[...], preferred_element_type=jnp.float32) + b1_ref[...]
    h = jnp.maximum(h, 0.0).astype(jnp.bfloat16)
    h = jnp.dot(w2_ref[...], h, preferred_element_type=jnp.float32) + b2_ref[...]
    h = jnp.maximum(h, 0.0).astype(jnp.bfloat16)
    o = jnp.dot(w3_ref[...], h, preferred_element_type=jnp.float32) + b3_ref[...]
    o_ref[...] = o.astype(o_ref.dtype)


# ----------------------------------------------------------------------------
# pallas_call wrappers
# ----------------------------------------------------------------------------
def _choose_tile_n(n_pad):
    """Lane tile along the point axis: 128-aligned, <= 1024 (larger tiles amortize
    the ~0.35us/step overhead now that per-tile traffic is small; capped so the
    pass-2 working set stays far below v7x's 64 MiB VMEM)."""
    if n_pad <= 1024:
        return n_pad
    for t in (1024, 512, 256, 128):
        if n_pad % t == 0:
            return t
    return 128


def _bn_affine(s, q, gamma, beta, m_valid):
    """Combine per-batch partial (sum, sum-of-squares) statistics and fold batch
    stats + BN affine into a per-channel scale/shift.  Tiny (B, C, 1) arrays ->
    plain JAX between the Pallas passes."""
    s = jnp.sum(s, axis=0)                       # (C, 1) combine per-core partials
    q = jnp.sum(q, axis=0)
    inv_m = 1.0 / float(m_valid)
    mean = s * inv_m
    var = jnp.maximum(q * inv_m - mean * mean, 0.0)   # one-pass variance, clamped
    scale = gamma * lax.rsqrt(var + BN_EPS)
    shift = beta - mean * scale
    return scale, shift


def _forward_with_bn(x_cf, params, n_valid, tn):
    """x_cf: (B, C_in, N_pad) bf16 channels-first -> (B, 256, N_pad) f32."""
    B, c_in, n_pad = x_cf.shape
    w1, _b1, g1, be1, w2, _b2, g2, be2, w3, b3 = params
    c1, c2, c3 = w1.shape[0], w2.shape[0], w3.shape[0]
    grid = (B, n_pad // tn)
    m_valid = B * n_valid

    x_spec = pl.BlockSpec((None, c_in, tn), lambda b, i: (b, 0, i))

    def const2d(shape):
        # full-array operand, constant block index -> DMA'd once, stays resident
        return pl.BlockSpec(shape, lambda b, i: (0, 0))

    def stats_spec(c):
        # per-batch partial statistics: accumulator over the "arbitrary" axis,
        # distinct block per "parallel" index -> race-free across TensorCores
        return pl.BlockSpec((None, c, 1), lambda b, i: (b, 0, 0))

    arb = pltpu.CompilerParams(dimension_semantics=("parallel", "arbitrary"),
                               vmem_limit_bytes=_VMEM_LIMIT)
    par = pltpu.CompilerParams(dimension_semantics=("parallel", "parallel"),
                               vmem_limit_bytes=_VMEM_LIMIT)

    # ---- pass 1: BN1 statistics only (no h1 spill)
    s1, q1 = pl.pallas_call(
        _bn1_stats_kernel,
        grid=grid,
        in_specs=[x_spec, const2d((c1, c_in))],
        out_specs=(stats_spec(c1), stats_spec(c1)),
        out_shape=(jax.ShapeDtypeStruct((B, c1, 1), jnp.float32),
                   jax.ShapeDtypeStruct((B, c1, 1), jnp.float32)),
        compiler_params=arb,
        cost_estimate=pl.CostEstimate(
            flops=2 * B * n_pad * c_in * c1, transcendentals=0,
            bytes_accessed=B * n_pad * c_in * 2 + c_in * c1 * 2 + 2 * B * c1 * 4),
    )(x_cf, w1)
    sc1, sh1 = _bn_affine(s1, q1, g1, be1, m_valid)

    # ---- pass 2: recompute h1, BN1 apply + ReLU, layer-2 matmul, BN2 statistics
    h2, s2, q2 = pl.pallas_call(
        functools.partial(_bn1_apply_l2_stats_kernel, tn=tn, n_valid=n_valid),
        grid=grid,
        in_specs=[x_spec, const2d((c1, c_in)), const2d((c1, 1)), const2d((c1, 1)),
                  const2d((c2, c1))],
        out_specs=(pl.BlockSpec((None, c2, tn), lambda b, i: (b, 0, i)),
                   stats_spec(c2), stats_spec(c2)),
        out_shape=(jax.ShapeDtypeStruct((B, c2, n_pad), jnp.bfloat16),
                   jax.ShapeDtypeStruct((B, c2, 1), jnp.float32),
                   jax.ShapeDtypeStruct((B, c2, 1), jnp.float32)),
        compiler_params=arb,
        cost_estimate=pl.CostEstimate(
            flops=2 * B * n_pad * (c_in * c1 + c1 * c2), transcendentals=0,
            bytes_accessed=B * n_pad * (c_in + c2) * 2 + (c_in * c1 + c1 * c2) * 2),
    )(x_cf, w1, sc1, sh1, w2)
    sc2, sh2 = _bn_affine(s2, q2, g2, be2, m_valid)

    # ---- pass 3: BN2 apply + ReLU + layer-3 matmul + bias (fully parallel)
    out = pl.pallas_call(
        _bn2_apply_l3_kernel,
        grid=grid,
        in_specs=[pl.BlockSpec((None, c2, tn), lambda b, i: (b, 0, i)),
                  const2d((c2, 1)), const2d((c2, 1)),
                  const2d((c3, c2)), const2d((c3, 1))],
        out_specs=pl.BlockSpec((None, c3, tn), lambda b, i: (b, 0, i)),
        out_shape=jax.ShapeDtypeStruct((B, c3, n_pad), jnp.float32),
        compiler_params=par,
        cost_estimate=pl.CostEstimate(
            flops=2 * B * n_pad * c2 * c3, transcendentals=0,
            bytes_accessed=B * n_pad * (c2 * 2 + c3 * 4) + c2 * c3 * 2),
    )(h2, sc2, sh2, w3, b3)
    return out


def _forward_no_bn(x_cf, params, tn):
    """x_cf: (C_in, N_pad) bf16 (batch == 1, module skips BatchNorm) -> (256, N_pad) f32."""
    c_in, n_pad = x_cf.shape
    w1, b1, _g1, _be1, w2, b2, _g2, _be2, w3, b3 = params
    c1, c2, c3 = w1.shape[0], w2.shape[0], w3.shape[0]
    grid = (n_pad // tn,)

    def const2d(shape):
        return pl.BlockSpec(shape, lambda i: (0, 0))

    return pl.pallas_call(
        _fused_nobn_kernel,
        grid=grid,
        in_specs=[pl.BlockSpec((c_in, tn), lambda i: (0, i)),
                  const2d((c1, c_in)), const2d((c1, 1)),
                  const2d((c2, c1)), const2d((c2, 1)),
                  const2d((c3, c2)), const2d((c3, 1))],
        out_specs=pl.BlockSpec((c3, tn), lambda i: (0, i)),
        out_shape=jax.ShapeDtypeStruct((c3, n_pad), jnp.float32),
        compiler_params=pltpu.CompilerParams(
            dimension_semantics=("parallel",), vmem_limit_bytes=_VMEM_LIMIT),
        cost_estimate=pl.CostEstimate(
            flops=2 * n_pad * (c_in * c1 + c1 * c2 + c2 * c3), transcendentals=0,
            bytes_accessed=n_pad * (c_in * 2 + c3 * 4)
                           + (c_in * c1 + c1 * c2 + c2 * c3) * 2),
    )(x_cf, w1, b1, w2, b2, w3, b3)


# ----------------------------------------------------------------------------
# Parameters + module-level forward
# ----------------------------------------------------------------------------
def init_params(keypoint_type="orb", seed=0):
    """Deterministic synthetic parameters matching the PyTorch module shapes.
    Conv weights are stored channels-first (c_out, c_in) in bf16 for the MXU;
    biases / BN affine are (c_out, 1) f32 columns (broadcast along lanes)."""
    if keypoint_type == "sift":
        input_dim = 128
    elif keypoint_type == "orb":
        input_dim = 32
    else:
        raise ValueError("Invalid keypoint type. Choose from ['sift', 'orb']")

    dims = [input_dim, 1024, 512, 256]
    key = jax.random.PRNGKey(seed)
    flat = []
    for i in range(1, len(dims)):
        c_in, c_out = dims[i - 1], dims[i]
        key, kw, kb = jax.random.split(key, 3)
        scale = 1.0 / jnp.sqrt(jnp.float32(c_in))
        w = jax.random.uniform(kw, (c_out, c_in), jnp.float32, -scale, scale)
        b = jax.random.uniform(kb, (c_out, 1), jnp.float32, -scale, scale)
        flat += [w.astype(jnp.bfloat16), b]
        if i < len(dims) - 1:
            # BatchNorm1d default init: gamma = 1, beta = 0
            flat += [jnp.ones((c_out, 1), jnp.float32),
                     jnp.zeros((c_out, 1), jnp.float32)]
    return dict(input_dim=input_dim, flat=tuple(flat))


def descriptor_feature_extractor(x, params):
    """Forward pass mirroring DescriptorFeatureExtractor.forward.

    x: (B, C_in, N) or (B, C_in)  ->  (B, 256, N) or (B, 256)
    """
    if x.ndim == 2:
        x = x[:, :, None]
    elif x.ndim != 3:
        raise ValueError(f"Expected 2D or 3D input tensor, got {x.ndim}D tensor")

    B, C, N = x.shape
    if C != params["input_dim"]:
        raise ValueError(f"Expected channel dim {params['input_dim']}, got {C}")

    # Module semantics: BatchNorm1d layers are skipped when batch size == 1.
    apply_bn = (B != 1)

    xb = x.astype(jnp.bfloat16)  # bf16 matmul inputs once, f32 MXU accumulation

    if apply_bn and N == 1:
        # 2-D-input path: fold the batch axis onto the lane axis so BN still sees
        # all B points in one lane tile (instead of B single-lane tiles).
        xb = jnp.transpose(xb[:, :, 0])[None]            # (1, C, B) — tiny
        n_points = B
    else:
        n_points = N

    n_pad = max(((n_points + 127) // 128) * 128, 128)
    tn = _choose_tile_n(n_pad)
    if n_pad != xb.shape[2]:
        xb = jnp.pad(xb, ((0, 0), (0, 0), (0, n_pad - xb.shape[2])))

    flat = params["flat"]
    if apply_bn:
        out = _forward_with_bn(xb, flat, n_points, tn)    # (B or 1, 256, n_pad)
    else:
        out = _forward_no_bn(xb[0], flat, tn)[None]       # (1, 256, n_pad)

    out = out[:, :, :n_points]

    if apply_bn and N == 1:
        out = jnp.transpose(out[0])[:, :, None]           # (B, 256, 1) — tiny

    # x.squeeze(2): only drops the last axis if it has size 1
    if N == 1:
        out = out[:, :, 0]
    return out


# ----------------------------------------------------------------------------
# Pure-JAX reference (f32) for a sanity check
# ----------------------------------------------------------------------------
def _reference_forward(x, params):
    if x.ndim == 2:
        x = x[:, :, None]
    B, C, N = x.shape
    w1, b1, g1, be1, w2, b2, g2, be2, w3, b3 = params["flat"]
    h = jnp.transpose(x, (0, 2, 1)).reshape(B * N, C).astype(jnp.float32)

    def lin(h, w, b):
        return h @ w.astype(jnp.float32).T + b[:, 0][None, :]

    def bn(h, g, be):
        mean = jnp.mean(h, axis=0, keepdims=True)
        var = jnp.mean(jnp.square(h - mean), axis=0, keepdims=True)
        return (h - mean) * lax.rsqrt(var + BN_EPS) * g[:, 0][None, :] + be[:, 0][None, :]

    apply_bn = (B != 1)
    h = lin(h, w1, b1)
    if apply_bn:
        h = bn(h, g1, be1)
    h = jnp.maximum(h, 0.0)
    h = lin(h, w2, b2)
    if apply_bn:
        h = bn(h, g2, be2)
    h = jnp.maximum(h, 0.0)
    h = lin(h, w3, b3)
    out = jnp.transpose(h.reshape(B, N, 256), (0, 2, 1))
    if N == 1:
        out = out[:, :, 0]
    return out


if __name__ == "__main__":
    params = init_params("orb", seed=0)

    key = jax.random.PRNGKey(0)
    B, C, N = 2, 32, 8
    x = jax.random.normal(key, (B, C, N), jnp.float32)

    out = jax.block_until_ready(descriptor_feature_extractor(x, params))
    assert out.shape == (B, 256, N), out.shape
    assert bool(jnp.all(jnp.isfinite(out)))
    ref = _reference_forward(x, params)
    assert float(jnp.max(jnp.abs(out - ref))) < 0.2  # bf16 matmul inputs vs f32 ref

    # 2D-input path (N squeezed away; BN still applied since B > 1)
    x2 = jax.random.normal(jax.random.PRNGKey(1), (B, C), jnp.float32)
    out2 = jax.block_until_ready(descriptor_feature_extractor(x2, params))
    assert out2.shape == (B, 256), out2.shape
    assert bool(jnp.all(jnp.isfinite(out2)))

    # batch-size-1 path: module skips BatchNorm -> fused single-pass kernel
    x3 = jax.random.normal(jax.random.PRNGKey(2), (1, C, N), jnp.float32)
    out3 = jax.block_until_ready(descriptor_feature_extractor(x3, params))
    assert out3.shape == (1, 256, N), out3.shape
    assert bool(jnp.all(jnp.isfinite(out3)))
    ref3 = _reference_forward(x3, params)
    assert float(jnp.max(jnp.abs(out3 - ref3))) < 0.2

    print("KERNEL_OK")
</pallas_src>

<mosaic_0001>
module attributes {stable_mosaic.version = 11 : i64} {
  func.func @_bn1_stats_kernel(%arg0: i32, %arg1: i32, %arg2: memref<1x32x128xbf16, #tpu.memory_space<vmem>>, %arg3: memref<1024x32xbf16, #tpu.memory_space<vmem>>, %arg4: memref<1x1024x1xf32, #tpu.memory_space<vmem>>, %arg5: memref<1x1024x1xf32, #tpu.memory_space<vmem>>) attributes {dimension_semantics = [#tpu.dimension_semantics<parallel>, #tpu.dimension_semantics<arbitrary>], iteration_bounds = array<i64: 2, 1>, scalar_prefetch = 0 : i64, scratch_operands = 0 : i64, tpu.core_type = #tpu.core_type<tc>, window_params = [{transform_indices = @transform_0, window_bounds = array<i64: 1, 32, 128>}, {pipeline_mode = #tpu.pipeline_mode<synchronous>, transform_indices = @transform_1, window_bounds = array<i64: 1024, 32>}, {transform_indices = @transform_2, window_bounds = array<i64: 1, 1024, 1>}, {transform_indices = @transform_3, window_bounds = array<i64: 1, 1024, 1>}]} {
    %c0_i32 = arith.constant 0 : i32
    %0 = arith.cmpi eq, %arg1, %c0_i32 : i32
    %1 = arith.extui %0 : i1 to i32
    %c0_i32_0 = arith.constant 0 : i32
    %2 = arith.cmpi ne, %1, %c0_i32_0 : i32
    scf.if %2 {
      %cst_19 = arith.constant 0.000000e+00 : f32
      %24 = vector.broadcast %cst_19 : f32 to vector<1024x1xf32>
      %c0_20 = arith.constant 0 : index
      %c0_21 = arith.constant 0 : index
      %c0_22 = arith.constant 0 : index
      %25 = vector.load %arg4[%c0_20, %c0_21, %c0_22] : memref<1x1024x1xf32, #tpu.memory_space<vmem>>, vector<1x1024x1xf32>
      %26 = vector.shape_cast %25 : vector<1x1024x1xf32> to vector<1024x1xf32>
      %27 = vector.shape_cast %24 : vector<1024x1xf32> to vector<1x1024x1xf32>
      tpu.vector_store %arg4[%c0_20, %c0_21, %c0_22], %27 {strides = array<i32>} : memref<1x1024x1xf32, #tpu.memory_space<vmem>>, vector<1x1024x1xf32>,
      %cst_23 = arith.constant 0.000000e+00 : f32
      %28 = vector.broadcast %cst_23 : f32 to vector<1024x1xf32>
      %c0_24 = arith.constant 0 : index
      %c0_25 = arith.constant 0 : index
      %c0_26 = arith.constant 0 : index
      %29 = vector.load %arg5[%c0_24, %c0_25, %c0_26] : memref<1x1024x1xf32, #tpu.memory_space<vmem>>, vector<1x1024x1xf32>
      %30 = vector.shape_cast %29 : vector<1x1024x1xf32> to vector<1024x1xf32>
      %31 = vector.shape_cast %28 : vector<1024x1xf32> to vector<1x1024x1xf32>
      tpu.vector_store %arg5[%c0_24, %c0_25, %c0_26], %31 {strides = array<i32>} : memref<1x1024x1xf32, #tpu.memory_space<vmem>>, vector<1x1024x1xf32>,
    } else {
    }
    %c0 = arith.constant 0 : index
    %c0_1 = arith.constant 0 : index
    %3 = vector.load %arg3[%c0, %c0_1] : memref<1024x32xbf16, #tpu.memory_space<vmem>>, vector<1024x32xbf16>
    %c0_2 = arith.constant 0 : index
    %c0_3 = arith.constant 0 : index
    %c0_4 = arith.constant 0 : index
    %4 = vector.load %arg2[%c0_2, %c0_3, %c0_4] : memref<1x32x128xbf16, #tpu.memory_space<vmem>>, vector<1x32x128xbf16>
    %5 = vector.shape_cast %4 : vector<1x32x128xbf16> to vector<32x128xbf16>
    %cst = arith.constant dense<0.000000e+00> : vector<1024x128xf32>
    %6 = tpu.matmul %3, %5, %cst {dimension_numbers = #tpu.dot_dimension_numbers<[1], [0], [0], [1], [0, 0, 1, 1], [], []>} : vector<1024x32xbf16>, vector<32x128xbf16>, vector<1024x128xf32> -> vector<1024x128xf32>
    %c0_5 = arith.constant 0 : index
    %c0_6 = arith.constant 0 : index
    %c0_7 = arith.constant 0 : index
    %7 = vector.load %arg4[%c0_5, %c0_6, %c0_7] : memref<1x1024x1xf32, #tpu.memory_space<vmem>>, vector<1x1024x1xf32>
    %8 = vector.shape_cast %7 : vector<1x1024x1xf32> to vector<1024x1xf32>
    %cst_8 = arith.constant dense<0.000000e+00> : vector<1024xf32>
    %9 = vector.multi_reduction <add>, %6, %cst_8 [1] : vector<1024x128xf32> to vector<1024xf32>
    %10 = vector.shape_cast %9 : vector<1024xf32> to vector<1024x1xf32>
    %11 = arith.addf %8, %10 : vector<1024x1xf32>
    %c0_9 = arith.constant 0 : index
    %c0_10 = arith.constant 0 : index
    %c0_11 = arith.constant 0 : index
    %12 = vector.load %arg4[%c0_9, %c0_10, %c0_11] : memref<1x1024x1xf32, #tpu.memory_space<vmem>>, vector<1x1024x1xf32>
    %13 = vector.shape_cast %12 : vector<1x1024x1xf32> to vector<1024x1xf32>
    %14 = vector.shape_cast %11 : vector<1024x1xf32> to vector<1x1024x1xf32>
    tpu.vector_store %arg4[%c0_9, %c0_10, %c0_11], %14 {strides = array<i32>} : memref<1x1024x1xf32, #tpu.memory_space<vmem>>, vector<1x1024x1xf32>,
    %c0_12 = arith.constant 0 : index
    %c0_13 = arith.constant 0 : index
    %c0_14 = arith.constant 0 : index
    %15 = vector.load %arg5[%c0_12, %c0_13, %c0_14] : memref<1x1024x1xf32, #tpu.memory_space<vmem>>, vector<1x1024x1xf32>
    %16 = vector.shape_cast %15 : vector<1x1024x1xf32> to vector<1024x1xf32>
    %17 = arith.mulf %6, %6 : vector<1024x128xf32>
    %cst_15 = arith.constant dense<0.000000e+00> : vector<1024xf32>
    %18 = vector.multi_reduction <add>, %17, %cst_15 [1] : vector<1024x128xf32> to vector<1024xf32>
    %19 = vector.shape_cast %18 : vector<1024xf32> to vector<1024x1xf32>
    %20 = arith.addf %16, %19 : vector<1024x1xf32>
    %c0_16 = arith.constant 0 : index
    %c0_17 = arith.constant 0 : index
    %c0_18 = arith.constant 0 : index
    %21 = vector.load %arg5[%c0_16, %c0_17, %c0_18] : memref<1x1024x1xf32, #tpu.memory_space<vmem>>, vector<1x1024x1xf32>
    %22 = vector.shape_cast %21 : vector<1x1024x1xf32> to vector<1024x1xf32>
    %23 = vector.shape_cast %20 : vector<1024x1xf32> to vector<1x1024x1xf32>
    tpu.vector_store %arg5[%c0_16, %c0_17, %c0_18], %23 {strides = array<i32>} : memref<1x1024x1xf32, #tpu.memory_space<vmem>>, vector<1x1024x1xf32>,
    return
  }
  func.func @transform_0(%arg0: i32, %arg1: i32) -> (i32, i32, i32) {
    %c0_i32 = arith.constant 0 : i32
    %c0_i32_0 = arith.constant 0 : i32
    return %arg0, %c0_i32, %arg1 : i32, i32, i32
  }
  func.func @transform_1(%arg0: i32, %arg1: i32) -> (i32, i32) {
    %c0_i32 = arith.constant 0 : i32
    %c0_i32_0 = arith.constant 0 : i32
    %c0_i32_1 = arith.constant 0 : i32
    return %c0_i32, %c0_i32_0 : i32, i32
  }
  func.func @transform_2(%arg0: i32, %arg1: i32) -> (i32, i32, i32) {
    %c0_i32 = arith.constant 0 : i32
    %c0_i32_0 = arith.constant 0 : i32
    %c0_i32_1 = arith.constant 0 : i32
    return %arg0, %c0_i32, %c0_i32_0 : i32, i32, i32
  }
  func.func @transform_3(%arg0: i32, %arg1: i32) -> (i32, i32, i32) {
    %c0_i32 = arith.constant 0 : i32
    %c0_i32_0 = arith.constant 0 : i32
    %c0_i32_1 = arith.constant 0 : i32
    return %arg0, %c0_i32, %c0_i32_0 : i32, i32, i32
  }
}

</mosaic_0001>

<bundles_post_ra>
// kernel: tpu_custom_call.1
= control target key start
LH: loop header
LB: loop body
LE: loop exit
PB: predicated region body
PF: predicated region fallthrough
CT: control target
= control target key end

     0   :  { %s3666_s12 = smov 0   ;;  %s3668_s13 = smov 0   ;;  %s5992_s0 = inlined_call_operand.vmem [shape: bf16[2,32,128], index: 0, kind: input, shape index: {}]   ;;  %s5993_s1 = inlined_call_operand.vmem [shape: bf16[1024,32], index: 1, kind: input, shape index: {}]   ;;  %s5994_s2 = inlined_call_operand.vmem [shape: f32[2,1024,1], index: 2, kind: output, shape index: {0}]   ;;  %s5995_s3 = inlined_call_operand.vmem [shape: f32[2,1024,1], index: 3, kind: output, shape index: {1}]  }
   0x1   :  { %s3670_s14 = smov 0  }
   0x2 LB: > { %s26_s15 = sadd.s32 1, %s3639_s13  ;;  %p3186_p0 = scmp.ge.s32.totalorder %s3643_s14, 1  ;;  %s3643_s14 = sphi %s3670_s14, %s14_s14   ;;  %s3639_s13 = sphi %s3668_s13, %s6099_s13   ;;  %s3635_s12 = sphi %s3666_s12, %s6098_s12  }
   0x3   : > { %p28_p1 = scmp.ge.s32.totalorder %s26_s15, 2  ;;  %p157_p2 = scmp.lt.s32.totalorder %s3643_s14, 3 }
   0x5   : > { %s6101_s15 = smov (%p28_p1, %s26_s15), 0  ;;  %p158_p3 = pnand %p3186_p0, %p157_p2 }
   0x7   : > { %161 = sbr.rel (%p158_p3) target bundleno = 868 (0x364), region = 28 }
   0xc   : > { %p189_p4 = scmp.lt.s32.totalorder %s3635_s12, 1  ;;  %v3557_v0 = vld [vmem:[%s5993_s1] sm:$0xff]   ;;  %vm933_vm0 = vcmask 261120   ;;  %v3559_v4 = vld [vmem:[%s5993_s1 + $0x8] sm:$0xff]   ;;  %v3561_v6 = vld [vmem:[%s5993_s1 + $0x10] sm:$0xff]   ;;  %vm212_vm1 = vcmask 7168  }
   0xd   : > { %v3558_v1 = vld [vmem:[%s5993_s1 + $0x100] sm:$0xff]   ;;  %3398 = vmatprep.mubr.msk.bf16.mxu0 %vm933_vm0, %v3557_v0  ;;  %v3560_v5 = vld [vmem:[%s5993_s1 + $0x108] sm:$0xff]   ;;  %v3563_v7 = vld [vmem:[%s5993_s1 + $0x110] sm:$0xff]  }
   0xe   : > { %s6103_s12 = smov (!%p189_p4, %s3635_s12), 1  ;;  %3462 = vmatprep.mubr.msk.bf16.mxu1 %vm933_vm0, %v3558_v1  ;;  %v3562_v8 = vld [vmem:[%s5993_s1 + $0x18] sm:$0xff]   ;;  %v3565_v10 = vld [vmem:[%s5993_s1 + $0x20] sm:$0xff]   ;;  %v3566_v12 = vld [vmem:[%s5993_s1 + $0x28] sm:$0xff]  }
   0xf   : > { %s3325_s20 = sshll.u32 %s6103_s12, 4  ;;  %v3564_v9 = vld [vmem:[%s5993_s1 + $0x118] sm:$0xff]   ;;  %v3567_v11 = vld [vmem:[%s5993_s1 + $0x120] sm:$0xff]   ;;  %v3568_v13 = vld [vmem:[%s5993_s1 + $0x128] sm:$0xff]   ;;  %s3326_s6 = sshll.u32 %s6103_s12, 10 }
  0x10   : > { %s196_s23 = scalar_lea.vmem %s5992_s0, %s3325_s20  ;;  %v3569_v14 = vld [vmem:[%s5993_s1 + $0x30] sm:$0xff]   ;;  %v3570_v16 = vld [vmem:[%s5993_s1 + $0x38] sm:$0xff]   ;;  %v3573_v18 = vld [vmem:[%s5993_s1 + $0x40] sm:$0xff]   ;;  %s3950_s9 = scalar_lea.vmem %s5994_s2, %s3326_s6 }
  0x11   : > { %v3555_v2 = vld [vmem:[%s196_s23 + $0x8] sm:$0xff]   ;;  %v3556_v3 = vld [vmem:[%s196_s23] sm:$0xff]   ;;  %v3571_v15 = vld [vmem:[%s5993_s1 + $0x130] sm:$0xff]   ;;  %s3955_s16 = scalar_lea.vmem %s5995_s3, %s3326_s6 }
  0x12   : > { %3394 = vmatprep.subr.bf16.mxu0 %v3555_v2  ;;  %3526 = vmatprep.subr.bf16.mxu1 %v3555_v2  ;;  %v3572_v17 = vld [vmem:[%s5993_s1 + $0x138] sm:$0xff]   ;;  %v3575_v19 = vld [vmem:[%s5993_s1 + $0x140] sm:$0xff]   ;;  %v3574_v20 = vld [vmem:[%s5993_s1 + $0x48] sm:$0xff]  }
  0x13   : > { %3395 = vmatpush3.bf16.msra.mxu0 %v3555_v2  ;;  %3528 = vmatpush3.bf16.msra.mxu1 %v3555_v2  ;;  %v3576_v21 = vld [vmem:[%s5993_s1 + $0x148] sm:$0xff]   ;;  %v3577_v22 = vld [vmem:[%s5993_s1 + $0x50] sm:$0xff]   ;;  %v3578_v24 = vld [vmem:[%s5993_s1 + $0x58] sm:$0xff]  }
  0x14   : > { %3396 = vmatprep.subr.bf16.mxu0 %v3556_v3  ;;  %3527 = vmatprep.subr.bf16.mxu1 %v3556_v3  ;;  %v3579_v23 = vld [vmem:[%s5993_s1 + $0x150] sm:$0xff]   ;;  %v3580_v25 = vld [vmem:[%s5993_s1 + $0x158] sm:$0xff]   ;;  %v3581_v26 = vld [vmem:[%s5993_s1 + $0x60] sm:$0xff]  }
  0x15   : > { %v3583_v27 = vld [vmem:[%s5993_s1 + $0x160] sm:$0xff]   ;;  %v3582_v28 = vld [vmem:[%s5993_s1 + $0x68] sm:$0xff]   ;;  %v3585_v30 = vld [vmem:[%s5993_s1 + $0x70] sm:$0xff]  }
  0x16   : > { %v3584_v29 = vld [vmem:[%s5993_s1 + $0x168] sm:$0xff]   ;;  %v3587_v31 = vld [vmem:[%s5993_s1 + $0x170] sm:$0xff]   ;;  %v3586_v32 = vld [vmem:[%s5993_s1 + $0x78] sm:$0xff]  }
  0x17   : > { %3397 = vmatpush3.bf16.msra.mxu0 %v3556_v3  ;;  %3529 = vmatpush3.bf16.msra.mxu1 %v3556_v3  ;;  %v3588_v33 = vld [vmem:[%s5993_s1 + $0x178] sm:$0xff]   ;;  %v3589_v34 = vld [vmem:[%s5993_s1 + $0x80] sm:$0xff]   ;;  %v3590_v36 = vld [vmem:[%s5993_s1 + $0x88] sm:$0xff]  }
  0x18   : > { %v3591_v35 = vld [vmem:[%s5993_s1 + $0x180] sm:$0xff]   ;;  %v3592_v37 = vld [vmem:[%s5993_s1 + $0x188] sm:$0xff]   ;;  %v3593_v38 = vld [vmem:[%s5993_s1 + $0x90] sm:$0xff]  }
  0x19   : > { %v3594_v39 = vld [vmem:[%s5993_s1 + $0x98] sm:$0xff]   ;;  %v3595_v40 = vld [vmem:[%s5993_s1 + $0x190] sm:$0xff]   ;;  %v3597_v42 = vld [vmem:[%s5993_s1 + $0xa0] sm:$0xff]  }
  0x1a   : > { %3399 = vmatmul.mubr.msk.bf16.vlgmr.msra.gmra.mxu0 %vm933_vm0, %v3559_v4  ;;  %3463 = vmatmul.mubr.msk.bf16.vlgmr.msra.gmra.mxu1 %vm933_vm0, %v3560_v5  ;;  %v3596_v41 = vld [vmem:[%s5993_s1 + $0x198] sm:$0xff]   ;;  %v3598_v43 = vld [vmem:[%s5993_s1 + $0xa8] sm:$0xff]   ;;  %v3599_v44 = vld [vmem:[%s5993_s1 + $0x1a0] sm:$0xff]   ;;  %v3645_v5 = vmov 0.0  }
  0x1b   : > { %3402 = vmatprep.mubr.msk.bf16.mxu0 %vm933_vm0, %v3561_v6  ;;  %3466 = vmatprep.mubr.msk.bf16.mxu1 %vm933_vm0, %v3563_v7  ;;  %v3600_v45 = vld [vmem:[%s5993_s1 + $0x1a8] sm:$0xff]   ;;  %v3601_v46 = vld [vmem:[%s5993_s1 + $0xb0] sm:$0xff]   ;;  %v3602_v47 = vld [vmem:[%s5993_s1 + $0xb8] sm:$0xff]   ;;  %279 = vst.msk [vmem:[%s3950_s9 + $0x210] sm:$0xff] %vm212_vm1, %v3645_v5 }
  0x1c   : > { %v3603_v48 = vld [vmem:[%s5993_s1 + $0x1b0] sm:$0xff]   ;;  %v3604_v49 = vld [vmem:[%s5993_s1 + $0x1b8] sm:$0xff]   ;;  %v3605_v50 = vld [vmem:[%s5993_s1 + $0xc0] sm:$0xff]   ;;  %213 = vst.msk [vmem:[%s3950_s9] sm:$0xff] %vm212_vm1, %v3645_v5 }
  0x1d   : > { %v3606_v51 = vld [vmem:[%s5993_s1 + $0xc8] sm:$0xff]   ;;  %v3607_v52 = vld [vmem:[%s5993_s1 + $0x1c0] sm:$0xff]   ;;  %v3609_v54 = vld [vmem:[%s5993_s1 + $0xd0] sm:$0xff]   ;;  %214 = vst.msk [vmem:[%s3950_s9 + $0x8] sm:$0xff] %vm212_vm1, %v3645_v5 }
  0x1e   : > { %v3608_v53 = vld [vmem:[%s5993_s1 + $0x1c8] sm:$0xff]   ;;  %v3610_v55 = vld [vmem:[%s5993_s1 + $0xd8] sm:$0xff]   ;;  %v3611_v56 = vld [vmem:[%s5993_s1 + $0x1d0] sm:$0xff]   ;;  %215 = vst.msk [vmem:[%s3950_s9 + $0x10] sm:$0xff] %vm212_vm1, %v3645_v5 }
  0x1f   : > { %v3612_v57 = vld [vmem:[%s5993_s1 + $0x1d8] sm:$0xff]   ;;  %v3613_v58 = vld [vmem:[%s5993_s1 + $0xe0] sm:$0xff]   ;;  %v3614_v59 = vld [vmem:[%s5993_s1 + $0xe8] sm:$0xff]   ;;  %216 = vst.msk [vmem:[%s3950_s9 + $0x18] sm:$0xff] %vm212_vm1, %v3645_v5 }
  0x20   : > { %v3615_v60 = vld [vmem:[%s5993_s1 + $0x1e0] sm:$0xff]   ;;  %v3616_v61 = vld [vmem:[%s5993_s1 + $0x1e8] sm:$0xff]   ;;  %v3617_v62 = vld [vmem:[%s5993_s1 + $0xf0] sm:$0xff]   ;;  %217 = vst.msk [vmem:[%s3950_s9 + $0x20] sm:$0xff] %vm212_vm1, %v3645_v5 }
  0x21   : > { %v3618_v63 = vld [vmem:[%s5993_s1 + $0xf8] sm:$0xff]   ;;  %v3619_v0 = vld [vmem:[%s5993_s1 + $0x1f0] sm:$0xff]   ;;  %218 = vst.msk [vmem:[%s3950_s9 + $0x28] sm:$0xff] %vm212_vm1, %v3645_v5  ;;  %219 = vst.msk [vmem:[%s3950_s9 + $0x30] sm:$0xff] %vm212_vm1, %v3645_v5 }
  0x22   : > { %3403 = vmatmul.mubr.msk.bf16.gmra.mxu0 %vm933_vm0, %v3562_v8  ;;  %3467 = vmatmul.mubr.msk.bf16.gmra.mxu1 %vm933_vm0, %v3564_v9  ;;  %v3620_v1 = vld [vmem:[%s5993_s1 + $0x1f8] sm:$0xff]   ;;  %220 = vst.msk [vmem:[%s3950_s9 + $0x38] sm:$0xff] %vm212_vm1, %v3645_v5  ;;  %221 = vst.msk [vmem:[%s3950_s9 + $0x40] sm:$0xff] %vm212_vm1, %v3645_v5 }
  0x23   : > { %3406 = vmatprep.mubr.msk.bf16.mxu0 %vm933_vm0, %v3565_v10  ;;  %3470 = vmatprep.mubr.msk.bf16.mxu1 %vm933_vm0, %v3567_v11  ;;  %222 = vst.msk [vmem:[%s3950_s9 + $0x48] sm:$0xff] %vm212_vm1, %v3645_v5  ;;  %223 = vst.msk [vmem:[%s3950_s9 + $0x50] sm:$0xff] %vm212_vm1, %v3645_v5 }
  0x24   : > { %224 = vst.msk [vmem:[%s3950_s9 + $0x58] sm:$0xff] %vm212_vm1, %v3645_v5  ;;  %225 = vst.msk [vmem:[%s3950_s9 + $0x60] sm:$0xff] %vm212_vm1, %v3645_v5 }
  0x25   : > { %226 = vst.msk [vmem:[%s3950_s9 + $0x68] sm:$0xff] %vm212_vm1, %v3645_v5  ;;  %227 = vst.msk [vmem:[%s3950_s9 + $0x70] sm:$0xff] %vm212_vm1, %v3645_v5 }
  0x26   : > { %228 = vst.msk [vmem:[%s3950_s9 + $0x78] sm:$0xff] %vm212_vm1, %v3645_v5  ;;  %229 = vst.msk [vmem:[%s3950_s9 + $0x80] sm:$0xff] %vm212_vm1, %v3645_v5 }
  0x27   : > { %230 = vst.msk [vmem:[%s3950_s9 + $0x88] sm:$0xff] %vm212_vm1, %v3645_v5  ;;  %231 = vst.msk [vmem:[%s3950_s9 + $0x90] sm:$0xff] %vm212_vm1, %v3645_v5 }
  0x28   : > { %232 = vst.msk [vmem:[%s3950_s9 + $0x98] sm:$0xff] %vm212_vm1, %v3645_v5  ;;  %233 = vst.msk [vmem:[%s3950_s9 + $0xa0] sm:$0xff] %vm212_vm1, %v3645_v5 }
  0x29   : > { %234 = vst.msk [vmem:[%s3950_s9 + $0xa8] sm:$0xff] %vm212_vm1, %v3645_v5  ;;  %235 = vst.msk [vmem:[%s3950_s9 + $0xb0] sm:$0xff] %vm212_vm1, %v3645_v5 }
  0x2a   : > { %3407 = vmatmul.mubr.msk.bf16.gmra.mxu0 %vm933_vm0, %v3566_v12  ;;  %3471 = vmatmul.mubr.msk.bf16.gmra.mxu1 %vm933_vm0, %v3568_v13  ;;  %236 = vst.msk [vmem:[%s3950_s9 + $0xb8] sm:$0xff] %vm212_vm1, %v3645_v5  ;;  %237 = vst.msk [vmem:[%s3950_s9 + $0xc0] sm:$0xff] %vm212_vm1, %v3645_v5 }
  0x2b   : > { %3410 = vmatprep.mubr.msk.bf16.mxu0 %vm933_vm0, %v3569_v14  ;;  %3474 = vmatprep.mubr.msk.bf16.mxu1 %vm933_vm0, %v3571_v15  ;;  %238 = vst.msk [vmem:[%s3950_s9 + $0xc8] sm:$0xff] %vm212_vm1, %v3645_v5  ;;  %239 = vst.msk [vmem:[%s3950_s9 + $0xd0] sm:$0xff] %vm212_vm1, %v3645_v5 }
  0x2c   : > { %240 = vst.msk [vmem:[%s3950_s9 + $0xd8] sm:$0xff] %vm212_vm1, %v3645_v5  ;;  %241 = vst.msk [vmem:[%s3950_s9 + $0xe0] sm:$0xff] %vm212_vm1, %v3645_v5 }
  0x2d   : > { %242 = vst.msk [vmem:[%s3950_s9 + $0xe8] sm:$0xff] %vm212_vm1, %v3645_v5  ;;  %243 = vst.msk [vmem:[%s3950_s9 + $0xf0] sm:$0xff] %vm212_vm1, %v3645_v5 }
  0x2e   : > { %244 = vst.msk [vmem:[%s3950_s9 + $0xf8] sm:$0xff] %vm212_vm1, %v3645_v5  ;;  %245 = vst.msk [vmem:[%s3950_s9 + $0x100] sm:$0xff] %vm212_vm1, %v3645_v5 }
  0x2f   : > { %246 = vst.msk [vmem:[%s3950_s9 + $0x108] sm:$0xff] %vm212_vm1, %v3645_v5  ;;  %247 = vst.msk [vmem:[%s3950_s9 + $0x110] sm:$0xff] %vm212_vm1, %v3645_v5 }
  0x30   : > { %248 = vst.msk [vmem:[%s3950_s9 + $0x118] sm:$0xff] %vm212_vm1, %v3645_v5  ;;  %249 = vst.msk [vmem:[%s3950_s9 + $0x120] sm:$0xff] %vm212_vm1, %v3645_v5 }
  0x31   : > { %250 = vst.msk [vmem:[%s3950_s9 + $0x128] sm:$0xff] %vm212_vm1, %v3645_v5  ;;  %251 = vst.msk [vmem:[%s3950_s9 + $0x130] sm:$0xff] %vm212_vm1, %v3645_v5 }
  0x32   : > { %3411 = vmatmul.mubr.msk.bf16.gmra.mxu0 %vm933_vm0, %v3570_v16  ;;  %3475 = vmatmul.mubr.msk.bf16.gmra.mxu1 %vm933_vm0, %v3572_v17  ;;  %252 = vst.msk [vmem:[%s3950_s9 + $0x138] sm:$0xff] %vm212_vm1, %v3645_v5  ;;  %253 = vst.msk [vmem:[%s3950_s9 + $0x140] sm:$0xff] %vm212_vm1, %v3645_v5 }
  0x33   : > { %3414 = vmatprep.mubr.msk.bf16.mxu0 %vm933_vm0, %v3573_v18  ;;  %3478 = vmatprep.mubr.msk.bf16.mxu1 %vm933_vm0, %v3575_v19  ;;  %254 = vst.msk [vmem:[%s3950_s9 + $0x148] sm:$0xff] %vm212_vm1, %v3645_v5  ;;  %255 = vst.msk [vmem:[%s3950_s9 + $0x150] sm:$0xff] %vm212_vm1, %v3645_v5 }
  0x34   : > { %256 = vst.msk [vmem:[%s3950_s9 + $0x158] sm:$0xff] %vm212_vm1, %v3645_v5  ;;  %257 = vst.msk [vmem:[%s3950_s9 + $0x160] sm:$0xff] %vm212_vm1, %v3645_v5 }
  0x35   : > { %258 = vst.msk [vmem:[%s3950_s9 + $0x168] sm:$0xff] %vm212_vm1, %v3645_v5  ;;  %259 = vst.msk [vmem:[%s3950_s9 + $0x170] sm:$0xff] %vm212_vm1, %v3645_v5 }
  0x36   : > { %260 = vst.msk [vmem:[%s3950_s9 + $0x178] sm:$0xff] %vm212_vm1, %v3645_v5  ;;  %261 = vst.msk [vmem:[%s3950_s9 + $0x180] sm:$0xff] %vm212_vm1, %v3645_v5 }
  0x37   : > { %262 = vst.msk [vmem:[%s3950_s9 + $0x188] sm:$0xff] %vm212_vm1, %v3645_v5  ;;  %263 = vst.msk [vmem:[%s3950_s9 + $0x190] sm:$0xff] %vm212_vm1, %v3645_v5 }
  0x38   : > { %264 = vst.msk [vmem:[%s3950_s9 + $0x198] sm:$0xff] %vm212_vm1, %v3645_v5  ;;  %265 = vst.msk [vmem:[%s3950_s9 + $0x1a0] sm:$0xff] %vm212_vm1, %v3645_v5 }
  0x39   : > { %266 = vst.msk [vmem:[%s3950_s9 + $0x1a8] sm:$0xff] %vm212_vm1, %v3645_v5  ;;  %267 = vst.msk [vmem:[%s3950_s9 + $0x1b0] sm:$0xff] %vm212_vm1, %v3645_v5 }
  0x3a   : > { %3415 = vmatmul.mubr.msk.bf16.gmra.mxu0 %vm933_vm0, %v3574_v20  ;;  %3479 = vmatmul.mubr.msk.bf16.gmra.mxu1 %vm933_vm0, %v3576_v21  ;;  %268 = vst.msk [vmem:[%s3950_s9 + $0x1b8] sm:$0xff] %vm212_vm1, %v3645_v5  ;;  %269 = vst.msk [vmem:[%s3950_s9 + $0x1c0] sm:$0xff] %vm212_vm1, %v3645_v5 }
  0x3b   : > { %3418 = vmatprep.mubr.msk.bf16.mxu0 %vm933_vm0, %v3577_v22  ;;  %3482 = vmatprep.mubr.msk.bf16.mxu1 %vm933_vm0, %v3579_v23  ;;  %270 = vst.msk [vmem:[%s3950_s9 + $0x1c8] sm:$0xff] %vm212_vm1, %v3645_v5  ;;  %271 = vst.msk [vmem:[%s3950_s9 + $0x1d0] sm:$0xff] %vm212_vm1, %v3645_v5 }
  0x3c   : > { %272 = vst.msk [vmem:[%s3950_s9 + $0x1d8] sm:$0xff] %vm212_vm1, %v3645_v5  ;;  %273 = vst.msk [vmem:[%s3950_s9 + $0x1e0] sm:$0xff] %vm212_vm1, %v3645_v5 }
  0x3d   : > { %274 = vst.msk [vmem:[%s3950_s9 + $0x1e8] sm:$0xff] %vm212_vm1, %v3645_v5  ;;  %275 = vst.msk [vmem:[%s3950_s9 + $0x1f0] sm:$0xff] %vm212_vm1, %v3645_v5 }
  0x3e   : > { %276 = vst.msk [vmem:[%s3950_s9 + $0x1f8] sm:$0xff] %vm212_vm1, %v3645_v5  ;;  %277 = vst.msk [vmem:[%s3950_s9 + $0x200] sm:$0xff] %vm212_vm1, %v3645_v5 }
  0x3f   : > { %278 = vst.msk [vmem:[%s3950_s9 + $0x208] sm:$0xff] %vm212_vm1, %v3645_v5  ;;  %280 = vst.msk [vmem:[%s3950_s9 + $0x218] sm:$0xff] %vm212_vm1, %v3645_v5 }
  0x40   : > { %281 = vst.msk [vmem:[%s3950_s9 + $0x220] sm:$0xff] %vm212_vm1, %v3645_v5  ;;  %282 = vst.msk [vmem:[%s3950_s9 + $0x228] sm:$0xff] %vm212_vm1, %v3645_v5 }
  0x41   : > { %283 = vst.msk [vmem:[%s3950_s9 + $0x230] sm:$0xff] %vm212_vm1, %v3645_v5  ;;  %284 = vst.msk [vmem:[%s3950_s9 + $0x238] sm:$0xff] %vm212_vm1, %v3645_v5 }
  0x42   : > { %3419 = vmatmul.mubr.msk.bf16.gmra.mxu0 %vm933_vm0, %v3578_v24  ;;  %3483 = vmatmul.mubr.msk.bf16.gmra.mxu1 %vm933_vm0, %v3580_v25  ;;  %285 = vst.msk [vmem:[%s3950_s9 + $0x240] sm:$0xff] %vm212_vm1, %v3645_v5  ;;  %286 = vst.msk [vmem:[%s3950_s9 + $0x248] sm:$0xff] %vm212_vm1, %v3645_v5 }
  0x43   : > { %3422 = vmatprep.mubr.msk.bf16.mxu0 %vm933_vm0, %v3581_v26  ;;  %3486 = vmatprep.mubr.msk.bf16.mxu1 %vm933_vm0, %v3583_v27  ;;  %287 = vst.msk [vmem:[%s3950_s9 + $0x250] sm:$0xff] %vm212_vm1, %v3645_v5  ;;  %288 = vst.msk [vmem:[%s3950_s9 + $0x258] sm:$0xff] %vm212_vm1, %v3645_v5 }
  0x44   : > { %289 = vst.msk [vmem:[%s3950_s9 + $0x260] sm:$0xff] %vm212_vm1, %v3645_v5  ;;  %290 = vst.msk [vmem:[%s3950_s9 + $0x268] sm:$0xff] %vm212_vm1, %v3645_v5 }
  0x45   : > { %291 = vst.msk [vmem:[%s3950_s9 + $0x270] sm:$0xff] %vm212_vm1, %v3645_v5  ;;  %292 = vst.msk [vmem:[%s3950_s9 + $0x278] sm:$0xff] %vm212_vm1, %v3645_v5 }
  0x46   : > { %293 = vst.msk [vmem:[%s3950_s9 + $0x280] sm:$0xff] %vm212_vm1, %v3645_v5  ;;  %294 = vst.msk [vmem:[%s3950_s9 + $0x288] sm:$0xff] %vm212_vm1, %v3645_v5 }
  0x47   : > { %295 = vst.msk [vmem:[%s3950_s9 + $0x290] sm:$0xff] %vm212_vm1, %v3645_v5  ;;  %296 = vst.msk [vmem:[%s3950_s9 + $0x298] sm:$0xff] %vm212_vm1, %v3645_v5 }
  0x48   : > { %297 = vst.msk [vmem:[%s3950_s9 + $0x2a0] sm:$0xff] %vm212_vm1, %v3645_v5  ;;  %298 = vst.msk [vmem:[%s3950_s9 + $0x2a8] sm:$0xff] %vm212_vm1, %v3645_v5 }
  0x49   : > { %299 = vst.msk [vmem:[%s3950_s9 + $0x2b0] sm:$0xff] %vm212_vm1, %v3645_v5  ;;  %300 = vst.msk [vmem:[%s3950_s9 + $0x2b8] sm:$0xff] %vm212_vm1, %v3645_v5 }
  0x4a   : > { %3423 = vmatmul.mubr.msk.bf16.gmra.mxu0 %vm933_vm0, %v3582_v28  ;;  %3487 = vmatmul.mubr.msk.bf16.gmra.mxu1 %vm933_vm0, %v3584_v29  ;;  %301 = vst.msk [vmem:[%s3950_s9 + $0x2c0] sm:$0xff] %vm212_vm1, %v3645_v5  ;;  %302 = vst.msk [vmem:[%s3950_s9 + $0x2c8] sm:$0xff] %vm212_vm1, %v3645_v5 }
  0x4b   : > { %3426 = vmatprep.mubr.msk.bf16.mxu0 %vm933_vm0, %v3585_v30  ;;  %3490 = vmatprep.mubr.msk.bf16.mxu1 %vm933_vm0, %v3587_v31  ;;  %303 = vst.msk [vmem:[%s3950_s9 + $0x2d0] sm:$0xff] %vm212_vm1, %v3645_v5  ;;  %304 = vst.msk [vmem:[%s3950_s9 + $0x2d8] sm:$0xff] %vm212_vm1, %v3645_v5 }
  0x4c   : > { %305 = vst.msk [vmem:[%s3950_s9 + $0x2e0] sm:$0xff] %vm212_vm1, %v3645_v5  ;;  %306 = vst.msk [vmem:[%s3950_s9 + $0x2e8] sm:$0xff] %vm212_vm1, %v3645_v5 }
  0x4d   : > { %307 = vst.msk [vmem:[%s3950_s9 + $0x2f0] sm:$0xff] %vm212_vm1, %v3645_v5  ;;  %308 = vst.msk [vmem:[%s3950_s9 + $0x2f8] sm:$0xff] %vm212_vm1, %v3645_v5 }
  0x4e   : > { %309 = vst.msk [vmem:[%s3950_s9 + $0x300] sm:$0xff] %vm212_vm1, %v3645_v5  ;;  %310 = vst.msk [vmem:[%s3950_s9 + $0x308] sm:$0xff] %vm212_vm1, %v3645_v5 }
  0x4f   : > { %311 = vst.msk [vmem:[%s3950_s9 + $0x310] sm:$0xff] %vm212_vm1, %v3645_v5  ;;  %312 = vst.msk [vmem:[%s3950_s9 + $0x318] sm:$0xff] %vm212_vm1, %v3645_v5 }
  0x50   : > { %313 = vst.msk [vmem:[%s3950_s9 + $0x320] sm:$0xff] %vm212_vm1, %v3645_v5  ;;  %314 = vst.msk [vmem:[%s3950_s9 + $0x328] sm:$0xff] %vm212_vm1, %v3645_v5 }
  0x51   : > { %315 = vst.msk [vmem:[%s3950_s9 + $0x330] sm:$0xff] %vm212_vm1, %v3645_v5  ;;  %316 = vst.msk [vmem:[%s3950_s9 + $0x338] sm:$0xff] %vm212_vm1, %v3645_v5 }
  0x52   : > { %3427 = vmatmul.mubr.msk.bf16.gmra.mxu0 %vm933_vm0, %v3586_v32  ;;  %3491 = vmatmul.mubr.msk.bf16.gmra.mxu1 %vm933_vm0, %v3588_v33  ;;  %317 = vst.msk [vmem:[%s3950_s9 + $0x340] sm:$0xff] %vm212_vm1, %v3645_v5  ;;  %318 = vst.msk [vmem:[%s3950_s9 + $0x348] sm:$0xff] %vm212_vm1, %v3645_v5 }
  0x53   : > { %3430 = vmatprep.mubr.msk.bf16.mxu0 %vm933_vm0, %v3589_v34  ;;  %3494 = vmatprep.mubr.msk.bf16.mxu1 %vm933_vm0, %v3591_v35  ;;  %319 = vst.msk [vmem:[%s3950_s9 + $0x350] sm:$0xff] %vm212_vm1, %v3645_v5  ;;  %320 = vst.msk [vmem:[%s3950_s9 + $0x358] sm:$0xff] %vm212_vm1, %v3645_v5 }
  0x54   : > { %321 = vst.msk [vmem:[%s3950_s9 + $0x360] sm:$0xff] %vm212_vm1, %v3645_v5  ;;  %322 = vst.msk [vmem:[%s3950_s9 + $0x368] sm:$0xff] %vm212_vm1, %v3645_v5 }
  0x55   : > { %323 = vst.msk [vmem:[%s3950_s9 + $0x370] sm:$0xff] %vm212_vm1, %v3645_v5  ;;  %324 = vst.msk [vmem:[%s3950_s9 + $0x378] sm:$0xff] %vm212_vm1, %v3645_v5 }
  0x56   : > { %325 = vst.msk [vmem:[%s3950_s9 + $0x380] sm:$0xff] %vm212_vm1, %v3645_v5  ;;  %326 = vst.msk [vmem:[%s3950_s9 + $0x388] sm:$0xff] %vm212_vm1, %v3645_v5 }
  0x57   : > { %327 = vst.msk [vmem:[%s3950_s9 + $0x390] sm:$0xff] %vm212_vm1, %v3645_v5  ;;  %328 = vst.msk [vmem:[%s3950_s9 + $0x398] sm:$0xff] %vm212_vm1, %v3645_v5 }
  0x58   : > { %329 = vst.msk [vmem:[%s3950_s9 + $0x3a0] sm:$0xff] %vm212_vm1, %v3645_v5  ;;  %330 = vst.msk [vmem:[%s3950_s9 + $0x3a8] sm:$0xff] %vm212_vm1, %v3645_v5 }
  0x59   : > { %331 = vst.msk [vmem:[%s3950_s9 + $0x3b0] sm:$0xff] %vm212_vm1, %v3645_v5  ;;  %332 = vst.msk [vmem:[%s3950_s9 + $0x3b8] sm:$0xff] %vm212_vm1, %v3645_v5 }
  0x5a   : > { %3431 = vmatmul.mubr.msk.bf16.gmra.mxu0 %vm933_vm0, %v3590_v36  ;;  %3495 = vmatmul.mubr.msk.bf16.gmra.mxu1 %vm933_vm0, %v3592_v37  ;;  %333 = vst.msk [vmem:[%s3950_s9 + $0x3c0] sm:$0xff] %vm212_vm1, %v3645_v5  ;;  %334 = vst.msk [vmem:[%s3950_s9 + $0x3c8] sm:$0xff] %vm212_vm1, %v3645_v5 }
  0x5b   : > { %3434 = vmatprep.mubr.msk.bf16.mxu0 %vm933_vm0, %v3593_v38  ;;  %3498 = vmatprep.mubr.msk.bf16.mxu1 %vm933_vm0, %v3595_v40  ;;  %335 = vst.msk [vmem:[%s3950_s9 + $0x3d0] sm:$0xff] %vm212_vm1, %v3645_v5  ;;  %336 = vst.msk [vmem:[%s3950_s9 + $0x3d8] sm:$0xff] %vm212_vm1, %v3645_v5 }
  0x5c   : > { %337 = vst.msk [vmem:[%s3950_s9 + $0x3e0] sm:$0xff] %vm212_vm1, %v3645_v5  ;;  %338 = vst.msk [vmem:[%s3950_s9 + $0x3e8] sm:$0xff] %vm212_vm1, %v3645_v5 }
  0x5d   : > { %339 = vst.msk [vmem:[%s3950_s9 + $0x3f0] sm:$0xff] %vm212_vm1, %v3645_v5  ;;  %340 = vst.msk [vmem:[%s3950_s9 + $0x3f8] sm:$0xff] %vm212_vm1, %v3645_v5 }
  0x5e   : > { %341 = vst.msk [vmem:[%s3955_s16] sm:$0xff] %vm212_vm1, %v3645_v5  ;;  %342 = vst.msk [vmem:[%s3955_s16 + $0x8] sm:$0xff] %vm212_vm1, %v3645_v5 }
  0x5f   : > { %343 = vst.msk [vmem:[%s3955_s16 + $0x10] sm:$0xff] %vm212_vm1, %v3645_v5  ;;  %344 = vst.msk [vmem:[%s3955_s16 + $0x18] sm:$0xff] %vm212_vm1, %v3645_v5 }
  0x60   : > { %345 = vst.msk [vmem:[%s3955_s16 + $0x20] sm:$0xff] %vm212_vm1, %v3645_v5  ;;  %346 = vst.msk [vmem:[%s3955_s16 + $0x28] sm:$0xff] %vm212_vm1, %v3645_v5 }
  0x61   : > { %347 = vst.msk [vmem:[%s3955_s16 + $0x30] sm:$0xff] %vm212_vm1, %v3645_v5  ;;  %348 = vst.msk [vmem:[%s3955_s16 + $0x38] sm:$0xff] %vm212_vm1, %v3645_v5 }
  0x62   : > { %3435 = vmatmul.mubr.msk.bf16.gmra.mxu0 %vm933_vm0, %v3594_v39  ;;  %3499 = vmatmul.mubr.msk.bf16.gmra.mxu1 %vm933_vm0, %v3596_v41  ;;  %349 = vst.msk [vmem:[%s3955_s16 + $0x40] sm:$0xff] %vm212_vm1, %v3645_v5  ;;  %350 = vst.msk [vmem:[%s3955_s16 + $0x48] sm:$0xff] %vm212_vm1, %v3645_v5 }
  0x63   : > { %3438 = vmatprep.mubr.msk.bf16.mxu0 %vm933_vm0, %v3597_v42  ;;  %3502 = vmatprep.mubr.msk.bf16.mxu1 %vm933_vm0, %v3599_v44  ;;  %351 = vst.msk [vmem:[%s3955_s16 + $0x50] sm:$0xff] %vm212_vm1, %v3645_v5  ;;  %352 = vst.msk [vmem:[%s3955_s16 + $0x58] sm:$0xff] %vm212_vm1, %v3645_v5 }
  0x64   : > { %353 = vst.msk [vmem:[%s3955_s16 + $0x60] sm:$0xff] %vm212_vm1, %v3645_v5  ;;  %354 = vst.msk [vmem:[%s3955_s16 + $0x68] sm:$0xff] %vm212_vm1, %v3645_v5 }
  0x65   : > { %355 = vst.msk [vmem:[%s3955_s16 + $0x70] sm:$0xff] %vm212_vm1, %v3645_v5  ;;  %356 = vst.msk [vmem:[%s3955_s16 + $0x78] sm:$0xff] %vm212_vm1, %v3645_v5 }
  0x66   : > { %357 = vst.msk [vmem:[%s3955_s16 + $0x80] sm:$0xff] %vm212_vm1, %v3645_v5  ;;  %358 = vst.msk [vmem:[%s3955_s16 + $0x88] sm:$0xff] %vm212_vm1, %v3645_v5 }
  0x67   : > { %359 = vst.msk [vmem:[%s3955_s16 + $0x90] sm:$0xff] %vm212_vm1, %v3645_v5  ;;  %360 = vst.msk [vmem:[%s3955_s16 + $0x98] sm:$0xff] %vm212_vm1, %v3645_v5 }
  0x68   : > { %361 = vst.msk [vmem:[%s3955_s16 + $0xa0] sm:$0xff] %vm212_vm1, %v3645_v5  ;;  %362 = vst.msk [vmem:[%s3955_s16 + $0xa8] sm:$0xff] %vm212_vm1, %v3645_v5 }
  0x69   : > { %363 = vst.msk [vmem:[%s3955_s16 + $0xb0] sm:$0xff] %vm212_vm1, %v3645_v5  ;;  %364 = vst.msk [vmem:[%s3955_s16 + $0xb8] sm:$0xff] %vm212_vm1, %v3645_v5 }
  0x6a   : > { %3439 = vmatmul.mubr.msk.bf16.gmra.mxu0 %vm933_vm0, %v3598_v43  ;;  %3503 = vmatmul.mubr.msk.bf16.gmra.mxu1 %vm933_vm0, %v3600_v45  ;;  %365 = vst.msk [vmem:[%s3955_s16 + $0xc0] sm:$0xff] %vm212_vm1, %v3645_v5  ;;  %366 = vst.msk [vmem:[%s3955_s16 + $0xc8] sm:$0xff] %vm212_vm1, %v3645_v5 }
  0x6b   : > { %3442 = vmatprep.mubr.msk.bf16.mxu0 %vm933_vm0, %v3601_v46  ;;  %3506 = vmatprep.mubr.msk.bf16.mxu1 %vm933_vm0, %v3603_v48  ;;  %367 = vst.msk [vmem:[%s3955_s16 + $0xd0] sm:$0xff] %vm212_vm1, %v3645_v5  ;;  %368 = vst.msk [vmem:[%s3955_s16 + $0xd8] sm:$0xff] %vm212_vm1, %v3645_v5 }
  0x6c   : > { %369 = vst.msk [vmem:[%s3955_s16 + $0xe0] sm:$0xff] %vm212_vm1, %v3645_v5  ;;  %370 = vst.msk [vmem:[%s3955_s16 + $0xe8] sm:$0xff] %vm212_vm1, %v3645_v5 }
  0x6d   : > { %371 = vst.msk [vmem:[%s3955_s16 + $0xf0] sm:$0xff] %vm212_vm1, %v3645_v5  ;;  %372 = vst.msk [vmem:[%s3955_s16 + $0xf8] sm:$0xff] %vm212_vm1, %v3645_v5 }
  0x6e   : > { %373 = vst.msk [vmem:[%s3955_s16 + $0x100] sm:$0xff] %vm212_vm1, %v3645_v5  ;;  %374 = vst.msk [vmem:[%s3955_s16 + $0x108] sm:$0xff] %vm212_vm1, %v3645_v5 }
  0x6f   : > { %375 = vst.msk [vmem:[%s3955_s16 + $0x110] sm:$0xff] %vm212_vm1, %v3645_v5  ;;  %376 = vst.msk [vmem:[%s3955_s16 + $0x118] sm:$0xff] %vm212_vm1, %v3645_v5 }
  0x70   : > { %377 = vst.msk [vmem:[%s3955_s16 + $0x120] sm:$0xff] %vm212_vm1, %v3645_v5  ;;  %378 = vst.msk [vmem:[%s3955_s16 + $0x128] sm:$0xff] %vm212_vm1, %v3645_v5 }
  0x71   : > { %379 = vst.msk [vmem:[%s3955_s16 + $0x130] sm:$0xff] %vm212_vm1, %v3645_v5  ;;  %380 = vst.msk [vmem:[%s3955_s16 + $0x138] sm:$0xff] %vm212_vm1, %v3645_v5 }
  0x72   : > { %3443 = vmatmul.mubr.msk.bf16.gmra.mxu0 %vm933_vm0, %v3602_v47  ;;  %3507 = vmatmul.mubr.msk.bf16.gmra.mxu1 %vm933_vm0, %v3604_v49  ;;  %381 = vst.msk [vmem:[%s3955_s16 + $0x140] sm:$0xff] %vm212_vm1, %v3645_v5  ;;  %382 = vst.msk [vmem:[%s3955_s16 + $0x148] sm:$0xff] %vm212_vm1, %v3645_v5 }
  0x73   : > { %3446 = vmatprep.mubr.msk.bf16.mxu0 %vm933_vm0, %v3605_v50  ;;  %3510 = vmatprep.mubr.msk.bf16.mxu1 %vm933_vm0, %v3607_v52  ;;  %383 = vst.msk [vmem:[%s3955_s16 + $0x150] sm:$0xff] %vm212_vm1, %v3645_v5  ;;  %384 = vst.msk [vmem:[%s3955_s16 + $0x158] sm:$0xff] %vm212_vm1, %v3645_v5 }
  0x74   : > { %385 = vst.msk [vmem:[%s3955_s16 + $0x160] sm:$0xff] %vm212_vm1, %v3645_v5  ;;  %386 = vst.msk [vmem:[%s3955_s16 + $0x168] sm:$0xff] %vm212_vm1, %v3645_v5 }
  0x75   : > { %387 = vst.msk [vmem:[%s3955_s16 + $0x170] sm:$0xff] %vm212_vm1, %v3645_v5  ;;  %388 = vst.msk [vmem:[%s3955_s16 + $0x178] sm:$0xff] %vm212_vm1, %v3645_v5 }
  0x76   : > { %389 = vst.msk [vmem:[%s3955_s16 + $0x180] sm:$0xff] %vm212_vm1, %v3645_v5  ;;  %390 = vst.msk [vmem:[%s3955_s16 + $0x188] sm:$0xff] %vm212_vm1, %v3645_v5 }
  0x77   : > { %391 = vst.msk [vmem:[%s3955_s16 + $0x190] sm:$0xff] %vm212_vm1, %v3645_v5  ;;  %392 = vst.msk [vmem:[%s3955_s16 + $0x198] sm:$0xff] %vm212_vm1, %v3645_v5 }
  0x78   : > { %393 = vst.msk [vmem:[%s3955_s16 + $0x1a0] sm:$0xff] %vm212_vm1, %v3645_v5  ;;  %394 = vst.msk [vmem:[%s3955_s16 + $0x1a8] sm:$0xff] %vm212_vm1, %v3645_v5 }
  0x79   : > { %395 = vst.msk [vmem:[%s3955_s16 + $0x1b0] sm:$0xff] %vm212_vm1, %v3645_v5  ;;  %396 = vst.msk [vmem:[%s3955_s16 + $0x1b8] sm:$0xff] %vm212_vm1, %v3645_v5 }
  0x7a   : > { %3447 = vmatmul.mubr.msk.bf16.gmra.mxu0 %vm933_vm0, %v3606_v51  ;;  %3511 = vmatmul.mubr.msk.bf16.gmra.mxu1 %vm933_vm0, %v3608_v53  ;;  %397 = vst.msk [vmem:[%s3955_s16 + $0x1c0] sm:$0xff] %vm212_vm1, %v3645_v5  ;;  %398 = vst.msk [vmem:[%s3955_s16 + $0x1c8] sm:$0xff] %vm212_vm1, %v3645_v5 }
  0x7b   : > { %3450 = vmatprep.mubr.msk.bf16.mxu0 %vm933_vm0, %v3609_v54  ;;  %3514 = vmatprep.mubr.msk.bf16.mxu1 %vm933_vm0, %v3611_v56  ;;  %399 = vst.msk [vmem:[%s3955_s16 + $0x1d0] sm:$0xff] %vm212_vm1, %v3645_v5  ;;  %400 = vst.msk [vmem:[%s3955_s16 + $0x1d8] sm:$0xff] %vm212_vm1, %v3645_v5 }
  0x7c   : > { %401 = vst.msk [vmem:[%s3955_s16 + $0x1e0] sm:$0xff] %vm212_vm1, %v3645_v5  ;;  %402 = vst.msk [vmem:[%s3955_s16 + $0x1e8] sm:$0xff] %vm212_vm1, %v3645_v5 }
  0x7d   : > { %403 = vst.msk [vmem:[%s3955_s16 + $0x1f0] sm:$0xff] %vm212_vm1, %v3645_v5  ;;  %404 = vst.msk [vmem:[%s3955_s16 + $0x1f8] sm:$0xff] %vm212_vm1, %v3645_v5 }
  0x7e   : > { %405 = vst.msk [vmem:[%s3955_s16 + $0x200] sm:$0xff] %vm212_vm1, %v3645_v5  ;;  %406 = vst.msk [vmem:[%s3955_s16 + $0x208] sm:$0xff] %vm212_vm1, %v3645_v5 }
  0x7f   : > { %407 = vst.msk [vmem:[%s3955_s16 + $0x210] sm:$0xff] %vm212_vm1, %v3645_v5  ;;  %408 = vst.msk [vmem:[%s3955_s16 + $0x218] sm:$0xff] %vm212_vm1, %v3645_v5 }
  0x80   : > { %409 = vst.msk [vmem:[%s3955_s16 + $0x220] sm:$0xff] %vm212_vm1, %v3645_v5  ;;  %410 = vst.msk [vmem:[%s3955_s16 + $0x228] sm:$0xff] %vm212_vm1, %v3645_v5 }
  0x81   : > { %411 = vst.msk [vmem:[%s3955_s16 + $0x230] sm:$0xff] %vm212_vm1, %v3645_v5  ;;  %412 = vst.msk [vmem:[%s3955_s16 + $0x238] sm:$0xff] %vm212_vm1, %v3645_v5 }
  0x82   : > { %3451 = vmatmul.mubr.msk.bf16.gmra.mxu0 %vm933_vm0, %v3610_v55  ;;  %3515 = vmatmul.mubr.msk.bf16.gmra.mxu1 %vm933_vm0, %v3612_v57  ;;  %413 = vst.msk [vmem:[%s3955_s16 + $0x240] sm:$0xff] %vm212_vm1, %v3645_v5  ;;  %414 = vst.msk [vmem:[%s3955_s16 + $0x248] sm:$0xff] %vm212_vm1, %v3645_v5 }
  0x83   : > { %3454 = vmatprep.mubr.msk.bf16.mxu0 %vm933_vm0, %v3613_v58  ;;  %3518 = vmatprep.mubr.msk.bf16.mxu1 %vm933_vm0, %v3615_v60  ;;  %415 = vst.msk [vmem:[%s3955_s16 + $0x250] sm:$0xff] %vm212_vm1, %v3645_v5  ;;  %416 = vst.msk [vmem:[%s3955_s16 + $0x258] sm:$0xff] %vm212_vm1, %v3645_v5 }
  0x84   : > { %417 = vst.msk [vmem:[%s3955_s16 + $0x260] sm:$0xff] %vm212_vm1, %v3645_v5  ;;  %418 = vst.msk [vmem:[%s3955_s16 + $0x268] sm:$0xff] %vm212_vm1, %v3645_v5 }
  0x85   : > { %419 = vst.msk [vmem:[%s3955_s16 + $0x270] sm:$0xff] %vm212_vm1, %v3645_v5  ;;  %420 = vst.msk [vmem:[%s3955_s16 + $0x278] sm:$0xff] %vm212_vm1, %v3645_v5 }
  0x86   : > { %421 = vst.msk [vmem:[%s3955_s16 + $0x280] sm:$0xff] %vm212_vm1, %v3645_v5  ;;  %422 = vst.msk [vmem:[%s3955_s16 + $0x288] sm:$0xff] %vm212_vm1, %v3645_v5 }
  0x87   : > { %423 = vst.msk [vmem:[%s3955_s16 + $0x290] sm:$0xff] %vm212_vm1, %v3645_v5  ;;  %424 = vst.msk [vmem:[%s3955_s16 + $0x298] sm:$0xff] %vm212_vm1, %v3645_v5 }
  0x88   : > { %425 = vst.msk [vmem:[%s3955_s16 + $0x2a0] sm:$0xff] %vm212_vm1, %v3645_v5  ;;  %426 = vst.msk [vmem:[%s3955_s16 + $0x2a8] sm:$0xff] %vm212_vm1, %v3645_v5 }
  0x89   : > { %427 = vst.msk [vmem:[%s3955_s16 + $0x2b0] sm:$0xff] %vm212_vm1, %v3645_v5  ;;  %428 = vst.msk [vmem:[%s3955_s16 + $0x2b8] sm:$0xff] %vm212_vm1, %v3645_v5 }
  0x8a   : > { %3455 = vmatmul.mubr.msk.bf16.gmra.mxu0 %vm933_vm0, %v3614_v59  ;;  %3519 = vmatmul.mubr.msk.bf16.gmra.mxu1 %vm933_vm0, %v3616_v61  ;;  %429 = vst.msk [vmem:[%s3955_s16 + $0x2c0] sm:$0xff] %vm212_vm1, %v3645_v5  ;;  %430 = vst.msk [vmem:[%s3955_s16 + $0x2c8] sm:$0xff] %vm212_vm1, %v3645_v5 }
  0x8b   : > { %3458 = vmatprep.mubr.msk.bf16.mxu0 %vm933_vm0, %v3617_v62  ;;  %3522 = vmatprep.mubr.msk.bf16.mxu1 %vm933_vm0, %v3619_v0  ;;  %431 = vst.msk [vmem:[%s3955_s16 + $0x2d0] sm:$0xff] %vm212_vm1, %v3645_v5  ;;  %432 = vst.msk [vmem:[%s3955_s16 + $0x2d8] sm:$0xff] %vm212_vm1, %v3645_v5 }
  0x8c   : > { %433 = vst.msk [vmem:[%s3955_s16 + $0x2e0] sm:$0xff] %vm212_vm1, %v3645_v5  ;;  %434 = vst.msk [vmem:[%s3955_s16 + $0x2e8] sm:$0xff] %vm212_vm1, %v3645_v5 }
  0x8d   : > { %435 = vst.msk [vmem:[%s3955_s16 + $0x2f0] sm:$0xff] %vm212_vm1, %v3645_v5  ;;  %436 = vst.msk [vmem:[%s3955_s16 + $0x2f8] sm:$0xff] %vm212_vm1, %v3645_v5 }
  0x8e   : > { %437 = vst.msk [vmem:[%s3955_s16 + $0x300] sm:$0xff] %vm212_vm1, %v3645_v5  ;;  %438 = vst.msk [vmem:[%s3955_s16 + $0x308] sm:$0xff] %vm212_vm1, %v3645_v5 }
  0x8f   : > { %439 = vst.msk [vmem:[%s3955_s16 + $0x310] sm:$0xff] %vm212_vm1, %v3645_v5  ;;  %440 = vst.msk [vmem:[%s3955_s16 + $0x318] sm:$0xff] %vm212_vm1, %v3645_v5 }
  0x90   : > { %441 = vst.msk [vmem:[%s3955_s16 + $0x320] sm:$0xff] %vm212_vm1, %v3645_v5  ;;  %442 = vst.msk [vmem:[%s3955_s16 + $0x328] sm:$0xff] %vm212_vm1, %v3645_v5 }
  0x91   : > { %443 = vst.msk [vmem:[%s3955_s16 + $0x330] sm:$0xff] %vm212_vm1, %v3645_v5  ;;  %444 = vst.msk [vmem:[%s3955_s16 + $0x338] sm:$0xff] %vm212_vm1, %v3645_v5 }
  0x92   : > { %3459 = vmatmul.mubr.msk.bf16.gmra.mxu0 %vm933_vm0, %v3618_v63  ;;  %3523 = vmatmul.mubr.msk.bf16.gmra.mxu1 %vm933_vm0, %v3620_v1  ;;  %445 = vst.msk [vmem:[%s3955_s16 + $0x340] sm:$0xff] %vm212_vm1, %v3645_v5  ;;  %446 = vst.msk [vmem:[%s3955_s16 + $0x348] sm:$0xff] %vm212_vm1, %v3645_v5 }
  0x93   : > { %447 = vst.msk [vmem:[%s3955_s16 + $0x350] sm:$0xff] %vm212_vm1, %v3645_v5  ;;  %448 = vst.msk [vmem:[%s3955_s16 + $0x358] sm:$0xff] %vm212_vm1, %v3645_v5 }
  0x94   : > { %449 = vst.msk [vmem:[%s3955_s16 + $0x360] sm:$0xff] %vm212_vm1, %v3645_v5  ;;  %450 = vst.msk [vmem:[%s3955_s16 + $0x368] sm:$0xff] %vm212_vm1, %v3645_v5 }
  0x95   : > { %451 = vst.msk [vmem:[%s3955_s16 + $0x370] sm:$0xff] %vm212_vm1, %v3645_v5  ;;  %452 = vst.msk [vmem:[%s3955_s16 + $0x378] sm:$0xff] %vm212_vm1, %v3645_v5 }
  0x96   : > { %453 = vst.msk [vmem:[%s3955_s16 + $0x380] sm:$0xff] %vm212_vm1, %v3645_v5  ;;  %454 = vst.msk [vmem:[%s3955_s16 + $0x388] sm:$0xff] %vm212_vm1, %v3645_v5 }
  0x97   : > { %455 = vst.msk [vmem:[%s3955_s16 + $0x390] sm:$0xff] %vm212_vm1, %v3645_v5  ;;  %456 = vst.msk [vmem:[%s3955_s16 + $0x398] sm:$0xff] %vm212_vm1, %v3645_v5 }
  0x98   : > { %457 = vst.msk [vmem:[%s3955_s16 + $0x3a0] sm:$0xff] %vm212_vm1, %v3645_v5  ;;  %458 = vst.msk [vmem:[%s3955_s16 + $0x3a8] sm:$0xff] %vm212_vm1, %v3645_v5 }
  0x99   : > { %459 = vst.msk [vmem:[%s3955_s16 + $0x3b0] sm:$0xff] %vm212_vm1, %v3645_v5  ;;  %460 = vst.msk [vmem:[%s3955_s16 + $0x3b8] sm:$0xff] %vm212_vm1, %v3645_v5 }
  0x9a   : > { %461 = vst.msk [vmem:[%s3955_s16 + $0x3c0] sm:$0xff] %vm212_vm1, %v3645_v5  ;;  %462 = vst.msk [vmem:[%s3955_s16 + $0x3c8] sm:$0xff] %vm212_vm1, %v3645_v5 }
  0x9b   : > { %463 = vst.msk [vmem:[%s3955_s16 + $0x3d0] sm:$0xff] %vm212_vm1, %v3645_v5  ;;  %464 = vst.msk [vmem:[%s3955_s16 + $0x3d8] sm:$0xff] %vm212_vm1, %v3645_v5 }
  0x9c   : > { %465 = vst.msk [vmem:[%s3955_s16 + $0x3e0] sm:$0xff] %vm212_vm1, %v3645_v5  ;;  %466 = vst.msk [vmem:[%s3955_s16 + $0x3e8] sm:$0xff] %vm212_vm1, %v3645_v5 }
  0x9d   : > { %467 = vst.msk [vmem:[%s3955_s16 + $0x3f0] sm:$0xff] %vm212_vm1, %v3645_v5  ;;  %468 = vst.msk [vmem:[%s3955_s16 + $0x3f8] sm:$0xff] %vm212_vm1, %v3645_v5 }
  0xda   : > { %v3957_v2 = vpop.f32.mrf.mxu0  ;;  %v3959_v3 = vpop.f32.mrf.mxu1 }
  0xdb   : > { %1931 = vadd.xlane.f32.xlu0 %v3959_v3  ;;  %1803 = vadd.xlane.f32.xlu1 %v3957_v2  ;;  %v2442_v9 = vmul.f32 %v3957_v2, %v3957_v2 }
  0xdc   : > { %v3963_v4 = vpop.f32.mrf.mxu0  ;;  %v4733_v6 = vpop.f32.mrf.mxu1 }
  0xdd   : > { %v2440_v12 = vmul.f32 %v3963_v4, %v3963_v4 }
  0xde   : > { %v3401_v7 = vpop.f32.mrf.mxu0  ;;  %v4736_v8 = vpop.f32.mrf.mxu1 }
  0xdf   : > { %1799 = vadd.xlane.f32.xlu0 %v3963_v4  ;;  %1805 = vadd.xlane.f32.xlu1 %v3401_v7  ;;  %v2443_v13 = vmul.f32 %v3401_v7, %v3401_v7 }
  0xe0   : > { %v4742_v10 = vpop.f32.mrf.mxu1  ;;  %v1163_v11 = vpop.f32.mrf.mxu0 }
  0xe1   : > { %v2441_v15 = vmul.f32 %v1163_v11, %v1163_v11 }
  0xe2   : > { %v3404_v14 = vpop.f32.mrf.mxu0  ;;  %v4747_v17 = vpop.f32.mrf.mxu1 }
  0xe3   : > { %1927 = vadd.xlane.f32.xlu0 %v4733_v6  ;;  %1933 = vadd.xlane.f32.xlu1 %v4736_v8  ;;  %v2446_v23 = vmul.f32 %v3404_v14, %v3404_v14 }
  0xe4   : > { %v1176_v16 = vpop.f32.mrf.mxu0  ;;  %v4749_v19 = vpop.f32.mrf.mxu1 }
  0xe5   : > { %v2444_v26 = vmul.f32 %v1176_v16, %v1176_v16 }
  0xe6   : > { %v3405_v18 = vpop.f32.mrf.mxu0  ;;  %v4751_v20 = vpop.f32.mrf.mxu1 }
  0xe7   : > { %2572 = vadd.xlane.f32.xlu0 %v2442_v9  ;;  %1929 = vadd.xlane.f32.xlu1 %v4742_v10  ;;  %v2447_v24 = vmul.f32 %v3405_v18, %v3405_v18 }
  0xe8   : > { %v1179_v21 = vpop.f32.mrf.mxu0  ;;  %v4755_v22 = vpop.f32.mrf.mxu1 }
  0xe9   : > { %v2445_v27 = vmul.f32 %v1179_v21, %v1179_v21 }
  0xea   : > { %v3408_v25 = vpop.f32.mrf.mxu0  ;;  %v4759_v29 = vpop.f32.mrf.mxu1 }
  0xeb   : > { %2568 = vadd.xlane.f32.xlu0 %v2440_v12  ;;  %2574 = vadd.xlane.f32.xlu1 %v2443_v13  ;;  %v2450_v35 = vmul.f32 %v3408_v25, %v3408_v25 }
  0xec   : > { %v1192_v28 = vpop.f32.mrf.mxu0  ;;  %v4761_v31 = vpop.f32.mrf.mxu1 }
  0xed   : > { %v2448_v38 = vmul.f32 %v1192_v28, %v1192_v28 }
  0xee   : > { %v3409_v30 = vpop.f32.mrf.mxu0  ;;  %v4763_v32 = vpop.f32.mrf.mxu1 }
  0xef   : > { %1801 = vadd.xlane.f32.xlu0 %v1163_v11  ;;  %2570 = vadd.xlane.f32.xlu1 %v2441_v15  ;;  %v2451_v36 = vmul.f32 %v3409_v30, %v3409_v30  ;;  %v1673_v15 = vld [vmem:[%s3950_s9 + $0x10] sm:$0xff] }
  0xf0   : > { %v1195_v33 = vpop.f32.mrf.mxu0  ;;  %v4767_v34 = vpop.f32.mrf.mxu1 }
  0xf1   : > { %v2449_v39 = vmul.f32 %v1195_v33, %v1195_v33 }
  0xf2   : > { %v3412_v37 = vpop.f32.mrf.mxu0  ;;  %v4771_v41 = vpop.f32.mrf.mxu1 }
  0xf3   : > { %1811 = vadd.xlane.f32.xlu0 %v3404_v14  ;;  %1813 = vadd.xlane.f32.xlu1 %v3405_v18  ;;  %v2454_v47 = vmul.f32 %v3412_v37, %v3412_v37  ;;  %v1737_v14 = vld [vmem:[%s3950_s9 + $0x210] sm:$0xff] }
  0xf4   : > { %v1208_v40 = vpop.f32.mrf.mxu0  ;;  %v4773_v43 = vpop.f32.mrf.mxu1 }
  0xf5   : > { %v2452_v50 = vmul.f32 %v1208_v40, %v1208_v40 }
  0xf6   : > { %v3413_v42 = vpop.f32.mrf.mxu0  ;;  %v4775_v44 = vpop.f32.mrf.mxu1 }
  0xf7   : > { %1939 = vadd.xlane.f32.xlu0 %v4747_v17  ;;  %1941 = vadd.xlane.f32.xlu1 %v4751_v20  ;;  %v2455_v48 = vmul.f32 %v3413_v42, %v3413_v42 }
  0xf8   : > { %v1211_v45 = vpop.f32.mrf.mxu0  ;;  %v4779_v46 = vpop.f32.mrf.mxu1 }
  0xf9   : > { %v2453_v51 = vmul.f32 %v1211_v45, %v1211_v45 }
  0xfa   : > { %v3416_v49 = vpop.f32.mrf.mxu0  ;;  %v4783_v53 = vpop.f32.mrf.mxu1 }
  0xfb   : > { %1807 = vadd.xlane.f32.xlu0 %v1176_v16  ;;  %1809 = vadd.xlane.f32.xlu1 %v1179_v21  ;;  %v2458_v59 = vmul.f32 %v3416_v49, %v3416_v49 }
  0xfc   : > { %v1224_v52 = vpop.f32.mrf.mxu0  ;;  %v4785_v55 = vpop.f32.mrf.mxu1 }
  0xfd   : > { %v2456_v62 = vmul.f32 %v1224_v52, %v1224_v52 }
  0xfe   : > { %v3417_v54 = vpop.f32.mrf.mxu0  ;;  %v4787_v56 = vpop.f32.mrf.mxu1 }
  0xff   : > { %1935 = vadd.xlane.f32.xlu0 %v4749_v19  ;;  %1937 = vadd.xlane.f32.xlu1 %v4755_v22  ;;  %v2459_v60 = vmul.f32 %v3417_v54, %v3417_v54 }
 0x100   : > { %v1227_v57 = vpop.f32.mrf.mxu0  ;;  %v4791_v58 = vpop.f32.mrf.mxu1 }
 0x101   : > { %v2457_v63 = vmul.f32 %v1227_v57, %v1227_v57 }
 0x102   : > { %v3420_v61 = vpop.f32.mrf.mxu0  ;;  %v4795_v1 = vpop.f32.mrf.mxu1 }
 0x103   : > { %2580 = vadd.xlane.f32.xlu0 %v2446_v23  ;;  %2582 = vadd.xlane.f32.xlu1 %v2447_v24  ;;  %v2462_v11 = vmul.f32 %v3420_v61, %v3420_v61 }
 0x104   : > { %v1240_v0 = vpop.f32.mrf.mxu0  ;;  %v4797_v4 = vpop.f32.mrf.mxu1 }
 0x105   : > { %v2460_v24 = vmul.f32 %v1240_v0, %v1240_v0 }
 0x106   : > { %v3421_v2 = vpop.f32.mrf.mxu0  ;;  %v4799_v5 = vpop.f32.mrf.mxu1 }
 0x107   : > { %2576 = vadd.xlane.f32.xlu0 %v2444_v26  ;;  %2578 = vadd.xlane.f32.xlu1 %v2445_v27  ;;  %v2463_v12 = vmul.f32 %v3421_v2, %v3421_v2 }
 0x108   : > { %v1243_v7 = vpop.f32.mrf.mxu0  ;;  %v4803_v9 = vpop.f32.mrf.mxu1 }
 0x10a   : > { %v4807_v13 = vpop.f32.mrf.mxu0  ;;  %v4813_v27 = vpop.f32.mrf.mxu1 }
 0x10b   : > { %1819 = vadd.xlane.f32.xlu0 %v3408_v25  ;;  %1821 = vadd.xlane.f32.xlu1 %v3409_v30  ;;  %v2461_v25 = vmul.f32 %v1243_v7, %v1243_v7  ;;  %v1674_v30 = vld [vmem:[%s3950_s9 + $0x18] sm:$0xff] }
 0x10c   : > { %v4811_v26 = vpop.f32.mrf.mxu0 }
 0x10f   : > { %1947 = vadd.xlane.f32.xlu0 %v4759_v29  ;;  %1949 = vadd.xlane.f32.xlu1 %v4763_v32 }
 0x113   : > { %1815 = vadd.xlane.f32.xlu0 %v1192_v28  ;;  %1817 = vadd.xlane.f32.xlu1 %v1195_v33  ;;  %v1671_v28 = vld [vmem:[%s3950_s9] sm:$0xff] }
 0x117   : > { %1943 = vadd.xlane.f32.xlu0 %v4761_v31  ;;  %1945 = vadd.xlane.f32.xlu1 %v4767_v34 }
 0x11b   : > { %2588 = vadd.xlane.f32.xlu0 %v2450_v35  ;;  %2590 = vadd.xlane.f32.xlu1 %v2451_v36 }
 0x11f   : > { %2584 = vadd.xlane.f32.xlu0 %v2448_v38  ;;  %2586 = vadd.xlane.f32.xlu1 %v2449_v39  ;;  %v3425_v38 = vpop.f32.mrf.mxu0  ;;  %v4821_v39 = vpop.f32.mrf.mxu1 }
 0x123   : > { %1827 = vadd.xlane.f32.xlu0 %v3412_v37  ;;  %1829 = vadd.xlane.f32.xlu1 %v3413_v42  ;;  %v1738_v42 = vld [vmem:[%s3950_s9 + $0x218] sm:$0xff] }
 0x127   : > { %1955 = vadd.xlane.f32.xlu0 %v4771_v41  ;;  %1957 = vadd.xlane.f32.xlu1 %v4775_v44 }
 0x12b   : > { %1823 = vadd.xlane.f32.xlu0 %v1208_v40  ;;  %1825 = vadd.xlane.f32.xlu1 %v1211_v45  ;;  %v1735_v40 = vld [vmem:[%s3950_s9 + $0x200] sm:$0xff] }
 0x12f   : > { %1951 = vadd.xlane.f32.xlu0 %v4773_v43  ;;  %1953 = vadd.xlane.f32.xlu1 %v4779_v46 }
 0x133   : > { %2596 = vadd.xlane.f32.xlu0 %v2454_v47  ;;  %2598 = vadd.xlane.f32.xlu1 %v2455_v48 }
 0x137   : > { %2592 = vadd.xlane.f32.xlu0 %v2452_v50  ;;  %2594 = vadd.xlane.f32.xlu1 %v2453_v51  ;;  %v4830_v50 = vpop.f32.mrf.mxu1  ;;  %v2314_v51 = vld [vmem:[%s3955_s16 + $0x10] sm:$0xff] }
 0x13b   : > { %1835 = vadd.xlane.f32.xlu0 %v3416_v49  ;;  %1837 = vadd.xlane.f32.xlu1 %v3417_v54 }
 0x13f   : > { %1963 = vadd.xlane.f32.xlu0 %v4783_v53  ;;  %1965 = vadd.xlane.f32.xlu1 %v4787_v56 }
 0x143   : > { %1831 = vadd.xlane.f32.xlu0 %v1224_v52  ;;  %1833 = vadd.xlane.f32.xlu1 %v1227_v57  ;;  %v1736_v52 = vld [vmem:[%s3950_s9 + $0x208] sm:$0xff] }
 0x147   : > { %1959 = vadd.xlane.f32.xlu0 %v4785_v55  ;;  %1961 = vadd.xlane.f32.xlu1 %v4791_v58 }
 0x14b   : > { %2604 = vadd.xlane.f32.xlu0 %v2458_v59  ;;  %2606 = vadd.xlane.f32.xlu1 %v2459_v60 }
 0x14f   : > { %2600 = vadd.xlane.f32.xlu0 %v2456_v62  ;;  %2602 = vadd.xlane.f32.xlu1 %v2457_v63  ;;  %v2312_v62 = vld [vmem:[%s3955_s16] sm:$0xff]  ;;  %v2315_v63 = vld [vmem:[%s3955_s16 + $0x18] sm:$0xff] }
 0x153   : > { %1843 = vadd.xlane.f32.xlu0 %v3420_v61  ;;  %1845 = vadd.xlane.f32.xlu1 %v3421_v2  ;;  %v1259_v61 = vpop.f32.mrf.mxu0 }
 0x157   : > { %1971 = vadd.xlane.f32.xlu0 %v4795_v1  ;;  %1973 = vadd.xlane.f32.xlu1 %v4799_v5 }
 0x15b   : > { %1839 = vadd.xlane.f32.xlu0 %v1240_v0  ;;  %1841 = vadd.xlane.f32.xlu1 %v1243_v7 }
 0x15f   : > { %1967 = vadd.xlane.f32.xlu0 %v4797_v4  ;;  %1969 = vadd.xlane.f32.xlu1 %v4803_v9 }
 0x163   : > { %2612 = vadd.xlane.f32.xlu0 %v2462_v11  ;;  %2614 = vadd.xlane.f32.xlu1 %v2463_v12  ;;  %v4847_v12 = vpop.f32.mrf.mxu1 }
 0x164   : > { %v1932_v16 = vpop.xlane.xlu0 %1931  ;;  %v1804_v18 = vpop.xlane.xlu1 %1803 }
 0x165   : > { %v2121_v21 = vadd.f32 %v1932_v16, %v1737_v14  ;;  %v2057_v23 = vadd.f32 %v1804_v18, %v1673_v15  ;;  %v1672_v14 = vld [vmem:[%s3950_s9 + $0x8] sm:$0xff] }
 0x166   : > { %v2313_v15 = vld [vmem:[%s3955_s16 + $0x8] sm:$0xff] }
 0x167   : > { %2250 = vst.msk [vmem:[%s3950_s9 + $0x210] sm:$0xff] %vm212_vm1, %v2121_v21  ;;  %2186 = vst.msk [vmem:[%s3950_s9 + $0x10] sm:$0xff] %vm212_vm1, %v2057_v23  ;;  %2608 = vadd.xlane.f32.xlu0 %v2460_v24  ;;  %2610 = vadd.xlane.f32.xlu1 %v2461_v25  ;;  %v2466_v24 = vmul.f32 %v4807_v13, %v4807_v13  ;;  %v2467_v25 = vmul.f32 %v3425_v38, %v3425_v38 }
 0x168   : > { %v1800_v33 = vpop.xlane.xlu0 %1799  ;;  %v1806_v35 = vpop.xlane.xlu1 %1805 }
 0x169   : > { %v2055_v36 = vadd.f32 %v1800_v33, %v1671_v28  ;;  %v2058_v37 = vadd.f32 %v1806_v35, %v1674_v30  ;;  %v4859_v28 = vpop.f32.mrf.mxu0  ;;  %v1677_v30 = vld [vmem:[%s3950_s9 + $0x30] sm:$0xff]  ;;  %v1678_v33 = vld [vmem:[%s3950_s9 + $0x38] sm:$0xff] }
 0x16b   : > { %2184 = vst.msk [vmem:[%s3950_s9] sm:$0xff] %vm212_vm1, %v2055_v36  ;;  %2187 = vst.msk [vmem:[%s3950_s9 + $0x18] sm:$0xff] %vm212_vm1, %v2058_v37  ;;  %1851 = vadd.xlane.f32.xlu0 %v4807_v13  ;;  %1853 = vadd.xlane.f32.xlu1 %v3425_v38  ;;  %v2464_v13 = vmul.f32 %v4811_v26, %v4811_v26  ;;  %v2465_v38 = vmul.f32 %v1259_v61, %v1259_v61 }
 0x16c   : > { %v1928_v45 = vpop.xlane.xlu0 %1927  ;;  %v1934_v47 = vpop.xlane.xlu1 %1933 }
 0x16d   : > { %v2119_v48 = vadd.f32 %v1928_v45, %v1735_v40  ;;  %v2122_v49 = vadd.f32 %v1934_v47, %v1738_v42  ;;  %v4869_v42 = vpop.f32.mrf.mxu0  ;;  %v4871_v45 = vpop.f32.mrf.mxu1  ;;  %v1741_v47 = vld [vmem:[%s3950_s9 + $0x230] sm:$0xff] }
 0x16e   : > { %6030 = vst [vmem:[#allocation2_spill] sm:$0xff] %v4871_v45 }
 0x16f   : > { %2248 = vst.msk [vmem:[%s3950_s9 + $0x200] sm:$0xff] %vm212_vm1, %v2119_v48  ;;  %2251 = vst.msk [vmem:[%s3950_s9 + $0x218] sm:$0xff] %vm212_vm1, %v2122_v49  ;;  %1979 = vadd.xlane.f32.xlu0 %v4813_v27  ;;  %1981 = vadd.xlane.f32.xlu1 %v4830_v50  ;;  %v1742_v48 = vld [vmem:[%s3950_s9 + $0x238] sm:$0xff] }
 0x170   : > { %v2573_v54 = vpop.xlane.xlu0 %2572  ;;  %v1930_v57 = vpop.xlane.xlu1 %1929 }
 0x171   : > { %v2826_v59 = vadd.f32 %v2573_v54, %v2314_v51  ;;  %v2120_v60 = vadd.f32 %v1930_v57, %v1736_v52  ;;  %v3429_v54 = vpop.f32.mrf.mxu0  ;;  %v4879_v57 = vpop.f32.mrf.mxu1 }
 0x173   : > { %2954 = vst.msk [vmem:[%s3955_s16 + $0x10] sm:$0xff] %vm212_vm1, %v2826_v59  ;;  %2249 = vst.msk [vmem:[%s3950_s9 + $0x208] sm:$0xff] %vm212_vm1, %v2120_v60  ;;  %1847 = vadd.xlane.f32.xlu0 %v4811_v26  ;;  %1849 = vadd.xlane.f32.xlu1 %v1259_v61  ;;  %v1675_v59 = vld [vmem:[%s3950_s9 + $0x20] sm:$0xff]  ;;  %v1676_v60 = vld [vmem:[%s3950_s9 + $0x28] sm:$0xff] }
 0x174   : > { %v2569_v0 = vpop.xlane.xlu0 %2568  ;;  %v2575_v2 = vpop.xlane.xlu1 %2574 }
 0x175   : > { %v2824_v7 = vadd.f32 %v2569_v0, %v2312_v62  ;;  %v2827_v11 = vadd.f32 %v2575_v2, %v2315_v63  ;;  %v4888_v2 = vpop.f32.mrf.mxu1 }
 0x176   : > { %6031 = vst [vmem:[#allocation3_spill] sm:$0xff] %v4888_v2 }
 0x177   : > { %2952 = vst.msk [vmem:[%s3955_s16] sm:$0xff] %vm212_vm1, %v2824_v7  ;;  %2955 = vst.msk [vmem:[%s3955_s16 + $0x18] sm:$0xff] %vm212_vm1, %v2827_v11  ;;  %1975 = vadd.xlane.f32.xlu0 %v4821_v39  ;;  %1977 = vadd.xlane.f32.xlu1 %v4847_v12  ;;  %v1739_v7 = vld [vmem:[%s3950_s9 + $0x220] sm:$0xff]  ;;  %v1740_v11 = vld [vmem:[%s3950_s9 + $0x228] sm:$0xff] }
 0x178   : > { %v1802_v16 = vpop.xlane.xlu0 %1801  ;;  %v2571_v18 = vpop.xlane.xlu1 %2570 }
 0x179   : > { %v2056_v21 = vadd.f32 %v1802_v16, %v1672_v14  ;;  %v2825_v23 = vadd.f32 %v2571_v18, %v2313_v15 }
 0x17b   : > { %2185 = vst.msk [vmem:[%s3950_s9 + $0x8] sm:$0xff] %vm212_vm1, %v2056_v21  ;;  %2953 = vst.msk [vmem:[%s3955_s16 + $0x8] sm:$0xff] %vm212_vm1, %v2825_v23  ;;  %2620 = vadd.xlane.f32.xlu0 %v2466_v24  ;;  %2622 = vadd.xlane.f32.xlu1 %v2467_v25  ;;  %v1275_v21 = vpop.f32.mrf.mxu0  ;;  %v2318_v23 = vld [vmem:[%s3955_s16 + $0x30] sm:$0xff]  ;;  %v2319_v24 = vld [vmem:[%s3955_s16 + $0x38] sm:$0xff] }
 0x17c   : > { %v1812_v35 = vpop.xlane.xlu0 %1811  ;;  %v1814_v36 = vpop.xlane.xlu1 %1813 }
 0x17d   : > { %v2061_v37 = vadd.f32 %v1812_v35, %v1677_v30  ;;  %v2062_v40 = vadd.f32 %v1814_v36, %v1678_v33  ;;  %v4905_v36 = vpop.f32.mrf.mxu1 }
 0x17e   : > { %6032 = vst [vmem:[#allocation4_spill] sm:$0xff] %v4905_v36 }
 0x17f   : > { %2190 = vst.msk [vmem:[%s3950_s9 + $0x30] sm:$0xff] %vm212_vm1, %v2061_v37  ;;  %2191 = vst.msk [vmem:[%s3950_s9 + $0x38] sm:$0xff] %vm212_vm1, %v2062_v40  ;;  %2616 = vadd.xlane.f32.xlu0 %v2464_v13  ;;  %2618 = vadd.xlane.f32.xlu1 %v2465_v38  ;;  %v2316_v37 = vld [vmem:[%s3955_s16 + $0x20] sm:$0xff]  ;;  %v2317_v40 = vld [vmem:[%s3955_s16 + $0x28] sm:$0xff] }
 0x180   : > { %v1940_v49 = vpop.xlane.xlu0 %1939  ;;  %v1942_v51 = vpop.xlane.xlu1 %1941 }
 0x181   : > { %v2125_v26 = vadd.f32 %v1940_v49, %v1741_v47  ;;  %v2126_v52 = vadd.f32 %v1942_v51, %v1742_v48  ;;  %v2470_v49 = vmul.f32 %v4859_v28, %v4859_v28  ;;  %v2471_v51 = vmul.f32 %v3429_v54, %v3429_v54 }
 0x183   : > { %2254 = vst.msk [vmem:[%s3950_s9 + $0x230] sm:$0xff] %vm212_vm1, %v2125_v26  ;;  %2255 = vst.msk [vmem:[%s3950_s9 + $0x238] sm:$0xff] %vm212_vm1, %v2126_v52  ;;  %1859 = vadd.xlane.f32.xlu0 %v4859_v28  ;;  %1861 = vadd.xlane.f32.xlu1 %v3429_v54  ;;  %v4917_v26 = vpop.f32.mrf.mxu0  ;;  %v1681_v52 = vld [vmem:[%s3950_s9 + $0x50] sm:$0xff]  ;;  %v2468_v28 = vmul.f32 %v4869_v42, %v4869_v42  ;;  %v2469_v54 = vmul.f32 %v1275_v21, %v1275_v21 }
 0x184   : > { %v1808_v61 = vpop.xlane.xlu0 %1807  ;;  %v1810_v62 = vpop.xlane.xlu1 %1809 }
 0x185   : > { %v2059_v63 = vadd.f32 %v1808_v61, %v1675_v59  ;;  %v2060_v0 = vadd.f32 %v1810_v62, %v1676_v60  ;;  %v1682_v59 = vld [vmem:[%s3950_s9 + $0x58] sm:$0xff] }
 0x187   : > { %2188 = vst.msk [vmem:[%s3950_s9 + $0x20] sm:$0xff] %vm212_vm1, %v2059_v63  ;;  %2189 = vst.msk [vmem:[%s3950_s9 + $0x28] sm:$0xff] %vm212_vm1, %v2060_v0  ;;  %1987 = vadd.xlane.f32.xlu0 %v4871_v45  ;;  %1989 = vadd.xlane.f32.xlu1 %v4888_v2  ;;  %v4927_v0 = vpop.f32.mrf.mxu0 }
 0x188   : > { %v1936_v14 = vpop.xlane.xlu0 %1935  ;;  %v1938_v15 = vpop.xlane.xlu1 %1937 }
 0x189   : > { %v2123_v16 = vadd.f32 %v1936_v14, %v1739_v7  ;;  %v2124_v18 = vadd.f32 %v1938_v15, %v1740_v11  ;;  %v4929_v7 = vpop.f32.mrf.mxu1  ;;  %v1745_v11 = vld [vmem:[%s3950_s9 + $0x250] sm:$0xff]  ;;  %v1746_v14 = vld [vmem:[%s3950_s9 + $0x258] sm:$0xff] }
 0x18a   : > { %6033 = vst [vmem:[#allocation5_spill] sm:$0xff] %v4929_v7 }
 0x18b   : > { %2252 = vst.msk [vmem:[%s3950_s9 + $0x220] sm:$0xff] %vm212_vm1, %v2123_v16  ;;  %2253 = vst.msk [vmem:[%s3950_s9 + $0x228] sm:$0xff] %vm212_vm1, %v2124_v18  ;;  %1855 = vadd.xlane.f32.xlu0 %v4869_v42  ;;  %1857 = vadd.xlane.f32.xlu1 %v1275_v21  ;;  %v3433_v21 = vpop.f32.mrf.mxu0 }
 0x18c   : > { %v2581_v25 = vpop.xlane.xlu0 %2580  ;;  %v2583_v30 = vpop.xlane.xlu1 %2582 }
 0x18d   : > { %v2830_v33 = vadd.f32 %v2581_v25, %v2318_v23  ;;  %v2831_v35 = vadd.f32 %v2583_v30, %v2319_v24  ;;  %v4937_v23 = vpop.f32.mrf.mxu1  ;;  %v1679_v24 = vld [vmem:[%s3950_s9 + $0x40] sm:$0xff]  ;;  %v1680_v25 = vld [vmem:[%s3950_s9 + $0x48] sm:$0xff] }
 0x18e   : > { %6034 = vst [vmem:[#allocation6_spill] sm:$0xff] %v4937_v23 }
 0x18f   : > { %2958 = vst.msk [vmem:[%s3955_s16 + $0x30] sm:$0xff] %vm212_vm1, %v2830_v33  ;;  %2959 = vst.msk [vmem:[%s3955_s16 + $0x38] sm:$0xff] %vm212_vm1, %v2831_v35  ;;  %1983 = vadd.xlane.f32.xlu0 %v4879_v57  ;;  %1985 = vadd.xlane.f32.xlu1 %v4905_v36  ;;  %v2341_v36 = vld [vmem:[%s3955_s16 + $0xe8] sm:$0xff] }
 0x190   : > { %v2577_v13 = vpop.xlane.xlu0 %2576  ;;  %v2579_v38 = vpop.xlane.xlu1 %2578 }
 0x191   : > { %v2828_v47 = vadd.f32 %v2577_v13, %v2316_v37  ;;  %v2829_v48 = vadd.f32 %v2579_v38, %v2317_v40  ;;  %v4946_v40 = vpop.f32.mrf.mxu1  ;;  %v1743_v13 = vld [vmem:[%s3950_s9 + $0x240] sm:$0xff]  ;;  %v1744_v38 = vld [vmem:[%s3950_s9 + $0x248] sm:$0xff] }
 0x192   : > { %6035 = vst [vmem:[#allocation7_spill] sm:$0xff] %v4946_v40 }
 0x193   : > { %2956 = vst.msk [vmem:[%s3955_s16 + $0x20] sm:$0xff] %vm212_vm1, %v2828_v47  ;;  %2957 = vst.msk [vmem:[%s3955_s16 + $0x28] sm:$0xff] %vm212_vm1, %v2829_v48  ;;  %2628 = vadd.xlane.f32.xlu0 %v2470_v49  ;;  %2630 = vadd.xlane.f32.xlu1 %v2471_v51 }
 0x194   : > { %v1820_v60 = vpop.xlane.xlu0 %1819  ;;  %v1822_v61 = vpop.xlane.xlu1 %1821 }
 0x195   : > { %v2065_v62 = vadd.f32 %v1820_v60, %v1681_v52  ;;  %v2066_v63 = vadd.f32 %v1822_v61, %v1682_v59  ;;  %v1291_v52 = vpop.f32.mrf.mxu0  ;;  %v2322_v59 = vld [vmem:[%s3955_s16 + $0x50] sm:$0xff]  ;;  %v2323_v60 = vld [vmem:[%s3955_s16 + $0x58] sm:$0xff] }
 0x197   : > { %2194 = vst.msk [vmem:[%s3950_s9 + $0x50] sm:$0xff] %vm212_vm1, %v2065_v62  ;;  %2195 = vst.msk [vmem:[%s3950_s9 + $0x58] sm:$0xff] %vm212_vm1, %v2066_v63  ;;  %2624 = vadd.xlane.f32.xlu0 %v2468_v28  ;;  %2626 = vadd.xlane.f32.xlu1 %v2469_v54  ;;  %v4963_v54 = vpop.f32.mrf.mxu1 }
 0x198   : > { %v1948_v15 = vpop.xlane.xlu0 %1947  ;;  %v1950_v16 = vpop.xlane.xlu1 %1949  ;;  %6036 = vst [vmem:[#allocation8_spill] sm:$0xff] %v4963_v54 }
 0x199   : > { %v2129_v42 = vadd.f32 %v1948_v15, %v1745_v11  ;;  %v2130_v18 = vadd.f32 %v1950_v16, %v1746_v14  ;;  %v2320_v11 = vld [vmem:[%s3955_s16 + $0x40] sm:$0xff]  ;;  %v2321_v14 = vld [vmem:[%s3955_s16 + $0x48] sm:$0xff] }
 0x19b   : > { %2258 = vst.msk [vmem:[%s3950_s9 + $0x250] sm:$0xff] %vm212_vm1, %v2129_v42  ;;  %2259 = vst.msk [vmem:[%s3950_s9 + $0x258] sm:$0xff] %vm212_vm1, %v2130_v18  ;;  %1867 = vadd.xlane.f32.xlu0 %v4917_v26  ;;  %1869 = vadd.xlane.f32.xlu1 %v3433_v21  ;;  %v2474_v42 = vmul.f32 %v4917_v26, %v4917_v26  ;;  %v2475_v18 = vmul.f32 %v3433_v21, %v3433_v21 }
 0x19c   : > { %v1816_v30 = vpop.xlane.xlu0 %1815  ;;  %v1818_v33 = vpop.xlane.xlu1 %1817  ;;  %v2472_v26 = vmul.f32 %v4927_v0, %v4927_v0  ;;  %v2473_v21 = vmul.f32 %v1291_v52, %v1291_v52 }
 0x19d   : > { %v2063_v35 = vadd.f32 %v1816_v30, %v1679_v24  ;;  %v2064_v37 = vadd.f32 %v1818_v33, %v1680_v25  ;;  %v4975_v30 = vpop.f32.mrf.mxu0  ;;  %v1685_v33 = vld [vmem:[%s3950_s9 + $0x70] sm:$0xff] }
 0x19f   : > { %2192 = vst.msk [vmem:[%s3950_s9 + $0x40] sm:$0xff] %vm212_vm1, %v2063_v35  ;;  %2193 = vst.msk [vmem:[%s3950_s9 + $0x48] sm:$0xff] %vm212_vm1, %v2064_v37  ;;  %1995 = vadd.xlane.f32.xlu0 %v4929_v7  ;;  %1997 = vadd.xlane.f32.xlu1 %v4946_v40  ;;  %v1686_v35 = vld [vmem:[%s3950_s9 + $0x78] sm:$0xff] }
 0x1a0   : > { %v1944_v47 = vpop.xlane.xlu0 %1943  ;;  %v1946_v48 = vpop.xlane.xlu1 %1945  ;;  %v2339_v7 = vld [vmem:[%s3955_s16 + $0xd8] sm:$0xff] }
 0x1a1   : > { %v2127_v49 = vadd.f32 %v1944_v47, %v1743_v13  ;;  %v2128_v51 = vadd.f32 %v1946_v48, %v1744_v38  ;;  %v4985_v48 = vpop.f32.mrf.mxu0 }
 0x1a3   : > { %2256 = vst.msk [vmem:[%s3950_s9 + $0x240] sm:$0xff] %vm212_vm1, %v2127_v49  ;;  %2257 = vst.msk [vmem:[%s3950_s9 + $0x248] sm:$0xff] %vm212_vm1, %v2128_v51  ;;  %1863 = vadd.xlane.f32.xlu0 %v4927_v0  ;;  %1865 = vadd.xlane.f32.xlu1 %v1291_v52  ;;  %v4987_v49 = vpop.f32.mrf.mxu1  ;;  %v1749_v51 = vld [vmem:[%s3950_s9 + $0x270] sm:$0xff] }
 0x1a4   : > { %v2589_v61 = vpop.xlane.xlu0 %2588  ;;  %v2591_v62 = vpop.xlane.xlu1 %2590  ;;  %6037 = vst [vmem:[#allocation9_spill] sm:$0xff] %v4987_v49 }
 0x1a5   : > { %v2834_v63 = vadd.f32 %v2589_v61, %v2322_v59  ;;  %v2835_v28 = vadd.f32 %v2591_v62, %v2323_v60  ;;  %v1750_v59 = vld [vmem:[%s3950_s9 + $0x278] sm:$0xff]  ;;  %v3437_v62 = vpop.f32.mrf.mxu0 }
 0x1a7   : > { %2962 = vst.msk [vmem:[%s3955_s16 + $0x50] sm:$0xff] %vm212_vm1, %v2834_v63  ;;  %2963 = vst.msk [vmem:[%s3955_s16 + $0x58] sm:$0xff] %vm212_vm1, %v2835_v28  ;;  %1991 = vadd.xlane.f32.xlu0 %v4937_v23  ;;  %1993 = vadd.xlane.f32.xlu1 %v4963_v54  ;;  %v4995_v63 = vpop.f32.mrf.mxu1  ;;  %v1683_v28 = vld [vmem:[%s3950_s9 + $0x60] sm:$0xff]  ;;  %v1701_v23 = vld [vmem:[%s3950_s9 + $0xf0] sm:$0xff] }
 0x1a8   : > { %v2585_v15 = vpop.xlane.xlu0 %2584  ;;  %v2587_v16 = vpop.xlane.xlu1 %2586  ;;  %6038 = vst [vmem:[#allocation10_spill] sm:$0xff] %v4995_v63 }
 0x1a9   : > { %v2832_v24 = vadd.f32 %v2585_v15, %v2320_v11  ;;  %v2833_v25 = vadd.f32 %v2587_v16, %v2321_v14  ;;  %v1684_v11 = vld [vmem:[%s3950_s9 + $0x68] sm:$0xff] }
 0x1ab   : > { %2960 = vst.msk [vmem:[%s3955_s16 + $0x40] sm:$0xff] %vm212_vm1, %v2832_v24  ;;  %2961 = vst.msk [vmem:[%s3955_s16 + $0x48] sm:$0xff] %vm212_vm1, %v2833_v25  ;;  %2636 = vadd.xlane.f32.xlu0 %v2474_v42  ;;  %2638 = vadd.xlane.f32.xlu1 %v2475_v18  ;;  %v5004_v18 = vpop.f32.mrf.mxu1  ;;  %v1747_v24 = vld [vmem:[%s3950_s9 + $0x260] sm:$0xff]  ;;  %v1748_v25 = vld [vmem:[%s3950_s9 + $0x268] sm:$0xff] }
 0x1ac   : > { %v1828_v37 = vpop.xlane.xlu0 %1827  ;;  %v1830_v13 = vpop.xlane.xlu1 %1829  ;;  %6039 = vst [vmem:[#allocation11_spill] sm:$0xff] %v5004_v18 }
 0x1ad   : > { %v2069_v38 = vadd.f32 %v1828_v37, %v1685_v33  ;;  %v2070_v47 = vadd.f32 %v1830_v13, %v1686_v35 }
 0x1af   : > { %2198 = vst.msk [vmem:[%s3950_s9 + $0x70] sm:$0xff] %vm212_vm1, %v2069_v38  ;;  %2199 = vst.msk [vmem:[%s3950_s9 + $0x78] sm:$0xff] %vm212_vm1, %v2070_v47  ;;  %2632 = vadd.xlane.f32.xlu0 %v2472_v26  ;;  %2634 = vadd.xlane.f32.xlu1 %v2473_v21  ;;  %v1307_v26 = vpop.f32.mrf.mxu0  ;;  %v2326_v21 = vld [vmem:[%s3955_s16 + $0x70] sm:$0xff]  ;;  %v2327_v38 = vld [vmem:[%s3955_s16 + $0x78] sm:$0xff] }
 0x1b0   : > { %v1956_v0 = vpop.xlane.xlu0 %1955  ;;  %v1958_v52 = vpop.xlane.xlu1 %1957 }
 0x1b1   : > { %v2133_v60 = vadd.f32 %v1956_v0, %v1749_v51  ;;  %v2134_v61 = vadd.f32 %v1958_v52, %v1750_v59  ;;  %v5021_v52 = vpop.f32.mrf.mxu1 }
 0x1b2   : > { %6040 = vst [vmem:[#allocation12_spill] sm:$0xff] %v5021_v52 }
 0x1b3   : > { %2262 = vst.msk [vmem:[%s3950_s9 + $0x270] sm:$0xff] %vm212_vm1, %v2133_v60  ;;  %2263 = vst.msk [vmem:[%s3950_s9 + $0x278] sm:$0xff] %vm212_vm1, %v2134_v61  ;;  %1875 = vadd.xlane.f32.xlu0 %v4975_v30  ;;  %1877 = vadd.xlane.f32.xlu1 %v3437_v62  ;;  %v2324_v60 = vld [vmem:[%s3955_s16 + $0x60] sm:$0xff]  ;;  %v2325_v61 = vld [vmem:[%s3955_s16 + $0x68] sm:$0xff] }
 0x1b4   : > { %v1824_v14 = vpop.xlane.xlu0 %1823  ;;  %v1826_v15 = vpop.xlane.xlu1 %1825 }
 0x1b5   : > { %v2067_v16 = vadd.f32 %v1824_v14, %v1683_v28  ;;  %v2068_v42 = vadd.f32 %v1826_v15, %v1684_v11  ;;  %v2478_v14 = vmul.f32 %v4975_v30, %v4975_v30  ;;  %v2479_v15 = vmul.f32 %v3437_v62, %v3437_v62 }
 0x1b6   : > { %v2476_v30 = vmul.f32 %v4985_v48, %v4985_v48  ;;  %v2477_v62 = vmul.f32 %v1307_v26, %v1307_v26 }
 0x1b7   : > { %2196 = vst.msk [vmem:[%s3950_s9 + $0x60] sm:$0xff] %vm212_vm1, %v2067_v16  ;;  %2197 = vst.msk [vmem:[%s3950_s9 + $0x68] sm:$0xff] %vm212_vm1, %v2068_v42  ;;  %2003 = vadd.xlane.f32.xlu0 %v4987_v49  ;;  %2005 = vadd.xlane.f32.xlu1 %v5004_v18  ;;  %v1698_v49 = vld [vmem:[%s3950_s9 + $0xd8] sm:$0xff] }
 0x1b8   : > { %v1952_v33 = vpop.xlane.xlu0 %1951  ;;  %v1954_v35 = vpop.xlane.xlu1 %1953 }
 0x1b9   : > { %v2131_v37 = vadd.f32 %v1952_v33, %v1747_v24  ;;  %v2132_v13 = vadd.f32 %v1954_v35, %v1748_v25  ;;  %v5033_v24 = vpop.f32.mrf.mxu0  ;;  %v1689_v25 = vld [vmem:[%s3950_s9 + $0x90] sm:$0xff]  ;;  %v1690_v33 = vld [vmem:[%s3950_s9 + $0x98] sm:$0xff] }
 0x1bb   : > { %2260 = vst.msk [vmem:[%s3950_s9 + $0x260] sm:$0xff] %vm212_vm1, %v2131_v37  ;;  %2261 = vst.msk [vmem:[%s3950_s9 + $0x268] sm:$0xff] %vm212_vm1, %v2132_v13  ;;  %1871 = vadd.xlane.f32.xlu0 %v4985_v48  ;;  %1873 = vadd.xlane.f32.xlu1 %v1307_v26 }
 0x1bc   : > { %v2597_v47 = vpop.xlane.xlu0 %2596  ;;  %v2599_v51 = vpop.xlane.xlu1 %2598 }
 0x1bd   : > { %v2838_v59 = vadd.f32 %v2597_v47, %v2326_v21  ;;  %v2839_v0 = vadd.f32 %v2599_v51, %v2327_v38  ;;  %v5043_v38 = vpop.f32.mrf.mxu0  ;;  %v5045_v47 = vpop.f32.mrf.mxu1  ;;  %v1753_v51 = vld [vmem:[%s3950_s9 + $0x290] sm:$0xff] }
 0x1be   : > { %6041 = vst [vmem:[#allocation13_spill] sm:$0xff] %v5045_v47 }
 0x1bf   : > { %2966 = vst.msk [vmem:[%s3955_s16 + $0x70] sm:$0xff] %vm212_vm1, %v2838_v59  ;;  %2967 = vst.msk [vmem:[%s3955_s16 + $0x78] sm:$0xff] %vm212_vm1, %v2839_v0  ;;  %1999 = vadd.xlane.f32.xlu0 %v4995_v63  ;;  %2001 = vadd.xlane.f32.xlu1 %v5021_v52  ;;  %v1754_v59 = vld [vmem:[%s3950_s9 + $0x298] sm:$0xff]  ;;  %v1695_v63 = vld [vmem:[%s3950_s9 + $0xc0] sm:$0xff] }
 0x1c0   : > { %v2593_v28 = vpop.xlane.xlu0 %2592  ;;  %v2595_v11 = vpop.xlane.xlu1 %2594 }
 0x1c1   : > { %v2836_v16 = vadd.f32 %v2593_v28, %v2324_v60  ;;  %v2837_v42 = vadd.f32 %v2595_v11, %v2325_v61  ;;  %v5053_v61 = vpop.f32.mrf.mxu0  ;;  %v5055_v28 = vpop.f32.mrf.mxu1  ;;  %v1687_v11 = vld [vmem:[%s3950_s9 + $0x80] sm:$0xff] }
 0x1c2   : > { %6042 = vst [vmem:[#allocation14_spill] sm:$0xff] %v5055_v28 }
 0x1c3   : > { %2964 = vst.msk [vmem:[%s3955_s16 + $0x60] sm:$0xff] %vm212_vm1, %v2836_v16  ;;  %2965 = vst.msk [vmem:[%s3955_s16 + $0x68] sm:$0xff] %vm212_vm1, %v2837_v42  ;;  %2644 = vadd.xlane.f32.xlu0 %v2478_v14  ;;  %2646 = vadd.xlane.f32.xlu1 %v2479_v15  ;;  %v1688_v14 = vld [vmem:[%s3950_s9 + $0x88] sm:$0xff] }
 0x1c4   : > { %v1836_v35 = vpop.xlane.xlu0 %1835  ;;  %v1838_v37 = vpop.xlane.xlu1 %1837 }
 0x1c5   : > { %v2073_v13 = vadd.f32 %v1836_v35, %v1689_v25  ;;  %v2074_v21 = vadd.f32 %v1838_v37, %v1690_v33  ;;  %v5065_v33 = vpop.f32.mrf.mxu1  ;;  %v1751_v35 = vld [vmem:[%s3950_s9 + $0x280] sm:$0xff]  ;;  %v1752_v37 = vld [vmem:[%s3950_s9 + $0x288] sm:$0xff] }
 0x1c6   : > { %6043 = vst [vmem:[#allocation15_spill] sm:$0xff] %v5065_v33 }
 0x1c7   : > { %2202 = vst.msk [vmem:[%s3950_s9 + $0x90] sm:$0xff] %vm212_vm1, %v2073_v13  ;;  %2203 = vst.msk [vmem:[%s3950_s9 + $0x98] sm:$0xff] %vm212_vm1, %v2074_v21  ;;  %2640 = vadd.xlane.f32.xlu0 %v2476_v30  ;;  %2642 = vadd.xlane.f32.xlu1 %v2477_v62  ;;  %v5069_v30 = vpop.f32.mrf.mxu0 }
 0x1c8   : > { %v1964_v48 = vpop.xlane.xlu0 %1963  ;;  %v1966_v26 = vpop.xlane.xlu1 %1965 }
 0x1c9   : > { %v2137_v0 = vadd.f32 %v1964_v48, %v1753_v51  ;;  %v2138_v60 = vadd.f32 %v1966_v26, %v1754_v59  ;;  %v5077_v59 = vpop.f32.mrf.mxu0  ;;  %v2330_v48 = vld [vmem:[%s3955_s16 + $0x90] sm:$0xff]  ;;  %v2331_v26 = vld [vmem:[%s3955_s16 + $0x98] sm:$0xff] }
 0x1cb   : > { %2266 = vst.msk [vmem:[%s3950_s9 + $0x290] sm:$0xff] %vm212_vm1, %v2137_v0  ;;  %2267 = vst.msk [vmem:[%s3950_s9 + $0x298] sm:$0xff] %vm212_vm1, %v2138_v60  ;;  %1883 = vadd.xlane.f32.xlu0 %v5033_v24  ;;  %1885 = vadd.xlane.f32.xlu1 %v5053_v61  ;;  %v5081_v0 = vpop.f32.mrf.mxu1 }
 0x1cc   : > { %v1832_v15 = vpop.xlane.xlu0 %1831  ;;  %v1834_v16 = vpop.xlane.xlu1 %1833  ;;  %6044 = vst [vmem:[#allocation16_spill] sm:$0xff] %v5081_v0 }
 0x1cd   : > { %v2071_v42 = vadd.f32 %v1832_v15, %v1687_v11  ;;  %v2072_v25 = vadd.f32 %v1834_v16, %v1688_v14  ;;  %v5089_v16 = vpop.f32.mrf.mxu0 }
 0x1cf   : > { %2200 = vst.msk [vmem:[%s3950_s9 + $0x80] sm:$0xff] %vm212_vm1, %v2071_v42  ;;  %2201 = vst.msk [vmem:[%s3950_s9 + $0x88] sm:$0xff] %vm212_vm1, %v2072_v25  ;;  %2011 = vadd.xlane.f32.xlu0 %v5045_v47  ;;  %2013 = vadd.xlane.f32.xlu1 %v5065_v33  ;;  %v5091_v42 = vpop.f32.mrf.mxu1  ;;  %v2328_v25 = vld [vmem:[%s3955_s16 + $0x80] sm:$0xff]  ;;  %v1692_v47 = vld [vmem:[%s3950_s9 + $0xa8] sm:$0xff] }
 0x1d0   : > { %v1960_v62 = vpop.xlane.xlu0 %1959  ;;  %v1962_v13 = vpop.xlane.xlu1 %1961  ;;  %6045 = vst [vmem:[#allocation17_spill] sm:$0xff] %v5091_v42 }
 0x1d1   : > { %v2135_v21 = vadd.f32 %v1960_v62, %v1751_v35  ;;  %v2136_v51 = vadd.f32 %v1962_v13, %v1752_v37  ;;  %v2329_v35 = vld [vmem:[%s3955_s16 + $0x88] sm:$0xff] }
 0x1d3   : > { %2264 = vst.msk [vmem:[%s3950_s9 + $0x280] sm:$0xff] %vm212_vm1, %v2135_v21  ;;  %2265 = vst.msk [vmem:[%s3950_s9 + $0x288] sm:$0xff] %vm212_vm1, %v2136_v51  ;;  %1879 = vadd.xlane.f32.xlu0 %v5043_v38  ;;  %1881 = vadd.xlane.f32.xlu1 %v5069_v30  ;;  %v5101_v51 = vpop.f32.mrf.mxu0 }
 0x1d4   : > { %v2605_v60 = vpop.xlane.xlu0 %2604  ;;  %v2607_v11 = vpop.xlane.xlu1 %2606 }
 0x1d5   : > { %v2842_v14 = vadd.f32 %v2605_v60, %v2330_v48  ;;  %v2843_v15 = vadd.f32 %v2607_v11, %v2331_v26  ;;  %v5103_v48 = vpop.f32.mrf.mxu1  ;;  %v1693_v26 = vld [vmem:[%s3950_s9 + $0xb0] sm:$0xff]  ;;  %v1694_v60 = vld [vmem:[%s3950_s9 + $0xb8] sm:$0xff]  ;;  %v5117_v33 = vpop.f32.mrf.mxu0 }
 0x1d6   : > { %6046 = vst [vmem:[#allocation18_spill] sm:$0xff] %v5103_v48 }
 0x1d7   : > { %2970 = vst.msk [vmem:[%s3955_s16 + $0x90] sm:$0xff] %vm212_vm1, %v2842_v14  ;;  %2971 = vst.msk [vmem:[%s3955_s16 + $0x98] sm:$0xff] %vm212_vm1, %v2843_v15  ;;  %2007 = vadd.xlane.f32.xlu0 %v5055_v28  ;;  %2009 = vadd.xlane.f32.xlu1 %v5081_v0  ;;  %v2334_v28 = vld [vmem:[%s3955_s16 + $0xb0] sm:$0xff] }
 0x1d8   : > { %v2601_v37 = vpop.xlane.xlu0 %2600  ;;  %v2603_v62 = vpop.xlane.xlu1 %2602 }
 0x1d9   : > { %v2840_v13 = vadd.f32 %v2601_v37, %v2328_v25  ;;  %v2841_v21 = vadd.f32 %v2603_v62, %v2329_v35  ;;  %v5113_v35 = vpop.f32.mrf.mxu1  ;;  %v1757_v37 = vld [vmem:[%s3950_s9 + $0x2b0] sm:$0xff]  ;;  %v1758_v62 = vld [vmem:[%s3950_s9 + $0x2b8] sm:$0xff] }
 0x1da   : > { %6047 = vst [vmem:[#allocation19_spill] sm:$0xff] %v5113_v35 }
 0x1db   : > { %2968 = vst.msk [vmem:[%s3955_s16 + $0x80] sm:$0xff] %vm212_vm1, %v2840_v13  ;;  %2969 = vst.msk [vmem:[%s3955_s16 + $0x88] sm:$0xff] %vm212_vm1, %v2841_v21  ;;  %1891 = vadd.xlane.f32.xlu0 %v5077_v59  ;;  %1893 = vadd.xlane.f32.xlu1 %v5101_v51  ;;  %v5129_v0 = vpop.f32.mrf.mxu1 }
 0x1dc   : > { %v1844_v11 = vpop.xlane.xlu0 %1843  ;;  %v1846_v14 = vpop.xlane.xlu1 %1845  ;;  %6048 = vst [vmem:[#allocation20_spill] sm:$0xff] %v5129_v0 }
 0x1dd   : > { %v2077_v15 = vadd.f32 %v1844_v11, %v1693_v26  ;;  %v2078_v25 = vadd.f32 %v1846_v14, %v1694_v60  ;;  %v5125_v11 = vpop.f32.mrf.mxu0  ;;  %v1691_v14 = vld [vmem:[%s3950_s9 + $0xa0] sm:$0xff] }
 0x1df   : > { %2206 = vst.msk [vmem:[%s3950_s9 + $0xb0] sm:$0xff] %vm212_vm1, %v2077_v15  ;;  %2207 = vst.msk [vmem:[%s3950_s9 + $0xb8] sm:$0xff] %vm212_vm1, %v2078_v25  ;;  %2019 = vadd.xlane.f32.xlu0 %v5091_v42  ;;  %2021 = vadd.xlane.f32.xlu1 %v5113_v35  ;;  %v1755_v35 = vld [vmem:[%s3950_s9 + $0x2a0] sm:$0xff] }
 0x1e0   : > { %v1972_v13 = vpop.xlane.xlu0 %1971  ;;  %v1974_v21 = vpop.xlane.xlu1 %1973 }
 0x1e1   : > { %v2141_v26 = vadd.f32 %v1972_v13, %v1757_v37  ;;  %v2142_v60 = vadd.f32 %v1974_v21, %v1758_v62  ;;  %v5137_v13 = vpop.f32.mrf.mxu0  ;;  %v5139_v21 = vpop.f32.mrf.mxu1 }
 0x1e2   : > { %6049 = vst [vmem:[#allocation21_spill] sm:$0xff] %v5139_v21 }
 0x1e3   : > { %2270 = vst.msk [vmem:[%s3950_s9 + $0x2b0] sm:$0xff] %vm212_vm1, %v2141_v26  ;;  %2271 = vst.msk [vmem:[%s3950_s9 + $0x2b8] sm:$0xff] %vm212_vm1, %v2142_v60  ;;  %1887 = vadd.xlane.f32.xlu0 %v5089_v16  ;;  %1889 = vadd.xlane.f32.xlu1 %v5117_v33  ;;  %v1756_v26 = vld [vmem:[%s3950_s9 + $0x2a8] sm:$0xff]  ;;  %v5151_v42 = vpop.f32.mrf.mxu1 }
 0x1e4   : > { %v1840_v15 = vpop.xlane.xlu0 %1839  ;;  %v1842_v25 = vpop.xlane.xlu1 %1841  ;;  %6050 = vst [vmem:[#allocation22_spill] sm:$0xff] %v5151_v42 }
 0x1e5   : > { %v2075_v37 = vadd.f32 %v1840_v15, %v1691_v14  ;;  %v2076_v62 = vadd.f32 %v1842_v25, %v1692_v47  ;;  %v5149_v25 = vpop.f32.mrf.mxu0 }
 0x1e7   : > { %2204 = vst.msk [vmem:[%s3950_s9 + $0xa0] sm:$0xff] %vm212_vm1, %v2075_v37  ;;  %2205 = vst.msk [vmem:[%s3950_s9 + $0xa8] sm:$0xff] %vm212_vm1, %v2076_v62  ;;  %2015 = vadd.xlane.f32.xlu0 %v5103_v48  ;;  %2017 = vadd.xlane.f32.xlu1 %v5129_v0  ;;  %v2335_v37 = vld [vmem:[%s3955_s16 + $0xb8] sm:$0xff]  ;;  %v2332_v0 = vld [vmem:[%s3955_s16 + $0xa0] sm:$0xff]  ;;  %v5165_v18 = vpop.f32.mrf.mxu0 }
 0x1e8   : > { %v1968_v60 = vpop.xlane.xlu0 %1967  ;;  %v1970_v14 = vpop.xlane.xlu1 %1969  ;;  %v2333_v48 = vld [vmem:[%s3955_s16 + $0xa8] sm:$0xff] }
 0x1e9   : > { %v2139_v47 = vadd.f32 %v1968_v60, %v1755_v35  ;;  %v2140_v15 = vadd.f32 %v1970_v14, %v1756_v26  ;;  %v5161_v14 = vpop.f32.mrf.mxu1 }
 0x1ea   : > { %6051 = vst [vmem:[#allocation23_spill] sm:$0xff] %v5161_v14 }
 0x1eb   : > { %2268 = vst.msk [vmem:[%s3950_s9 + $0x2a0] sm:$0xff] %vm212_vm1, %v2139_v47  ;;  %2269 = vst.msk [vmem:[%s3950_s9 + $0x2a8] sm:$0xff] %vm212_vm1, %v2140_v15  ;;  %1899 = vadd.xlane.f32.xlu0 %v5125_v11  ;;  %1901 = vadd.xlane.f32.xlu1 %v5149_v25  ;;  %v5177_v52 = vpop.f32.mrf.mxu1 }
 0x1ec   : > { %v2613_v62 = vpop.xlane.xlu0 %2612  ;;  %v2615_v35 = vpop.xlane.xlu1 %2614  ;;  %6052 = vst [vmem:[#allocation24_spill] sm:$0xff] %v5177_v52 }
 0x1ed   : > { %v2846_v26 = vadd.f32 %v2613_v62, %v2334_v28  ;;  %v2847_v60 = vadd.f32 %v2615_v35, %v2335_v37  ;;  %v5173_v62 = vpop.f32.mrf.mxu0  ;;  %v1697_v35 = vld [vmem:[%s3950_s9 + $0xd0] sm:$0xff] }
 0x1ef   : > { %2974 = vst.msk [vmem:[%s3955_s16 + $0xb0] sm:$0xff] %vm212_vm1, %v2846_v26  ;;  %2975 = vst.msk [vmem:[%s3955_s16 + $0xb8] sm:$0xff] %vm212_vm1, %v2847_v60  ;;  %2027 = vadd.xlane.f32.xlu0 %v5139_v21  ;;  %2029 = vadd.xlane.f32.xlu1 %v5161_v14  ;;  %v1761_v14 = vld [vmem:[%s3950_s9 + $0x2d0] sm:$0xff] }
 0x1f0   : > { %v2609_v47 = vpop.xlane.xlu0 %2608  ;;  %v2611_v28 = vpop.xlane.xlu1 %2610 }
 0x1f1   : > { %v2844_v15 = vadd.f32 %v2609_v47, %v2332_v0  ;;  %v2845_v37 = vadd.f32 %v2611_v28, %v2333_v48  ;;  %v5185_v47 = vpop.f32.mrf.mxu0  ;;  %v5187_v28 = vpop.f32.mrf.mxu1 }
 0x1f2   : > { %6053 = vst [vmem:[#allocation25_spill] sm:$0xff] %v5187_v28 }
 0x1f3   : > { %2972 = vst.msk [vmem:[%s3955_s16 + $0xa0] sm:$0xff] %vm212_vm1, %v2844_v15  ;;  %2973 = vst.msk [vmem:[%s3955_s16 + $0xa8] sm:$0xff] %vm212_vm1, %v2845_v37  ;;  %1895 = vadd.xlane.f32.xlu0 %v5137_v13  ;;  %1897 = vadd.xlane.f32.xlu1 %v5165_v18  ;;  %v1762_v15 = vld [vmem:[%s3950_s9 + $0x2d8] sm:$0xff]  ;;  %v5199_v21 = vpop.f32.mrf.mxu1 }
 0x1f4   : > { %v1852_v0 = vpop.xlane.xlu0 %1851  ;;  %v1854_v26 = vpop.xlane.xlu1 %1853  ;;  %6054 = vst [vmem:[#allocation26_spill] sm:$0xff] %v5199_v21 }
 0x1f5   : > { %v2081_v48 = vadd.f32 %v1852_v0, %v1697_v35  ;;  %v2082_v60 = vadd.f32 %v1854_v26, %v1698_v49  ;;  %v5197_v26 = vpop.f32.mrf.mxu0 }
 0x1f7   : > { %2210 = vst.msk [vmem:[%s3950_s9 + $0xd0] sm:$0xff] %vm212_vm1, %v2081_v48  ;;  %2211 = vst.msk [vmem:[%s3950_s9 + $0xd8] sm:$0xff] %vm212_vm1, %v2082_v60  ;;  %2023 = vadd.xlane.f32.xlu0 %v5151_v42  ;;  %2025 = vadd.xlane.f32.xlu1 %v5177_v52  ;;  %v1696_v48 = vld [vmem:[%s3950_s9 + $0xc8] sm:$0xff]  ;;  %v1759_v52 = vld [vmem:[%s3950_s9 + $0x2c0] sm:$0xff]  ;;  %v5213_v40 = vpop.f32.mrf.mxu0 }
 0x1f8   : > { %v1980_v37 = vpop.xlane.xlu0 %1979  ;;  %v1982_v35 = vpop.xlane.xlu1 %1981  ;;  %v1760_v42 = vld [vmem:[%s3950_s9 + $0x2c8] sm:$0xff] }
 0x1f9   : > { %v2145_v49 = vadd.f32 %v1980_v37, %v1761_v14  ;;  %v2146_v0 = vadd.f32 %v1982_v35, %v1762_v15  ;;  %v5209_v35 = vpop.f32.mrf.mxu1 }
 0x1fa   : > { %6055 = vst [vmem:[#allocation27_spill] sm:$0xff] %v5209_v35 }
 0x1fb   : > { %2274 = vst.msk [vmem:[%s3950_s9 + $0x2d0] sm:$0xff] %vm212_vm1, %v2145_v49  ;;  %2275 = vst.msk [vmem:[%s3950_s9 + $0x2d8] sm:$0xff] %vm212_vm1, %v2146_v0  ;;  %1907 = vadd.xlane.f32.xlu0 %v5173_v62  ;;  %1909 = vadd.xlane.f32.xlu1 %v5197_v26  ;;  %v5225_v54 = vpop.f32.mrf.mxu1 }
 0x1fc   : > { %v1848_v60 = vpop.xlane.xlu0 %1847  ;;  %v1850_v14 = vpop.xlane.xlu1 %1849  ;;  %6056 = vst [vmem:[#allocation28_spill] sm:$0xff] %v5225_v54 }
 0x1fd   : > { %v2079_v15 = vadd.f32 %v1848_v60, %v1695_v63  ;;  %v2080_v37 = vadd.f32 %v1850_v14, %v1696_v48  ;;  %v5221_v60 = vpop.f32.mrf.mxu0  ;;  %v2338_v14 = vld [vmem:[%s3955_s16 + $0xd0] sm:$0xff] }
 0x1ff   : > { %2208 = vst.msk [vmem:[%s3950_s9 + $0xc0] sm:$0xff] %vm212_vm1, %v2079_v15  ;;  %2209 = vst.msk [vmem:[%s3950_s9 + $0xc8] sm:$0xff] %vm212_vm1, %v2080_v37  ;;  %2035 = vadd.xlane.f32.xlu0 %v5187_v28  ;;  %2037 = vadd.xlane.f32.xlu1 %v5209_v35  ;;  %v2336_v35 = vld [vmem:[%s3955_s16 + $0xc0] sm:$0xff] }
 0x200   : > { %v1976_v49 = vpop.xlane.xlu0 %1975  ;;  %v1978_v63 = vpop.xlane.xlu1 %1977 }
 0x201   : > { %v2143_v0 = vadd.f32 %v1976_v49, %v1759_v52  ;;  %v2144_v48 = vadd.f32 %v1978_v63, %v1760_v42  ;;  %v5233_v49 = vpop.f32.mrf.mxu0  ;;  %v5235_v63 = vpop.f32.mrf.mxu1 }
 0x202   : > { %6057 = vst [vmem:[#allocation29_spill] sm:$0xff] %v5235_v63 }
 0x203   : > { %2272 = vst.msk [vmem:[%s3950_s9 + $0x2c0] sm:$0xff] %vm212_vm1, %v2143_v0  ;;  %2273 = vst.msk [vmem:[%s3950_s9 + $0x2c8] sm:$0xff] %vm212_vm1, %v2144_v48  ;;  %1903 = vadd.xlane.f32.xlu0 %v5185_v47  ;;  %1905 = vadd.xlane.f32.xlu1 %v5213_v40  ;;  %v2337_v0 = vld [vmem:[%s3955_s16 + $0xc8] sm:$0xff]  ;;  %v5247_v28 = vpop.f32.mrf.mxu1 }
 0x204   : > { %v2621_v52 = vpop.xlane.xlu0 %2620  ;;  %v2623_v15 = vpop.xlane.xlu1 %2622  ;;  %6058 = vst [vmem:[#allocation30_spill] sm:$0xff] %v5247_v28 }
 0x205   : > { %v2850_v42 = vadd.f32 %v2621_v52, %v2338_v14  ;;  %v2851_v37 = vadd.f32 %v2623_v15, %v2339_v7  ;;  %v5245_v15 = vpop.f32.mrf.mxu0 }
 0x207   : > { %2978 = vst.msk [vmem:[%s3955_s16 + $0xd0] sm:$0xff] %vm212_vm1, %v2850_v42  ;;  %2979 = vst.msk [vmem:[%s3955_s16 + $0xd8] sm:$0xff] %vm212_vm1, %v2851_v37  ;;  %2031 = vadd.xlane.f32.xlu0 %v5199_v21  ;;  %2033 = vadd.xlane.f32.xlu1 %v5225_v54  ;;  %v1702_v42 = vld [vmem:[%s3950_s9 + $0xf8] sm:$0xff]  ;;  %v1765_v54 = vld [vmem:[%s3950_s9 + $0x2f0] sm:$0xff] }
 0x208   : > { %v2617_v48 = vpop.xlane.xlu0 %2616  ;;  %v2619_v14 = vpop.xlane.xlu1 %2618  ;;  %v1766_v21 = vld [vmem:[%s3950_s9 + $0x2f8] sm:$0xff] }
 0x209   : > { %v2848_v7 = vadd.f32 %v2617_v48, %v2336_v35  ;;  %v2849_v52 = vadd.f32 %v2619_v14, %v2337_v0  ;;  %v5257_v14 = vpop.f32.mrf.mxu1 }
 0x20a   : > { %6059 = vst [vmem:[#allocation31_spill] sm:$0xff] %v5257_v14 }
 0x20b   : > { %2976 = vst.msk [vmem:[%s3955_s16 + $0xc0] sm:$0xff] %vm212_vm1, %v2848_v7  ;;  %2977 = vst.msk [vmem:[%s3955_s16 + $0xc8] sm:$0xff] %vm212_vm1, %v2849_v52  ;;  %1915 = vadd.xlane.f32.xlu0 %v5221_v60  ;;  %1917 = vadd.xlane.f32.xlu1 %v5245_v15 }
 0x20c   : > { %v1860_v37 = vpop.xlane.xlu0 %1859  ;;  %v1862_v35 = vpop.xlane.xlu1 %1861 }
 0x20d   : > { %v2085_v0 = vadd.f32 %v1860_v37, %v1701_v23  ;;  %v2086_v48 = vadd.f32 %v1862_v35, %v1702_v42  ;;  %v5267_v42 = vpop.f32.mrf.mxu0  ;;  %v1699_v37 = vld [vmem:[%s3950_s9 + $0xe0] sm:$0xff]  ;;  %v1700_v35 = vld [vmem:[%s3950_s9 + $0xe8] sm:$0xff] }
 0x20f   : > { %2214 = vst.msk [vmem:[%s3950_s9 + $0xf0] sm:$0xff] %vm212_vm1, %v2085_v0  ;;  %2215 = vst.msk [vmem:[%s3950_s9 + $0xf8] sm:$0xff] %vm212_vm1, %v2086_v48  ;;  %2043 = vadd.xlane.f32.xlu0 %v5235_v63  ;;  %2045 = vadd.xlane.f32.xlu1 %v5257_v14 }
 0x210   : > { %v1988_v7 = vpop.xlane.xlu0 %1987  ;;  %v1990_v52 = vpop.xlane.xlu1 %1989 }
 0x211   : > { %v2149_v2 = vadd.f32 %v1988_v7, %v1765_v54  ;;  %v2150_v23 = vadd.f32 %v1990_v52, %v1766_v21  ;;  %v5277_v21 = vpop.f32.mrf.mxu1  ;;  %v5279_v7 = vpop.f32.mrf.mxu0  ;;  %v1763_v52 = vld [vmem:[%s3950_s9 + $0x2e0] sm:$0xff] }
 0x212   : > { %6060 = vst [vmem:[#allocation32_spill] sm:$0xff] %v5277_v21 }
 0x213   : > { %2278 = vst.msk [vmem:[%s3950_s9 + $0x2f0] sm:$0xff] %vm212_vm1, %v2149_v2  ;;  %2279 = vst.msk [vmem:[%s3950_s9 + $0x2f8] sm:$0xff] %vm212_vm1, %v2150_v23  ;;  %1911 = vadd.xlane.f32.xlu0 %v5233_v49  ;;  %1913 = vadd.xlane.f32.xlu1 %v5267_v42  ;;  %v1764_v2 = vld [vmem:[%s3950_s9 + $0x2e8] sm:$0xff]  ;;  %v5291_v63 = vpop.f32.mrf.mxu0  ;;  %v5293_v45 = vpop.f32.mrf.mxu1 }
 0x214   : > { %v1856_v0 = vpop.xlane.xlu0 %1855  ;;  %v1858_v48 = vpop.xlane.xlu1 %1857  ;;  %6061 = vst [vmem:[#allocation33_spill] sm:$0xff] %v5293_v45 }
 0x215   : > { %v2083_v14 = vadd.f32 %v1856_v0, %v1699_v37  ;;  %v2084_v54 = vadd.f32 %v1858_v48, %v1700_v35  ;;  %v2481_v35 = vmul.f32 %v5069_v30, %v5069_v30 }
 0x217   : > { %2212 = vst.msk [vmem:[%s3950_s9 + $0xe0] sm:$0xff] %vm212_vm1, %v2083_v14  ;;  %2213 = vst.msk [vmem:[%s3950_s9 + $0xe8] sm:$0xff] %vm212_vm1, %v2084_v54  ;;  %2039 = vadd.xlane.f32.xlu0 %v5247_v28  ;;  %2041 = vadd.xlane.f32.xlu1 %v5277_v21  ;;  %v2342_v14 = vld [vmem:[%s3955_s16 + $0xf0] sm:$0xff]  ;;  %v2343_v54 = vld [vmem:[%s3955_s16 + $0xf8] sm:$0xff]  ;;  %v5304_v21 = vpop.f32.mrf.mxu1 }
 0x218   : > { %v1984_v23 = vpop.xlane.xlu0 %1983  ;;  %v1986_v37 = vpop.xlane.xlu1 %1985  ;;  %6062 = vst [vmem:[#allocation34_spill] sm:$0xff] %v5304_v21  ;;  %v2340_v28 = vld [vmem:[%s3955_s16 + $0xe0] sm:$0xff] }
 0x219   : > { %v2147_v0 = vadd.f32 %v1984_v23, %v1763_v52  ;;  %v2148_v48 = vadd.f32 %v1986_v37, %v1764_v2  ;;  %v5302_v37 = vpop.f32.mrf.mxu0 }
 0x21b   : > { %2276 = vst.msk [vmem:[%s3950_s9 + $0x2e0] sm:$0xff] %vm212_vm1, %v2147_v0  ;;  %2277 = vst.msk [vmem:[%s3950_s9 + $0x2e8] sm:$0xff] %vm212_vm1, %v2148_v48  ;;  %2650 = vadd.xlane.f32.xlu1 %v2481_v35  ;;  %1923 = vadd.xlane.f32.xlu0 %v5279_v7 }
 0x21c   : > { %v2629_v30 = vpop.xlane.xlu0 %2628  ;;  %v2631_v52 = vpop.xlane.xlu1 %2630 }
 0x21d   : > { %v2854_v2 = vadd.f32 %v2629_v30, %v2342_v14  ;;  %v2855_v23 = vadd.f32 %v2631_v52, %v2343_v54  ;;  %v5314_v54 = vpop.f32.mrf.mxu1  ;;  %v1705_v30 = vld [vmem:[%s3950_s9 + $0x110] sm:$0xff]  ;;  %v1706_v52 = vld [vmem:[%s3950_s9 + $0x118] sm:$0xff] }
 0x21e   : > { %6063 = vst [vmem:[#allocation35_spill] sm:$0xff] %v5314_v54 }
 0x21f   : > { %2982 = vst.msk [vmem:[%s3955_s16 + $0xf0] sm:$0xff] %vm212_vm1, %v2854_v2  ;;  %2983 = vst.msk [vmem:[%s3955_s16 + $0xf8] sm:$0xff] %vm212_vm1, %v2855_v23  ;;  %2051 = vadd.xlane.f32.xlu0 %v5293_v45  ;;  %1925 = vadd.xlane.f32.xlu1 %v5302_v37 }
 0x220   : > { %v2625_v35 = vpop.xlane.xlu0 %2624  ;;  %v2627_v0 = vpop.xlane.xlu1 %2626 }
 0x221   : > { %v2852_v48 = vadd.f32 %v2625_v35, %v2340_v28  ;;  %v2853_v14 = vadd.f32 %v2627_v0, %v2341_v36  ;;  %v5324_v36 = vpop.f32.mrf.mxu0  ;;  %v1769_v35 = vld [vmem:[%s3950_s9 + $0x310] sm:$0xff]  ;;  %v1770_v0 = vld [vmem:[%s3950_s9 + $0x318] sm:$0xff] }
 0x223   : > { %2980 = vst.msk [vmem:[%s3955_s16 + $0xe0] sm:$0xff] %vm212_vm1, %v2852_v48  ;;  %2981 = vst.msk [vmem:[%s3955_s16 + $0xe8] sm:$0xff] %vm212_vm1, %v2853_v14  ;;  %1919 = vadd.xlane.f32.xlu0 %v5291_v63  ;;  %2053 = vadd.xlane.f32.xlu1 %v5314_v54  ;;  %v1704_v54 = vld [vmem:[%s3950_s9 + $0x108] sm:$0xff] }
 0x224   : > { %v1868_v2 = vpop.xlane.xlu0 %1867  ;;  %v1870_v23 = vpop.xlane.xlu1 %1869 }
 0x225   : > { %v2089_v45 = vadd.f32 %v1868_v2, %v1705_v30  ;;  %v2090_v28 = vadd.f32 %v1870_v23, %v1706_v52  ;;  %v2480_v30 = vmul.f32 %v5043_v38, %v5043_v38  ;;  %v5336_v23 = vpop.f32.mrf.mxu1  ;;  %v2482_v38 = vmul.f32 %v5033_v24, %v5033_v24 }
 0x226   : > { %v2484_v24 = vmul.f32 %v5089_v16, %v5089_v16  ;;  %v2486_v16 = vmul.f32 %v5077_v59, %v5077_v59  ;;  %v2488_v59 = vmul.f32 %v5137_v13, %v5137_v13  ;;  %v2490_v13 = vmul.f32 %v5125_v11, %v5125_v11 }
 0x227   : > { %2218 = vst.msk [vmem:[%s3950_s9 + $0x110] sm:$0xff] %vm212_vm1, %v2089_v45  ;;  %2219 = vst.msk [vmem:[%s3950_s9 + $0x118] sm:$0xff] %vm212_vm1, %v2090_v28  ;;  %2047 = vadd.xlane.f32.xlu0 %v5304_v21  ;;  %1921 = vadd.xlane.f32.xlu1 %v5324_v36  ;;  %v1703_v45 = vld [vmem:[%s3950_s9 + $0x100] sm:$0xff]  ;;  %v2492_v11 = vmul.f32 %v5185_v47, %v5185_v47  ;;  %v2494_v47 = vmul.f32 %v5173_v62, %v5173_v62 }
 0x228   : > { %v1996_v48 = vpop.xlane.xlu0 %1995  ;;  %v1998_v14 = vpop.xlane.xlu1 %1997  ;;  %v2496_v62 = vmul.f32 %v5233_v49, %v5233_v49  ;;  %v2498_v49 = vmul.f32 %v5221_v60, %v5221_v60  ;;  %v2500_v60 = vmul.f32 %v5291_v63, %v5291_v63  ;;  %v2502_v63 = vmul.f32 %v5279_v7, %v5279_v7 }
 0x229   : > { %v2153_v52 = vadd.f32 %v1996_v48, %v1769_v35  ;;  %v2154_v2 = vadd.f32 %v1998_v14, %v1770_v0  ;;  %v2483_v35 = vmul.f32 %v5053_v61, %v5053_v61  ;;  %v1767_v14 = vld [vmem:[%s3950_s9 + $0x300] sm:$0xff]  ;;  %v2485_v61 = vmul.f32 %v5117_v33, %v5117_v33 }
 0x22a   : > { %v2487_v33 = vmul.f32 %v5101_v51, %v5101_v51  ;;  %v2489_v51 = vmul.f32 %v5165_v18, %v5165_v18  ;;  %v2491_v18 = vmul.f32 %v5149_v25, %v5149_v25  ;;  %v2493_v25 = vmul.f32 %v5213_v40, %v5213_v40 }
 0x22b   : > { %2282 = vst.msk [vmem:[%s3950_s9 + $0x310] sm:$0xff] %vm212_vm1, %v2153_v52  ;;  %2283 = vst.msk [vmem:[%s3950_s9 + $0x318] sm:$0xff] %vm212_vm1, %v2154_v2  ;;  %2648 = vadd.xlane.f32.xlu0 %v2480_v30  ;;  %2049 = vadd.xlane.f32.xlu1 %v5336_v23  ;;  %v1768_v52 = vld [vmem:[%s3950_s9 + $0x308] sm:$0xff]  ;;  %v2495_v40 = vmul.f32 %v5197_v26, %v5197_v26  ;;  %v2497_v26 = vmul.f32 %v5267_v42, %v5267_v42 }
 0x22c   : > { %v1864_v28 = vpop.xlane.xlu0 %1863  ;;  %v1866_v21 = vpop.xlane.xlu1 %1865  ;;  %v2499_v42 = vmul.f32 %v5245_v15, %v5245_v15  ;;  %v2501_v15 = vmul.f32 %v5324_v36, %v5324_v36  ;;  %v2503_v36 = vmul.f32 %v5302_v37, %v5302_v37  ;;  %v2504_v7 = vmul.f32 %v4733_v6, %v4733_v6 }
 0x22d   : > { %v2087_v0 = vadd.f32 %v1864_v28, %v1703_v45  ;;  %v2088_v48 = vadd.f32 %v1866_v21, %v1704_v54  ;;  %v2346_v45 = vld [vmem:[%s3955_s16 + $0x110] sm:$0xff]  ;;  %v2347_v28 = vld [vmem:[%s3955_s16 + $0x118] sm:$0xff]  ;;  %v2505_v37 = vmul.f32 %v4742_v10, %v4742_v10  ;;  %v2506_v6 = vmul.f32 %v3959_v3, %v3959_v3 }
 0x22e   : > { %v2507_v10 = vmul.f32 %v4736_v8, %v4736_v8  ;;  %v2508_v3 = vmul.f32 %v4749_v19, %v4749_v19  ;;  %v2509_v8 = vmul.f32 %v4755_v22, %v4755_v22  ;;  %v2510_v19 = vmul.f32 %v4747_v17, %v4747_v17 }
 0x22f   : > { %2216 = vst.msk [vmem:[%s3950_s9 + $0x100] sm:$0xff] %vm212_vm1, %v2087_v0  ;;  %2217 = vst.msk [vmem:[%s3950_s9 + $0x108] sm:$0xff] %vm212_vm1, %v2088_v48  ;;  %2652 = vadd.xlane.f32.xlu0 %v2482_v38  ;;  %2654 = vadd.xlane.f32.xlu1 %v2483_v35  ;;  %v2511_v22 = vmul.f32 %v4751_v20, %v4751_v20  ;;  %v2512_v17 = vmul.f32 %v4761_v31, %v4761_v31 }
 0x230   : > { %v1992_v30 = vpop.xlane.xlu0 %1991  ;;  %v1994_v2 = vpop.xlane.xlu1 %1993  ;;  %v2513_v20 = vmul.f32 %v4767_v34, %v4767_v34  ;;  %v2514_v31 = vmul.f32 %v4759_v29, %v4759_v29  ;;  %v2515_v34 = vmul.f32 %v4763_v32, %v4763_v32  ;;  %v2516_v29 = vmul.f32 %v4773_v43, %v4773_v43 }
 0x231   : > { %v2151_v21 = vadd.f32 %v1992_v30, %v1767_v14  ;;  %v2152_v54 = vadd.f32 %v1994_v2, %v1768_v52  ;;  %v2344_v14 = vld [vmem:[%s3955_s16 + $0x100] sm:$0xff]  ;;  %v2345_v52 = vld [vmem:[%s3955_s16 + $0x108] sm:$0xff]  ;;  %v2517_v32 = vmul.f32 %v4779_v46, %v4779_v46  ;;  %v2518_v43 = vmul.f32 %v4771_v41, %v4771_v41 }
 0x232   : > { %v2519_v46 = vmul.f32 %v4775_v44, %v4775_v44  ;;  %v2520_v41 = vmul.f32 %v4785_v55, %v4785_v55  ;;  %v2521_v44 = vmul.f32 %v4791_v58, %v4791_v58  ;;  %v2522_v55 = vmul.f32 %v4783_v53, %v4783_v53 }
 0x233   : > { %2280 = vst.msk [vmem:[%s3950_s9 + $0x300] sm:$0xff] %vm212_vm1, %v2151_v21  ;;  %2281 = vst.msk [vmem:[%s3950_s9 + $0x308] sm:$0xff] %vm212_vm1, %v2152_v54  ;;  %2656 = vadd.xlane.f32.xlu0 %v2484_v24  ;;  %2658 = vadd.xlane.f32.xlu1 %v2485_v61  ;;  %v1709_v21 = vld [vmem:[%s3950_s9 + $0x130] sm:$0xff]  ;;  %v1710_v54 = vld [vmem:[%s3950_s9 + $0x138] sm:$0xff]  ;;  %v2523_v58 = vmul.f32 %v4787_v56, %v4787_v56  ;;  %v2524_v53 = vmul.f32 %v4797_v4, %v4797_v4 }
 0x234   : > { %v2637_v38 = vpop.xlane.xlu0 %2636  ;;  %v2639_v35 = vpop.xlane.xlu1 %2638  ;;  %v2525_v56 = vmul.f32 %v4803_v9, %v4803_v9  ;;  %v2526_v4 = vmul.f32 %v4795_v1, %v4795_v1  ;;  %v2527_v9 = vmul.f32 %v4799_v5, %v4799_v5  ;;  %v2528_v1 = vmul.f32 %v4821_v39, %v4821_v39 }
 0x235   : > { %v2858_v0 = vadd.f32 %v2637_v38, %v2346_v45  ;;  %v2859_v48 = vadd.f32 %v2639_v35, %v2347_v28  ;;  %v2529_v5 = vmul.f32 %v4847_v12, %v4847_v12  ;;  %v2530_v39 = vmul.f32 %v4813_v27, %v4813_v27 }
 0x236   : > { %v2531_v12 = vmul.f32 %v4830_v50, %v4830_v50  ;;  %v2532_v27 = vmul.f32 %v4879_v57, %v4879_v57  ;;  %v6065_v57 = vld [vmem:[#allocation2_spill] sm:$0xff] }
 0x237   : > { %2986 = vst.msk [vmem:[%s3955_s16 + $0x110] sm:$0xff] %vm212_vm1, %v2858_v0  ;;  %2987 = vst.msk [vmem:[%s3955_s16 + $0x118] sm:$0xff] %vm212_vm1, %v2859_v48  ;;  %2660 = vadd.xlane.f32.xlu0 %v2486_v16  ;;  %2662 = vadd.xlane.f32.xlu1 %v2487_v33  ;;  %v1773_v16 = vld [vmem:[%s3950_s9 + $0x330] sm:$0xff]  ;;  %v1774_v33 = vld [vmem:[%s3950_s9 + $0x338] sm:$0xff] }
 0x238   : > { %v2633_v30 = vpop.xlane.xlu0 %2632  ;;  %v2635_v2 = vpop.xlane.xlu1 %2634 }
 0x239   : > { %v2856_v24 = vadd.f32 %v2633_v30, %v2344_v14  ;;  %v2857_v61 = vadd.f32 %v2635_v2, %v2345_v52  ;;  %v1707_v30 = vld [vmem:[%s3950_s9 + $0x120] sm:$0xff]  ;;  %v1708_v2 = vld [vmem:[%s3950_s9 + $0x128] sm:$0xff] }
 0x23b   : > { %2984 = vst.msk [vmem:[%s3955_s16 + $0x100] sm:$0xff] %vm212_vm1, %v2856_v24  ;;  %2985 = vst.msk [vmem:[%s3955_s16 + $0x108] sm:$0xff] %vm212_vm1, %v2857_v61  ;;  %2664 = vadd.xlane.f32.xlu0 %v2488_v59  ;;  %2666 = vadd.xlane.f32.xlu1 %v2489_v51 }
 0x23c   : > { %v1876_v45 = vpop.xlane.xlu0 %1875  ;;  %v1878_v28 = vpop.xlane.xlu1 %1877 }
 0x23d   : > { %v2093_v38 = vadd.f32 %v1876_v45, %v1709_v21  ;;  %v2094_v35 = vadd.f32 %v1878_v28, %v1710_v54  ;;  %v1771_v21 = vld [vmem:[%s3950_s9 + $0x320] sm:$0xff]  ;;  %v1772_v54 = vld [vmem:[%s3950_s9 + $0x328] sm:$0xff] }
 0x23f   : > { %2222 = vst.msk [vmem:[%s3950_s9 + $0x130] sm:$0xff] %vm212_vm1, %v2093_v38  ;;  %2223 = vst.msk [vmem:[%s3950_s9 + $0x138] sm:$0xff] %vm212_vm1, %v2094_v35  ;;  %2668 = vadd.xlane.f32.xlu0 %v2490_v13  ;;  %2670 = vadd.xlane.f32.xlu1 %v2491_v18  ;;  %v2350_v38 = vld [vmem:[%s3955_s16 + $0x130] sm:$0xff]  ;;  %v2351_v35 = vld [vmem:[%s3955_s16 + $0x138] sm:$0xff] }
 0x240   : > { %v2004_v0 = vpop.xlane.xlu0 %2003  ;;  %v2006_v48 = vpop.xlane.xlu1 %2005 }
 0x241   : > { %v2157_v14 = vadd.f32 %v2004_v0, %v1773_v16  ;;  %v2158_v52 = vadd.f32 %v2006_v48, %v1774_v33 }
 0x243   : > { %2286 = vst.msk [vmem:[%s3950_s9 + $0x330] sm:$0xff] %vm212_vm1, %v2157_v14  ;;  %2287 = vst.msk [vmem:[%s3950_s9 + $0x338] sm:$0xff] %vm212_vm1, %v2158_v52  ;;  %2672 = vadd.xlane.f32.xlu0 %v2492_v11  ;;  %2674 = vadd.xlane.f32.xlu1 %v2493_v25  ;;  %v2348_v11 = vld [vmem:[%s3955_s16 + $0x120] sm:$0xff]  ;;  %v2349_v25 = vld [vmem:[%s3955_s16 + $0x128] sm:$0xff] }
 0x244   : > { %v1872_v59 = vpop.xlane.xlu0 %1871  ;;  %v1874_v51 = vpop.xlane.xlu1 %1873 }
 0x245   : > { %v2091_v24 = vadd.f32 %v1872_v59, %v1707_v30  ;;  %v2092_v61 = vadd.f32 %v1874_v51, %v1708_v2  ;;  %v1713_v59 = vld [vmem:[%s3950_s9 + $0x150] sm:$0xff]  ;;  %v1714_v51 = vld [vmem:[%s3950_s9 + $0x158] sm:$0xff] }
 0x247   : > { %2220 = vst.msk [vmem:[%s3950_s9 + $0x120] sm:$0xff] %vm212_vm1, %v2091_v24  ;;  %2221 = vst.msk [vmem:[%s3950_s9 + $0x128] sm:$0xff] %vm212_vm1, %v2092_v61  ;;  %2676 = vadd.xlane.f32.xlu0 %v2494_v47  ;;  %2678 = vadd.xlane.f32.xlu1 %v2495_v40 }
 0x248   : > { %v2000_v45 = vpop.xlane.xlu0 %1999  ;;  %v2002_v28 = vpop.xlane.xlu1 %2001 }
 0x249   : > { %v2155_v13 = vadd.f32 %v2000_v45, %v1771_v21  ;;  %v2156_v18 = vadd.f32 %v2002_v28, %v1772_v54  ;;  %v1777_v21 = vld [vmem:[%s3950_s9 + $0x350] sm:$0xff]  ;;  %v1778_v54 = vld [vmem:[%s3950_s9 + $0x358] sm:$0xff] }
 0x24b   : > { %2284 = vst.msk [vmem:[%s3950_s9 + $0x320] sm:$0xff] %vm212_vm1, %v2155_v13  ;;  %2285 = vst.msk [vmem:[%s3950_s9 + $0x328] sm:$0xff] %vm212_vm1, %v2156_v18  ;;  %2680 = vadd.xlane.f32.xlu0 %v2496_v62  ;;  %2682 = vadd.xlane.f32.xlu1 %v2497_v26  ;;  %v1711_v13 = vld [vmem:[%s3950_s9 + $0x140] sm:$0xff]  ;;  %v1712_v18 = vld [vmem:[%s3950_s9 + $0x148] sm:$0xff] }
 0x24c   : > { %v2645_v16 = vpop.xlane.xlu0 %2644  ;;  %v2647_v33 = vpop.xlane.xlu1 %2646 }
 0x24d   : > { %v2862_v0 = vadd.f32 %v2645_v16, %v2350_v38  ;;  %v2863_v48 = vadd.f32 %v2647_v33, %v2351_v35 }
 0x24f   : > { %2990 = vst.msk [vmem:[%s3955_s16 + $0x130] sm:$0xff] %vm212_vm1, %v2862_v0  ;;  %2991 = vst.msk [vmem:[%s3955_s16 + $0x138] sm:$0xff] %vm212_vm1, %v2863_v48  ;;  %2684 = vadd.xlane.f32.xlu0 %v2498_v49  ;;  %2686 = vadd.xlane.f32.xlu1 %v2499_v42  ;;  %v1775_v49 = vld [vmem:[%s3950_s9 + $0x340] sm:$0xff]  ;;  %v1776_v42 = vld [vmem:[%s3950_s9 + $0x348] sm:$0xff] }
 0x250   : > { %v2641_v14 = vpop.xlane.xlu0 %2640  ;;  %v2643_v52 = vpop.xlane.xlu1 %2642 }
 0x251   : > { %v2860_v30 = vadd.f32 %v2641_v14, %v2348_v11  ;;  %v2861_v2 = vadd.f32 %v2643_v52, %v2349_v25  ;;  %v1717_v14 = vld [vmem:[%s3950_s9 + $0x170] sm:$0xff]  ;;  %v1718_v52 = vld [vmem:[%s3950_s9 + $0x178] sm:$0xff] }
 0x253   : > { %2988 = vst.msk [vmem:[%s3955_s16 + $0x120] sm:$0xff] %vm212_vm1, %v2860_v30  ;;  %2989 = vst.msk [vmem:[%s3955_s16 + $0x128] sm:$0xff] %vm212_vm1, %v2861_v2  ;;  %2688 = vadd.xlane.f32.xlu0 %v2500_v60  ;;  %2690 = vadd.xlane.f32.xlu1 %v2501_v15 }
 0x254   : > { %v1884_v47 = vpop.xlane.xlu0 %1883  ;;  %v1886_v40 = vpop.xlane.xlu1 %1885 }
 0x255   : > { %v2097_v24 = vadd.f32 %v1884_v47, %v1713_v59  ;;  %v2098_v61 = vadd.f32 %v1886_v40, %v1714_v51  ;;  %v1781_v59 = vld [vmem:[%s3950_s9 + $0x370] sm:$0xff]  ;;  %v1782_v51 = vld [vmem:[%s3950_s9 + $0x378] sm:$0xff] }
 0x257   : > { %2226 = vst.msk [vmem:[%s3950_s9 + $0x150] sm:$0xff] %vm212_vm1, %v2097_v24  ;;  %2227 = vst.msk [vmem:[%s3950_s9 + $0x158] sm:$0xff] %vm212_vm1, %v2098_v61  ;;  %2692 = vadd.xlane.f32.xlu0 %v2502_v63  ;;  %2694 = vadd.xlane.f32.xlu1 %v2503_v36  ;;  %v1715_v24 = vld [vmem:[%s3950_s9 + $0x160] sm:$0xff]  ;;  %v1716_v61 = vld [vmem:[%s3950_s9 + $0x168] sm:$0xff] }
 0x258   : > { %v2012_v45 = vpop.xlane.xlu0 %2011  ;;  %v2014_v28 = vpop.xlane.xlu1 %2013 }
 0x259   : > { %v2161_v62 = vadd.f32 %v2012_v45, %v1777_v21  ;;  %v2162_v26 = vadd.f32 %v2014_v28, %v1778_v54 }
 0x25b   : > { %2290 = vst.msk [vmem:[%s3950_s9 + $0x350] sm:$0xff] %vm212_vm1, %v2161_v62  ;;  %2291 = vst.msk [vmem:[%s3950_s9 + $0x358] sm:$0xff] %vm212_vm1, %v2162_v26  ;;  %2696 = vadd.xlane.f32.xlu0 %v2504_v7  ;;  %2698 = vadd.xlane.f32.xlu1 %v2505_v37  ;;  %v1779_v7 = vld [vmem:[%s3950_s9 + $0x360] sm:$0xff]  ;;  %v1780_v37 = vld [vmem:[%s3950_s9 + $0x368] sm:$0xff] }
 0x25c   : > { %v1880_v38 = vpop.xlane.xlu0 %1879  ;;  %v1882_v35 = vpop.xlane.xlu1 %1881 }
 0x25d   : > { %v2095_v16 = vadd.f32 %v1880_v38, %v1711_v13  ;;  %v2096_v33 = vadd.f32 %v1882_v35, %v1712_v18  ;;  %v1721_v38 = vld [vmem:[%s3950_s9 + $0x190] sm:$0xff]  ;;  %v1722_v35 = vld [vmem:[%s3950_s9 + $0x198] sm:$0xff] }
 0x25f   : > { %2224 = vst.msk [vmem:[%s3950_s9 + $0x140] sm:$0xff] %vm212_vm1, %v2095_v16  ;;  %2225 = vst.msk [vmem:[%s3950_s9 + $0x148] sm:$0xff] %vm212_vm1, %v2096_v33  ;;  %2700 = vadd.xlane.f32.xlu0 %v2506_v6  ;;  %2702 = vadd.xlane.f32.xlu1 %v2507_v10 }
 0x260   : > { %v2008_v0 = vpop.xlane.xlu0 %2007  ;;  %v2010_v48 = vpop.xlane.xlu1 %2009 }
 0x261   : > { %v2159_v11 = vadd.f32 %v2008_v0, %v1775_v49  ;;  %v2160_v25 = vadd.f32 %v2010_v48, %v1776_v42  ;;  %v1785_v49 = vld [vmem:[%s3950_s9 + $0x390] sm:$0xff]  ;;  %v1786_v42 = vld [vmem:[%s3950_s9 + $0x398] sm:$0xff] }
 0x263   : > { %2288 = vst.msk [vmem:[%s3950_s9 + $0x340] sm:$0xff] %vm212_vm1, %v2159_v11  ;;  %2289 = vst.msk [vmem:[%s3950_s9 + $0x348] sm:$0xff] %vm212_vm1, %v2160_v25  ;;  %2704 = vadd.xlane.f32.xlu0 %v2508_v3  ;;  %2706 = vadd.xlane.f32.xlu1 %v2509_v8  ;;  %v1719_v11 = vld [vmem:[%s3950_s9 + $0x180] sm:$0xff]  ;;  %v1720_v25 = vld [vmem:[%s3950_s9 + $0x188] sm:$0xff] }
 0x264   : > { %v1892_v60 = vpop.xlane.xlu0 %1891  ;;  %v1894_v15 = vpop.xlane.xlu1 %1893 }
 0x265   : > { %v2101_v30 = vadd.f32 %v1892_v60, %v1717_v14  ;;  %v2102_v2 = vadd.f32 %v1894_v15, %v1718_v52 }
 0x267   : > { %2230 = vst.msk [vmem:[%s3950_s9 + $0x170] sm:$0xff] %vm212_vm1, %v2101_v30  ;;  %2231 = vst.msk [vmem:[%s3950_s9 + $0x178] sm:$0xff] %vm212_vm1, %v2102_v2  ;;  %2708 = vadd.xlane.f32.xlu0 %v2510_v19  ;;  %2710 = vadd.xlane.f32.xlu1 %v2511_v22  ;;  %v1783_v19 = vld [vmem:[%s3950_s9 + $0x380] sm:$0xff]  ;;  %v1784_v22 = vld [vmem:[%s3950_s9 + $0x388] sm:$0xff] }
 0x268   : > { %v2020_v47 = vpop.xlane.xlu0 %2019  ;;  %v2022_v40 = vpop.xlane.xlu1 %2021 }
 0x269   : > { %v2165_v63 = vadd.f32 %v2020_v47, %v1781_v59  ;;  %v2166_v36 = vadd.f32 %v2022_v40, %v1782_v51  ;;  %v1725_v47 = vld [vmem:[%s3950_s9 + $0x1b0] sm:$0xff]  ;;  %v1726_v40 = vld [vmem:[%s3950_s9 + $0x1b8] sm:$0xff] }
 0x26b   : > { %2294 = vst.msk [vmem:[%s3950_s9 + $0x370] sm:$0xff] %vm212_vm1, %v2165_v63  ;;  %2295 = vst.msk [vmem:[%s3950_s9 + $0x378] sm:$0xff] %vm212_vm1, %v2166_v36  ;;  %2712 = vadd.xlane.f32.xlu0 %v2512_v17  ;;  %2714 = vadd.xlane.f32.xlu1 %v2513_v20 }
 0x26c   : > { %v1888_v21 = vpop.xlane.xlu0 %1887  ;;  %v1890_v54 = vpop.xlane.xlu1 %1889 }
 0x26d   : > { %v2099_v45 = vadd.f32 %v1888_v21, %v1715_v24  ;;  %v2100_v28 = vadd.f32 %v1890_v54, %v1716_v61  ;;  %v1789_v24 = vld [vmem:[%s3950_s9 + $0x3b0] sm:$0xff]  ;;  %v1790_v61 = vld [vmem:[%s3950_s9 + $0x3b8] sm:$0xff] }
 0x26f   : > { %2228 = vst.msk [vmem:[%s3950_s9 + $0x160] sm:$0xff] %vm212_vm1, %v2099_v45  ;;  %2229 = vst.msk [vmem:[%s3950_s9 + $0x168] sm:$0xff] %vm212_vm1, %v2100_v28  ;;  %2716 = vadd.xlane.f32.xlu0 %v2514_v31  ;;  %2718 = vadd.xlane.f32.xlu1 %v2515_v34  ;;  %v1723_v45 = vld [vmem:[%s3950_s9 + $0x1a0] sm:$0xff]  ;;  %v1724_v28 = vld [vmem:[%s3950_s9 + $0x1a8] sm:$0xff] }
 0x270   : > { %v2016_v62 = vpop.xlane.xlu0 %2015  ;;  %v2018_v26 = vpop.xlane.xlu1 %2017 }
 0x271   : > { %v2163_v13 = vadd.f32 %v2016_v62, %v1779_v7  ;;  %v2164_v18 = vadd.f32 %v2018_v26, %v1780_v37 }
 0x273   : > { %2292 = vst.msk [vmem:[%s3950_s9 + $0x360] sm:$0xff] %vm212_vm1, %v2163_v13  ;;  %2293 = vst.msk [vmem:[%s3950_s9 + $0x368] sm:$0xff] %vm212_vm1, %v2164_v18  ;;  %2720 = vadd.xlane.f32.xlu0 %v2516_v29  ;;  %2722 = vadd.xlane.f32.xlu1 %v2517_v32  ;;  %v1787_v29 = vld [vmem:[%s3950_s9 + $0x3a0] sm:$0xff]  ;;  %v1788_v32 = vld [vmem:[%s3950_s9 + $0x3a8] sm:$0xff] }
 0x274   : > { %v1900_v6 = vpop.xlane.xlu0 %1899  ;;  %v1902_v10 = vpop.xlane.xlu1 %1901 }
 0x275   : > { %v2105_v16 = vadd.f32 %v1900_v6, %v1721_v38  ;;  %v2106_v33 = vadd.f32 %v1902_v10, %v1722_v35  ;;  %v6064_v38 = vld [vmem:[#allocation4_spill] sm:$0xff] }
 0x276   : > { %v2533_v50 = vmul.f32 %v6064_v38, %v6064_v38  ;;  %v1729_v10 = vld [vmem:[%s3950_s9 + $0x1d0] sm:$0xff] }
 0x277   : > { %2234 = vst.msk [vmem:[%s3950_s9 + $0x190] sm:$0xff] %vm212_vm1, %v2105_v16  ;;  %2235 = vst.msk [vmem:[%s3950_s9 + $0x198] sm:$0xff] %vm212_vm1, %v2106_v33  ;;  %2724 = vadd.xlane.f32.xlu0 %v2518_v43  ;;  %2726 = vadd.xlane.f32.xlu1 %v2519_v46  ;;  %v1730_v43 = vld [vmem:[%s3950_s9 + $0x1d8] sm:$0xff]  ;;  %v2534_v33 = vmul.f32 %v6065_v57, %v6065_v57 }
 0x278   : > { %v2028_v0 = vpop.xlane.xlu0 %2027  ;;  %v2030_v48 = vpop.xlane.xlu1 %2029 }
 0x279   : > { %v2169_v3 = vadd.f32 %v2028_v0, %v1785_v49  ;;  %v2170_v8 = vadd.f32 %v2030_v48, %v1786_v42  ;;  %v6066_v49 = vld [vmem:[#allocation3_spill] sm:$0xff] }
 0x27a   : > { %v2535_v42 = vmul.f32 %v6066_v49, %v6066_v49 }
 0x27b   : > { %2298 = vst.msk [vmem:[%s3950_s9 + $0x390] sm:$0xff] %vm212_vm1, %v2169_v3  ;;  %2299 = vst.msk [vmem:[%s3950_s9 + $0x398] sm:$0xff] %vm212_vm1, %v2170_v8  ;;  %2728 = vadd.xlane.f32.xlu0 %v2520_v41  ;;  %2730 = vadd.xlane.f32.xlu1 %v2521_v44  ;;  %v1793_v41 = vld [vmem:[%s3950_s9 + $0x3d0] sm:$0xff]  ;;  %v1794_v44 = vld [vmem:[%s3950_s9 + $0x3d8] sm:$0xff] }
 0x27c   : > { %v1896_v14 = vpop.xlane.xlu0 %1895  ;;  %v1898_v52 = vpop.xlane.xlu1 %1897 }
 0x27d   : > { %v2103_v60 = vadd.f32 %v1896_v14, %v1719_v11  ;;  %v2104_v15 = vadd.f32 %v1898_v52, %v1720_v25  ;;  %v6067_v11 = vld [vmem:[#allocation6_spill] sm:$0xff]  ;;  %v6068_v14 = vld [vmem:[#allocation8_spill] sm:$0xff] }
 0x27e   : > { %v2536_v25 = vmul.f32 %v6067_v11, %v6067_v11  ;;  %v2537_v52 = vmul.f32 %v6068_v14, %v6068_v14 }
 0x27f   : > { %2232 = vst.msk [vmem:[%s3950_s9 + $0x180] sm:$0xff] %vm212_vm1, %v2103_v60  ;;  %2233 = vst.msk [vmem:[%s3950_s9 + $0x188] sm:$0xff] %vm212_vm1, %v2104_v15  ;;  %2732 = vadd.xlane.f32.xlu0 %v2522_v55  ;;  %2734 = vadd.xlane.f32.xlu1 %v2523_v58  ;;  %v1727_v60 = vld [vmem:[%s3950_s9 + $0x1c0] sm:$0xff]  ;;  %v1728_v15 = vld [vmem:[%s3950_s9 + $0x1c8] sm:$0xff] }
 0x280   : > { %v2024_v30 = vpop.xlane.xlu0 %2023  ;;  %v2026_v2 = vpop.xlane.xlu1 %2025 }
 0x281   : > { %v2167_v59 = vadd.f32 %v2024_v30, %v1783_v19  ;;  %v2168_v51 = vadd.f32 %v2026_v2, %v1784_v22  ;;  %v6069_v30 = vld [vmem:[#allocation5_spill] sm:$0xff] }
 0x282   : > { %v2538_v2 = vmul.f32 %v6069_v30, %v6069_v30 }
 0x283   : > { %2296 = vst.msk [vmem:[%s3950_s9 + $0x380] sm:$0xff] %vm212_vm1, %v2167_v59  ;;  %2297 = vst.msk [vmem:[%s3950_s9 + $0x388] sm:$0xff] %vm212_vm1, %v2168_v51  ;;  %2736 = vadd.xlane.f32.xlu0 %v2524_v53  ;;  %2738 = vadd.xlane.f32.xlu1 %v2525_v56  ;;  %v6070_v53 = vld [vmem:[#allocation7_spill] sm:$0xff] }
 0x284   : > { %v1908_v17 = vpop.xlane.xlu0 %1907  ;;  %v1910_v20 = vpop.xlane.xlu1 %1909  ;;  %v2539_v56 = vmul.f32 %v6070_v53, %v6070_v53 }
 0x285   : > { %v2109_v63 = vadd.f32 %v1908_v17, %v1725_v47  ;;  %v2110_v36 = vadd.f32 %v1910_v20, %v1726_v40  ;;  %v1791_v47 = vld [vmem:[%s3950_s9 + $0x3c0] sm:$0xff]  ;;  %v1792_v40 = vld [vmem:[%s3950_s9 + $0x3c8] sm:$0xff] }
 0x287   : > { %2238 = vst.msk [vmem:[%s3950_s9 + $0x1b0] sm:$0xff] %vm212_vm1, %v2109_v63  ;;  %2239 = vst.msk [vmem:[%s3950_s9 + $0x1b8] sm:$0xff] %vm212_vm1, %v2110_v36  ;;  %2740 = vadd.xlane.f32.xlu0 %v2526_v4  ;;  %2742 = vadd.xlane.f32.xlu1 %v2527_v9  ;;  %v6071_v4 = vld [vmem:[#allocation10_spill] sm:$0xff]  ;;  %v6072_v63 = vld [vmem:[#allocation12_spill] sm:$0xff] }
 0x288   : > { %v2036_v21 = vpop.xlane.xlu0 %2035  ;;  %v2038_v54 = vpop.xlane.xlu1 %2037  ;;  %v2540_v9 = vmul.f32 %v6071_v4, %v6071_v4  ;;  %v2541_v36 = vmul.f32 %v6072_v63, %v6072_v63 }
 0x289   : > { %v2173_v31 = vadd.f32 %v2036_v21, %v1789_v24  ;;  %v2174_v34 = vadd.f32 %v2038_v54, %v1790_v61  ;;  %v2353_v21 = vld [vmem:[%s3955_s16 + $0x148] sm:$0xff]  ;;  %v1733_v54 = vld [vmem:[%s3950_s9 + $0x1f0] sm:$0xff] }
 0x28b   : > { %2302 = vst.msk [vmem:[%s3950_s9 + $0x3b0] sm:$0xff] %vm212_vm1, %v2173_v31  ;;  %2303 = vst.msk [vmem:[%s3950_s9 + $0x3b8] sm:$0xff] %vm212_vm1, %v2174_v34  ;;  %2744 = vadd.xlane.f32.xlu0 %v2528_v1  ;;  %2746 = vadd.xlane.f32.xlu1 %v2529_v5  ;;  %v6073_v31 = vld [vmem:[#allocation9_spill] sm:$0xff] }
 0x28c   : > { %v1904_v7 = vpop.xlane.xlu0 %1903  ;;  %v1906_v37 = vpop.xlane.xlu1 %1905  ;;  %v2542_v34 = vmul.f32 %v6073_v31, %v6073_v31 }
 0x28d   : > { %v2107_v62 = vadd.f32 %v1904_v7, %v1723_v45  ;;  %v2108_v26 = vadd.f32 %v1906_v37, %v1724_v28  ;;  %v6074_v45 = vld [vmem:[#allocation11_spill] sm:$0xff] }
 0x28e   : > { %v2543_v28 = vmul.f32 %v6074_v45, %v6074_v45 }
 0x28f   : > { %2236 = vst.msk [vmem:[%s3950_s9 + $0x1a0] sm:$0xff] %vm212_vm1, %v2107_v62  ;;  %2237 = vst.msk [vmem:[%s3950_s9 + $0x1a8] sm:$0xff] %vm212_vm1, %v2108_v26  ;;  %2748 = vadd.xlane.f32.xlu0 %v2530_v39  ;;  %2750 = vadd.xlane.f32.xlu1 %v2531_v12  ;;  %v1797_v39 = vld [vmem:[%s3950_s9 + $0x3f0] sm:$0xff]  ;;  %v1734_v12 = vld [vmem:[%s3950_s9 + $0x1f8] sm:$0xff] }
 0x290   : > { %v2032_v13 = vpop.xlane.xlu0 %2031  ;;  %v2034_v18 = vpop.xlane.xlu1 %2033 }
 0x291   : > { %v2171_v35 = vadd.f32 %v2032_v13, %v1787_v29  ;;  %v2172_v6 = vadd.f32 %v2034_v18, %v1788_v32  ;;  %v6075_v29 = vld [vmem:[#allocation14_spill] sm:$0xff]  ;;  %v6076_v13 = vld [vmem:[#allocation16_spill] sm:$0xff] }
 0x292   : > { %v2544_v32 = vmul.f32 %v6075_v29, %v6075_v29  ;;  %v2545_v18 = vmul.f32 %v6076_v13, %v6076_v13 }
 0x293   : > { %2300 = vst.msk [vmem:[%s3950_s9 + $0x3a0] sm:$0xff] %vm212_vm1, %v2171_v35  ;;  %2301 = vst.msk [vmem:[%s3950_s9 + $0x3a8] sm:$0xff] %vm212_vm1, %v2172_v6  ;;  %2752 = vadd.xlane.f32.xlu0 %v2532_v27  ;;  %2754 = vadd.xlane.f32.xlu1 %v2533_v50  ;;  %v1731_v50 = vld [vmem:[%s3950_s9 + $0x1e0] sm:$0xff]  ;;  %v1798_v35 = vld [vmem:[%s3950_s9 + $0x3f8] sm:$0xff] }
 0x294   : > { %v1916_v46 = vpop.xlane.xlu0 %1915  ;;  %v1918_v16 = vpop.xlane.xlu1 %1917 }
 0x295   : > { %v2113_v0 = vadd.f32 %v1916_v46, %v1729_v10  ;;  %v2114_v48 = vadd.f32 %v1918_v16, %v1730_v43  ;;  %v6077_v43 = vld [vmem:[#allocation13_spill] sm:$0xff]  ;;  %v6078_v16 = vld [vmem:[#allocation15_spill] sm:$0xff] }
 0x296   : > { %v2546_v46 = vmul.f32 %v6077_v43, %v6077_v43  ;;  %v2547_v57 = vmul.f32 %v6078_v16, %v6078_v16 }
 0x297   : > { %2242 = vst.msk [vmem:[%s3950_s9 + $0x1d0] sm:$0xff] %vm212_vm1, %v2113_v0  ;;  %2243 = vst.msk [vmem:[%s3950_s9 + $0x1d8] sm:$0xff] %vm212_vm1, %v2114_v48  ;;  %2756 = vadd.xlane.f32.xlu0 %v2534_v33  ;;  %2758 = vadd.xlane.f32.xlu1 %v2535_v42  ;;  %v1795_v42 = vld [vmem:[%s3950_s9 + $0x3e0] sm:$0xff]  ;;  %v1732_v0 = vld [vmem:[%s3950_s9 + $0x1e8] sm:$0xff] }
 0x298   : > { %v2044_v3 = vpop.xlane.xlu0 %2043  ;;  %v2046_v8 = vpop.xlane.xlu1 %2045 }
 0x299   : > { %v2177_v55 = vadd.f32 %v2044_v3, %v1793_v41  ;;  %v2178_v58 = vadd.f32 %v2046_v8, %v1794_v44  ;;  %v6079_v44 = vld [vmem:[#allocation18_spill] sm:$0xff]  ;;  %v6080_v8 = vld [vmem:[#allocation20_spill] sm:$0xff] }
 0x29a   : > { %v2548_v3 = vmul.f32 %v6079_v44, %v6079_v44  ;;  %v2549_v11 = vmul.f32 %v6080_v8, %v6080_v8 }
 0x29b   : > { %2306 = vst.msk [vmem:[%s3950_s9 + $0x3d0] sm:$0xff] %vm212_vm1, %v2177_v55  ;;  %2307 = vst.msk [vmem:[%s3950_s9 + $0x3d8] sm:$0xff] %vm212_vm1, %v2178_v58  ;;  %2760 = vadd.xlane.f32.xlu0 %v2536_v25  ;;  %2762 = vadd.xlane.f32.xlu1 %v2537_v52  ;;  %v2352_v52 = vld [vmem:[%s3955_s16 + $0x140] sm:$0xff]  ;;  %v1796_v55 = vld [vmem:[%s3950_s9 + $0x3e8] sm:$0xff] }
 0x29c   : > { %v1912_v19 = vpop.xlane.xlu0 %1911  ;;  %v1914_v22 = vpop.xlane.xlu1 %1913 }
 0x29d   : > { %v2111_v59 = vadd.f32 %v1912_v19, %v1727_v60  ;;  %v2112_v51 = vadd.f32 %v1914_v22, %v1728_v15  ;;  %v6081_v15 = vld [vmem:[#allocation17_spill] sm:$0xff]  ;;  %v6082_v22 = vld [vmem:[#allocation19_spill] sm:$0xff] }
 0x29e   : > { %v2550_v19 = vmul.f32 %v6081_v15, %v6081_v15  ;;  %v2551_v30 = vmul.f32 %v6082_v22, %v6082_v22 }
 0x29f   : > { %2240 = vst.msk [vmem:[%s3950_s9 + $0x1c0] sm:$0xff] %vm212_vm1, %v2111_v59  ;;  %2241 = vst.msk [vmem:[%s3950_s9 + $0x1c8] sm:$0xff] %vm212_vm1, %v2112_v51  ;;  %2764 = vadd.xlane.f32.xlu0 %v2538_v2  ;;  %2766 = vadd.xlane.f32.xlu1 %v2539_v56  ;;  %v2354_v56 = vld [vmem:[%s3955_s16 + $0x150] sm:$0xff]  ;;  %v2355_v59 = vld [vmem:[%s3955_s16 + $0x158] sm:$0xff] }
 0x2a0   : > { %v2040_v17 = vpop.xlane.xlu0 %2039  ;;  %v2042_v20 = vpop.xlane.xlu1 %2041 }
 0x2a1   : > { %v2175_v24 = vadd.f32 %v2040_v17, %v1791_v47  ;;  %v2176_v61 = vadd.f32 %v2042_v20, %v1792_v40  ;;  %v6083_v40 = vld [vmem:[#allocation22_spill] sm:$0xff]  ;;  %v6084_v20 = vld [vmem:[#allocation24_spill] sm:$0xff] }
 0x2a2   : > { %v2552_v17 = vmul.f32 %v6083_v40, %v6083_v40  ;;  %v2553_v4 = vmul.f32 %v6084_v20, %v6084_v20  ;;  %v2368_v20 = vld [vmem:[%s3955_s16 + $0x1c0] sm:$0xff] }
 0x2a3   : > { %2304 = vst.msk [vmem:[%s3950_s9 + $0x3c0] sm:$0xff] %vm212_vm1, %v2175_v24  ;;  %2305 = vst.msk [vmem:[%s3950_s9 + $0x3c8] sm:$0xff] %vm212_vm1, %v2176_v61  ;;  %2768 = vadd.xlane.f32.xlu0 %v2540_v9  ;;  %2770 = vadd.xlane.f32.xlu1 %v2541_v36  ;;  %v2356_v36 = vld [vmem:[%s3955_s16 + $0x160] sm:$0xff]  ;;  %v2357_v24 = vld [vmem:[%s3955_s16 + $0x168] sm:$0xff] }
 0x2a4   : > { %v2651_v1 = vpop.xlane.xlu1 %2650  ;;  %v1924_v5 = vpop.xlane.xlu0 %1923 }
 0x2a5   : > { %v2865_v7 = vadd.f32 %v2651_v1, %v2353_v21  ;;  %v2117_v37 = vadd.f32 %v1924_v5, %v1733_v54  ;;  %v6085_v54 = vld [vmem:[#allocation21_spill] sm:$0xff]  ;;  %v6086_v5 = vld [vmem:[#allocation23_spill] sm:$0xff] }
 0x2a6   : > { %v2554_v1 = vmul.f32 %v6085_v54, %v6085_v54  ;;  %v2555_v31 = vmul.f32 %v6086_v5, %v6086_v5  ;;  %v2371_v5 = vld [vmem:[%s3955_s16 + $0x1d8] sm:$0xff] }
 0x2a7   : > { %2993 = vst.msk [vmem:[%s3955_s16 + $0x148] sm:$0xff] %vm212_vm1, %v2865_v7  ;;  %2246 = vst.msk [vmem:[%s3950_s9 + $0x1f0] sm:$0xff] %vm212_vm1, %v2117_v37  ;;  %2772 = vadd.xlane.f32.xlu0 %v2542_v34  ;;  %2774 = vadd.xlane.f32.xlu1 %v2543_v28  ;;  %v2358_v28 = vld [vmem:[%s3955_s16 + $0x170] sm:$0xff]  ;;  %v2359_v7 = vld [vmem:[%s3955_s16 + $0x178] sm:$0xff] }
 0x2a8   : > { %v2052_v62 = vpop.xlane.xlu0 %2051  ;;  %v1926_v26 = vpop.xlane.xlu1 %1925 }
 0x2a9   : > { %v2181_v27 = vadd.f32 %v2052_v62, %v1797_v39  ;;  %v2118_v38 = vadd.f32 %v1926_v26, %v1734_v12  ;;  %v6087_v12 = vld [vmem:[#allocation26_spill] sm:$0xff]  ;;  %v6088_v26 = vld [vmem:[#allocation28_spill] sm:$0xff] }
 0x2aa   : > { %v2556_v62 = vmul.f32 %v6087_v12, %v6087_v12  ;;  %v2557_v29 = vmul.f32 %v6088_v26, %v6088_v26 }
 0x2ab   : > { %2310 = vst.msk [vmem:[%s3950_s9 + $0x3f0] sm:$0xff] %vm212_vm1, %v2181_v27  ;;  %2247 = vst.msk [vmem:[%s3950_s9 + $0x1f8] sm:$0xff] %vm212_vm1, %v2118_v38  ;;  %2776 = vadd.xlane.f32.xlu0 %v2544_v32  ;;  %2778 = vadd.xlane.f32.xlu1 %v2545_v18  ;;  %v2360_v18 = vld [vmem:[%s3955_s16 + $0x180] sm:$0xff]  ;;  %v2361_v27 = vld [vmem:[%s3955_s16 + $0x188] sm:$0xff] }
 0x2ac   : > { %v1920_v6 = vpop.xlane.xlu0 %1919  ;;  %v2054_v10 = vpop.xlane.xlu1 %2053 }
 0x2ad   : > { %v2115_v33 = vadd.f32 %v1920_v6, %v1731_v50  ;;  %v2182_v49 = vadd.f32 %v2054_v10, %v1798_v35  ;;  %v6089_v35 = vld [vmem:[#allocation25_spill] sm:$0xff]  ;;  %v6090_v10 = vld [vmem:[#allocation27_spill] sm:$0xff] }
 0x2ae   : > { %v2558_v6 = vmul.f32 %v6089_v35, %v6089_v35  ;;  %v2559_v43 = vmul.f32 %v6090_v10, %v6090_v10  ;;  %v2377_v35 = vld [vmem:[%s3955_s16 + $0x208] sm:$0xff] }
 0x2af   : > { %2244 = vst.msk [vmem:[%s3950_s9 + $0x1e0] sm:$0xff] %vm212_vm1, %v2115_v33  ;;  %2311 = vst.msk [vmem:[%s3950_s9 + $0x3f8] sm:$0xff] %vm212_vm1, %v2182_v49  ;;  %2780 = vadd.xlane.f32.xlu0 %v2546_v46  ;;  %2782 = vadd.xlane.f32.xlu1 %v2547_v57  ;;  %v2362_v57 = vld [vmem:[%s3955_s16 + $0x190] sm:$0xff]  ;;  %v2363_v33 = vld [vmem:[%s3955_s16 + $0x198] sm:$0xff] }
 0x2b0   : > { %v2048_v48 = vpop.xlane.xlu0 %2047  ;;  %v1922_v41 = vpop.xlane.xlu1 %1921 }
 0x2b1   : > { %v2179_v25 = vadd.f32 %v2048_v48, %v1795_v42  ;;  %v2116_v14 = vadd.f32 %v1922_v41, %v1732_v0  ;;  %v6091_v0 = vld [vmem:[#allocation30_spill] sm:$0xff]  ;;  %v6092_v41 = vld [vmem:[#allocation32_spill] sm:$0xff] }
 0x2b2   : > { %v2560_v48 = vmul.f32 %v6091_v0, %v6091_v0  ;;  %v2561_v44 = vmul.f32 %v6092_v41, %v6092_v41  ;;  %v2381_v41 = vld [vmem:[%s3955_s16 + $0x228] sm:$0xff] }
 0x2b3   : > { %2308 = vst.msk [vmem:[%s3950_s9 + $0x3e0] sm:$0xff] %vm212_vm1, %v2179_v25  ;;  %2245 = vst.msk [vmem:[%s3950_s9 + $0x1e8] sm:$0xff] %vm212_vm1, %v2116_v14  ;;  %2784 = vadd.xlane.f32.xlu0 %v2548_v3  ;;  %2786 = vadd.xlane.f32.xlu1 %v2549_v11  ;;  %v2364_v11 = vld [vmem:[%s3955_s16 + $0x1a0] sm:$0xff]  ;;  %v2365_v25 = vld [vmem:[%s3955_s16 + $0x1a8] sm:$0xff] }
 0x2b4   : > { %v2649_v58 = vpop.xlane.xlu0 %2648  ;;  %v2050_v60 = vpop.xlane.xlu1 %2049 }
 0x2b5   : > { %v2864_v2 = vadd.f32 %v2649_v58, %v2352_v52  ;;  %v2180_v53 = vadd.f32 %v2050_v60, %v1796_v55  ;;  %v6093_v55 = vld [vmem:[#allocation29_spill] sm:$0xff]  ;;  %v6094_v60 = vld [vmem:[#allocation31_spill] sm:$0xff] }
 0x2b6   : > { %v2562_v58 = vmul.f32 %v6093_v55, %v6093_v55  ;;  %v2563_v15 = vmul.f32 %v6094_v60, %v6094_v60 }
 0x2b7   : > { %2992 = vst.msk [vmem:[%s3955_s16 + $0x140] sm:$0xff] %vm212_vm1, %v2864_v2  ;;  %2309 = vst.msk [vmem:[%s3950_s9 + $0x3e8] sm:$0xff] %vm212_vm1, %v2180_v53  ;;  %2788 = vadd.xlane.f32.xlu0 %v2550_v19  ;;  %2790 = vadd.xlane.f32.xlu1 %v2551_v30  ;;  %v2366_v30 = vld [vmem:[%s3955_s16 + $0x1b0] sm:$0xff]  ;;  %v2367_v2 = vld [vmem:[%s3955_s16 + $0x1b8] sm:$0xff] }
 0x2b8   : > { %v2653_v51 = vpop.xlane.xlu0 %2652  ;;  %v2655_v47 = vpop.xlane.xlu1 %2654 }
 0x2b9   : > { %v2866_v9 = vadd.f32 %v2653_v51, %v2354_v56  ;;  %v2867_v63 = vadd.f32 %v2655_v47, %v2355_v59  ;;  %v6095_v59 = vld [vmem:[#allocation34_spill] sm:$0xff]  ;;  %v2565_v47 = vmul.f32 %v5336_v23, %v5336_v23 }
 0x2ba   : > { %v2564_v51 = vmul.f32 %v6095_v59, %v6095_v59  ;;  %v2387_v59 = vld [vmem:[%s3955_s16 + $0x258] sm:$0xff] }
 0x2bb   : > { %2994 = vst.msk [vmem:[%s3955_s16 + $0x150] sm:$0xff] %vm212_vm1, %v2866_v9  ;;  %2995 = vst.msk [vmem:[%s3955_s16 + $0x158] sm:$0xff] %vm212_vm1, %v2867_v63  ;;  %2792 = vadd.xlane.f32.xlu0 %v2552_v17  ;;  %2794 = vadd.xlane.f32.xlu1 %v2553_v4  ;;  %v2369_v4 = vld [vmem:[%s3955_s16 + $0x1c8] sm:$0xff] }
 0x2bc   : > { %v2657_v61 = vpop.xlane.xlu0 %2656  ;;  %v2659_v21 = vpop.xlane.xlu1 %2658 }
 0x2bd   : > { %v2868_v34 = vadd.f32 %v2657_v61, %v2356_v36  ;;  %v2869_v45 = vadd.f32 %v2659_v21, %v2357_v24  ;;  %v6096_v36 = vld [vmem:[#allocation33_spill] sm:$0xff]  ;;  %v6097_v24 = vld [vmem:[#allocation35_spill] sm:$0xff] }
 0x2be   : > { %v2566_v23 = vmul.f32 %v6096_v36, %v6096_v36  ;;  %v2567_v61 = vmul.f32 %v6097_v24, %v6097_v24  ;;  %v2390_v24 = vld [vmem:[%s3955_s16 + $0x270] sm:$0xff] }
 0x2bf   : > { %2996 = vst.msk [vmem:[%s3955_s16 + $0x160] sm:$0xff] %vm212_vm1, %v2868_v34  ;;  %2997 = vst.msk [vmem:[%s3955_s16 + $0x168] sm:$0xff] %vm212_vm1, %v2869_v45  ;;  %2796 = vadd.xlane.f32.xlu0 %v2554_v1  ;;  %2798 = vadd.xlane.f32.xlu1 %v2555_v31  ;;  %v2370_v1 = vld [vmem:[%s3955_s16 + $0x1d0] sm:$0xff] }
 0x2c0   : > { %v2661_v37 = vpop.xlane.xlu0 %2660  ;;  %v2663_v39 = vpop.xlane.xlu1 %2662 }
 0x2c1   : > { %v2870_v32 = vadd.f32 %v2661_v37, %v2358_v28  ;;  %v2871_v13 = vadd.f32 %v2663_v39, %v2359_v7  ;;  %v2372_v7 = vld [vmem:[%s3955_s16 + $0x1e0] sm:$0xff]  ;;  %v2373_v37 = vld [vmem:[%s3955_s16 + $0x1e8] sm:$0xff] }
 0x2c3   : > { %2998 = vst.msk [vmem:[%s3955_s16 + $0x170] sm:$0xff] %vm212_vm1, %v2870_v32  ;;  %2999 = vst.msk [vmem:[%s3955_s16 + $0x178] sm:$0xff] %vm212_vm1, %v2871_v13  ;;  %2800 = vadd.xlane.f32.xlu0 %v2556_v62  ;;  %2802 = vadd.xlane.f32.xlu1 %v2557_v29  ;;  %v2374_v29 = vld [vmem:[%s3955_s16 + $0x1f0] sm:$0xff]  ;;  %v2375_v32 = vld [vmem:[%s3955_s16 + $0x1f8] sm:$0xff] }
 0x2c4   : > { %v2665_v38 = vpop.xlane.xlu0 %2664  ;;  %v2667_v50 = vpop.xlane.xlu1 %2666 }
 0x2c5   : > { %v2872_v46 = vadd.f32 %v2665_v38, %v2360_v18  ;;  %v2873_v16 = vadd.f32 %v2667_v50, %v2361_v27  ;;  %v2376_v50 = vld [vmem:[%s3955_s16 + $0x200] sm:$0xff] }
 0x2c7   : > { %3000 = vst.msk [vmem:[%s3955_s16 + $0x180] sm:$0xff] %vm212_vm1, %v2872_v46  ;;  %3001 = vst.msk [vmem:[%s3955_s16 + $0x188] sm:$0xff] %vm212_vm1, %v2873_v16  ;;  %2804 = vadd.xlane.f32.xlu0 %v2558_v6  ;;  %2806 = vadd.xlane.f32.xlu1 %v2559_v43  ;;  %v2378_v16 = vld [vmem:[%s3955_s16 + $0x210] sm:$0xff] }
 0x2c8   : > { %v2669_v49 = vpop.xlane.xlu0 %2668  ;;  %v2671_v42 = vpop.xlane.xlu1 %2670 }
 0x2c9   : > { %v2874_v3 = vadd.f32 %v2669_v49, %v2362_v57  ;;  %v2875_v8 = vadd.f32 %v2671_v42, %v2363_v33  ;;  %v2379_v57 = vld [vmem:[%s3955_s16 + $0x218] sm:$0xff] }
 0x2cb   : > { %3002 = vst.msk [vmem:[%s3955_s16 + $0x190] sm:$0xff] %vm212_vm1, %v2874_v3  ;;  %3003 = vst.msk [vmem:[%s3955_s16 + $0x198] sm:$0xff] %vm212_vm1, %v2875_v8  ;;  %2808 = vadd.xlane.f32.xlu0 %v2560_v48  ;;  %2810 = vadd.xlane.f32.xlu1 %v2561_v44  ;;  %v2380_v48 = vld [vmem:[%s3955_s16 + $0x220] sm:$0xff] }
 0x2cc   : > { %v2673_v14 = vpop.xlane.xlu0 %2672  ;;  %v2675_v52 = vpop.xlane.xlu1 %2674 }
 0x2cd   : > { %v2876_v19 = vadd.f32 %v2673_v14, %v2364_v11  ;;  %v2877_v22 = vadd.f32 %v2675_v52, %v2365_v25  ;;  %v2382_v25 = vld [vmem:[%s3955_s16 + $0x230] sm:$0xff]  ;;  %v2383_v14 = vld [vmem:[%s3955_s16 + $0x238] sm:$0xff] }
 0x2cf   : > { %3004 = vst.msk [vmem:[%s3955_s16 + $0x1a0] sm:$0xff] %vm212_vm1, %v2876_v19  ;;  %3005 = vst.msk [vmem:[%s3955_s16 + $0x1a8] sm:$0xff] %vm212_vm1, %v2877_v22  ;;  %2812 = vadd.xlane.f32.xlu0 %v2562_v58  ;;  %2814 = vadd.xlane.f32.xlu1 %v2563_v15  ;;  %v2384_v15 = vld [vmem:[%s3955_s16 + $0x240] sm:$0xff]  ;;  %v2385_v19 = vld [vmem:[%s3955_s16 + $0x248] sm:$0xff] }
 0x2d0   : > { %v2677_v53 = vpop.xlane.xlu0 %2676  ;;  %v2679_v56 = vpop.xlane.xlu1 %2678 }
 0x2d1   : > { %v2878_v40 = vadd.f32 %v2677_v53, %v2366_v30  ;;  %v2879_v17 = vadd.f32 %v2679_v56, %v2367_v2  ;;  %v2386_v56 = vld [vmem:[%s3955_s16 + $0x250] sm:$0xff] }
 0x2d3   : > { %3006 = vst.msk [vmem:[%s3955_s16 + $0x1b0] sm:$0xff] %vm212_vm1, %v2878_v40  ;;  %3007 = vst.msk [vmem:[%s3955_s16 + $0x1b8] sm:$0xff] %vm212_vm1, %v2879_v17  ;;  %2816 = vadd.xlane.f32.xlu0 %v2564_v51  ;;  %2818 = vadd.xlane.f32.xlu1 %v2565_v47 }
 0x2d4   : > { %v2681_v9 = vpop.xlane.xlu0 %2680  ;;  %v2683_v63 = vpop.xlane.xlu1 %2682 }
 0x2d5   : > { %v2880_v21 = vadd.f32 %v2681_v9, %v2368_v20  ;;  %v2881_v54 = vadd.f32 %v2683_v63, %v2369_v4  ;;  %v2388_v20 = vld [vmem:[%s3955_s16 + $0x260] sm:$0xff]  ;;  %v2389_v4 = vld [vmem:[%s3955_s16 + $0x268] sm:$0xff] }
 0x2d7   : > { %3008 = vst.msk [vmem:[%s3955_s16 + $0x1c0] sm:$0xff] %vm212_vm1, %v2880_v21  ;;  %3009 = vst.msk [vmem:[%s3955_s16 + $0x1c8] sm:$0xff] %vm212_vm1, %v2881_v54  ;;  %2820 = vadd.xlane.f32.xlu0 %v2566_v23  ;;  %2822 = vadd.xlane.f32.xlu1 %v2567_v61  ;;  %v2391_v61 = vld [vmem:[%s3955_s16 + $0x278] sm:$0xff] }
 0x2d8   : > { %v2685_v31 = vpop.xlane.xlu0 %2684  ;;  %v2687_v34 = vpop.xlane.xlu1 %2686 }
 0x2d9   : > { %v2882_v45 = vadd.f32 %v2685_v31, %v2370_v1  ;;  %v2883_v28 = vadd.f32 %v2687_v34, %v2371_v5  ;;  %v2392_v31 = vld [vmem:[%s3955_s16 + $0x280] sm:$0xff]  ;;  %v2393_v34 = vld [vmem:[%s3955_s16 + $0x288] sm:$0xff] }
 0x2db   : > { %3010 = vst.msk [vmem:[%s3955_s16 + $0x1d0] sm:$0xff] %vm212_vm1, %v2882_v45  ;;  %3011 = vst.msk [vmem:[%s3955_s16 + $0x1d8] sm:$0xff] %vm212_vm1, %v2883_v28 }
 0x2dc   : > { %v2689_v39 = vpop.xlane.xlu0 %2688  ;;  %v2691_v12 = vpop.xlane.xlu1 %2690 }
 0x2dd   : > { %v2884_v62 = vadd.f32 %v2689_v39, %v2372_v7  ;;  %v2885_v26 = vadd.f32 %v2691_v12, %v2373_v37  ;;  %v2394_v39 = vld [vmem:[%s3955_s16 + $0x290] sm:$0xff]  ;;  %v2395_v12 = vld [vmem:[%s3955_s16 + $0x298] sm:$0xff] }
 0x2df   : > { %3012 = vst.msk [vmem:[%s3955_s16 + $0x1e0] sm:$0xff] %vm212_vm1, %v2884_v62  ;;  %3013 = vst.msk [vmem:[%s3955_s16 + $0x1e8] sm:$0xff] %vm212_vm1, %v2885_v26 }
 0x2e0   : > { %v2693_v13 = vpop.xlane.xlu0 %2692  ;;  %v2695_v18 = vpop.xlane.xlu1 %2694 }
 0x2e1   : > { %v2886_v27 = vadd.f32 %v2693_v13, %v2374_v29  ;;  %v2887_v38 = vadd.f32 %v2695_v18, %v2375_v32  ;;  %v2396_v13 = vld [vmem:[%s3955_s16 + $0x2a0] sm:$0xff]  ;;  %v2397_v18 = vld [vmem:[%s3955_s16 + $0x2a8] sm:$0xff] }
 0x2e3   : > { %3014 = vst.msk [vmem:[%s3955_s16 + $0x1f0] sm:$0xff] %vm212_vm1, %v2886_v27  ;;  %3015 = vst.msk [vmem:[%s3955_s16 + $0x1f8] sm:$0xff] %vm212_vm1, %v2887_v38 }
 0x2e4   : > { %v2697_v6 = vpop.xlane.xlu0 %2696  ;;  %v2699_v10 = vpop.xlane.xlu1 %2698 }
 0x2e5   : > { %v2888_v43 = vadd.f32 %v2697_v6, %v2376_v50  ;;  %v2889_v46 = vadd.f32 %v2699_v10, %v2377_v35  ;;  %v2398_v6 = vld [vmem:[%s3955_s16 + $0x2b0] sm:$0xff]  ;;  %v2399_v10 = vld [vmem:[%s3955_s16 + $0x2b8] sm:$0xff] }
 0x2e7   : > { %3016 = vst.msk [vmem:[%s3955_s16 + $0x200] sm:$0xff] %vm212_vm1, %v2888_v43  ;;  %3017 = vst.msk [vmem:[%s3955_s16 + $0x208] sm:$0xff] %vm212_vm1, %v2889_v46 }
 0x2e8   : > { %v2701_v33 = vpop.xlane.xlu0 %2700  ;;  %v2703_v49 = vpop.xlane.xlu1 %2702 }
 0x2e9   : > { %v2890_v42 = vadd.f32 %v2701_v33, %v2378_v16  ;;  %v2891_v0 = vadd.f32 %v2703_v49, %v2379_v57  ;;  %v2400_v33 = vld [vmem:[%s3955_s16 + $0x2c0] sm:$0xff]  ;;  %v2401_v49 = vld [vmem:[%s3955_s16 + $0x2c8] sm:$0xff] }
 0x2eb   : > { %3018 = vst.msk [vmem:[%s3955_s16 + $0x210] sm:$0xff] %vm212_vm1, %v2890_v42  ;;  %3019 = vst.msk [vmem:[%s3955_s16 + $0x218] sm:$0xff] %vm212_vm1, %v2891_v0 }
 0x2ec   : > { %v2705_v44 = vpop.xlane.xlu0 %2704  ;;  %v2707_v3 = vpop.xlane.xlu1 %2706 }
 0x2ed   : > { %v2892_v8 = vadd.f32 %v2705_v44, %v2380_v48  ;;  %v2893_v11 = vadd.f32 %v2707_v3, %v2381_v41  ;;  %v2402_v44 = vld [vmem:[%s3955_s16 + $0x2d0] sm:$0xff]  ;;  %v2403_v3 = vld [vmem:[%s3955_s16 + $0x2d8] sm:$0xff] }
 0x2ef   : > { %3020 = vst.msk [vmem:[%s3955_s16 + $0x220] sm:$0xff] %vm212_vm1, %v2892_v8  ;;  %3021 = vst.msk [vmem:[%s3955_s16 + $0x228] sm:$0xff] %vm212_vm1, %v2893_v11 }
 0x2f0   : > { %v2709_v52 = vpop.xlane.xlu0 %2708  ;;  %v2711_v55 = vpop.xlane.xlu1 %2710 }
 0x2f1   : > { %v2894_v58 = vadd.f32 %v2709_v52, %v2382_v25  ;;  %v2895_v60 = vadd.f32 %v2711_v55, %v2383_v14  ;;  %v2404_v52 = vld [vmem:[%s3955_s16 + $0x2e0] sm:$0xff]  ;;  %v2405_v55 = vld [vmem:[%s3955_s16 + $0x2e8] sm:$0xff] }
 0x2f3   : > { %3022 = vst.msk [vmem:[%s3955_s16 + $0x230] sm:$0xff] %vm212_vm1, %v2894_v58  ;;  %3023 = vst.msk [vmem:[%s3955_s16 + $0x238] sm:$0xff] %vm212_vm1, %v2895_v60 }
 0x2f4   : > { %v2713_v22 = vpop.xlane.xlu0 %2712  ;;  %v2715_v30 = vpop.xlane.xlu1 %2714 }
 0x2f5   : > { %v2896_v2 = vadd.f32 %v2713_v22, %v2384_v15  ;;  %v2897_v53 = vadd.f32 %v2715_v30, %v2385_v19  ;;  %v2406_v22 = vld [vmem:[%s3955_s16 + $0x2f0] sm:$0xff]  ;;  %v2407_v30 = vld [vmem:[%s3955_s16 + $0x2f8] sm:$0xff] }
 0x2f7   : > { %3024 = vst.msk [vmem:[%s3955_s16 + $0x240] sm:$0xff] %vm212_vm1, %v2896_v2  ;;  %3025 = vst.msk [vmem:[%s3955_s16 + $0x248] sm:$0xff] %vm212_vm1, %v2897_v53 }
 0x2f8   : > { %v2717_v51 = vpop.xlane.xlu0 %2716  ;;  %v2719_v47 = vpop.xlane.xlu1 %2718 }
 0x2f9   : > { %v2898_v40 = vadd.f32 %v2717_v51, %v2386_v56  ;;  %v2899_v17 = vadd.f32 %v2719_v47, %v2387_v59  ;;  %v2408_v51 = vld [vmem:[%s3955_s16 + $0x300] sm:$0xff]  ;;  %v2409_v47 = vld [vmem:[%s3955_s16 + $0x308] sm:$0xff] }
 0x2fb   : > { %3026 = vst.msk [vmem:[%s3955_s16 + $0x250] sm:$0xff] %vm212_vm1, %v2898_v40  ;;  %3027 = vst.msk [vmem:[%s3955_s16 + $0x258] sm:$0xff] %vm212_vm1, %v2899_v17 }
 0x2fc   : > { %v2721_v9 = vpop.xlane.xlu0 %2720  ;;  %v2723_v63 = vpop.xlane.xlu1 %2722 }
 0x2fd   : > { %v2900_v36 = vadd.f32 %v2721_v9, %v2388_v20  ;;  %v2901_v23 = vadd.f32 %v2723_v63, %v2389_v4  ;;  %v2410_v9 = vld [vmem:[%s3955_s16 + $0x310] sm:$0xff]  ;;  %v2411_v63 = vld [vmem:[%s3955_s16 + $0x318] sm:$0xff] }
 0x2ff   : > { %3028 = vst.msk [vmem:[%s3955_s16 + $0x260] sm:$0xff] %vm212_vm1, %v2900_v36  ;;  %3029 = vst.msk [vmem:[%s3955_s16 + $0x268] sm:$0xff] %vm212_vm1, %v2901_v23 }
 0x300   : > { %v2725_v21 = vpop.xlane.xlu0 %2724  ;;  %v2727_v54 = vpop.xlane.xlu1 %2726 }
 0x301   : > { %v2902_v1 = vadd.f32 %v2725_v21, %v2390_v24  ;;  %v2903_v5 = vadd.f32 %v2727_v54, %v2391_v61  ;;  %v2412_v21 = vld [vmem:[%s3955_s16 + $0x320] sm:$0xff]  ;;  %v2413_v54 = vld [vmem:[%s3955_s16 + $0x328] sm:$0xff] }
 0x303   : > { %3030 = vst.msk [vmem:[%s3955_s16 + $0x270] sm:$0xff] %vm212_vm1, %v2902_v1  ;;  %3031 = vst.msk [vmem:[%s3955_s16 + $0x278] sm:$0xff] %vm212_vm1, %v2903_v5 }
 0x304   : > { %v2729_v45 = vpop.xlane.xlu0 %2728  ;;  %v2731_v28 = vpop.xlane.xlu1 %2730 }
 0x305   : > { %v2904_v7 = vadd.f32 %v2729_v45, %v2392_v31  ;;  %v2905_v37 = vadd.f32 %v2731_v28, %v2393_v34  ;;  %v2414_v45 = vld [vmem:[%s3955_s16 + $0x330] sm:$0xff]  ;;  %v2415_v28 = vld [vmem:[%s3955_s16 + $0x338] sm:$0xff] }
 0x307   : > { %3032 = vst.msk [vmem:[%s3955_s16 + $0x280] sm:$0xff] %vm212_vm1, %v2904_v7  ;;  %3033 = vst.msk [vmem:[%s3955_s16 + $0x288] sm:$0xff] %vm212_vm1, %v2905_v37 }
 0x308   : > { %v2733_v62 = vpop.xlane.xlu0 %2732  ;;  %v2735_v26 = vpop.xlane.xlu1 %2734 }
 0x309   : > { %v2906_v29 = vadd.f32 %v2733_v62, %v2394_v39  ;;  %v2907_v32 = vadd.f32 %v2735_v26, %v2395_v12  ;;  %v2416_v62 = vld [vmem:[%s3955_s16 + $0x340] sm:$0xff]  ;;  %v2417_v26 = vld [vmem:[%s3955_s16 + $0x348] sm:$0xff] }
 0x30b   : > { %3034 = vst.msk [vmem:[%s3955_s16 + $0x290] sm:$0xff] %vm212_vm1, %v2906_v29  ;;  %3035 = vst.msk [vmem:[%s3955_s16 + $0x298] sm:$0xff] %vm212_vm1, %v2907_v32 }
 0x30c   : > { %v2737_v27 = vpop.xlane.xlu0 %2736  ;;  %v2739_v38 = vpop.xlane.xlu1 %2738 }
 0x30d   : > { %v2908_v50 = vadd.f32 %v2737_v27, %v2396_v13  ;;  %v2909_v35 = vadd.f32 %v2739_v38, %v2397_v18  ;;  %v2418_v27 = vld [vmem:[%s3955_s16 + $0x350] sm:$0xff]  ;;  %v2419_v38 = vld [vmem:[%s3955_s16 + $0x358] sm:$0xff] }
 0x30f   : > { %3036 = vst.msk [vmem:[%s3955_s16 + $0x2a0] sm:$0xff] %vm212_vm1, %v2908_v50  ;;  %3037 = vst.msk [vmem:[%s3955_s16 + $0x2a8] sm:$0xff] %vm212_vm1, %v2909_v35 }
 0x310   : > { %v2741_v43 = vpop.xlane.xlu0 %2740  ;;  %v2743_v46 = vpop.xlane.xlu1 %2742 }
 0x311   : > { %v2910_v16 = vadd.f32 %v2741_v43, %v2398_v6  ;;  %v2911_v57 = vadd.f32 %v2743_v46, %v2399_v10  ;;  %v2420_v43 = vld [vmem:[%s3955_s16 + $0x360] sm:$0xff]  ;;  %v2421_v46 = vld [vmem:[%s3955_s16 + $0x368] sm:$0xff] }
 0x313   : > { %3038 = vst.msk [vmem:[%s3955_s16 + $0x2b0] sm:$0xff] %vm212_vm1, %v2910_v16  ;;  %3039 = vst.msk [vmem:[%s3955_s16 + $0x2b8] sm:$0xff] %vm212_vm1, %v2911_v57 }
 0x314   : > { %v2745_v42 = vpop.xlane.xlu0 %2744  ;;  %v2747_v0 = vpop.xlane.xlu1 %2746 }
 0x315   : > { %v2912_v48 = vadd.f32 %v2745_v42, %v2400_v33  ;;  %v2913_v41 = vadd.f32 %v2747_v0, %v2401_v49  ;;  %v2422_v42 = vld [vmem:[%s3955_s16 + $0x370] sm:$0xff]  ;;  %v2423_v0 = vld [vmem:[%s3955_s16 + $0x378] sm:$0xff] }
 0x317   : > { %3040 = vst.msk [vmem:[%s3955_s16 + $0x2c0] sm:$0xff] %vm212_vm1, %v2912_v48  ;;  %3041 = vst.msk [vmem:[%s3955_s16 + $0x2c8] sm:$0xff] %vm212_vm1, %v2913_v41 }
 0x318   : > { %v2749_v8 = vpop.xlane.xlu0 %2748  ;;  %v2751_v11 = vpop.xlane.xlu1 %2750 }
 0x319   : > { %v2914_v25 = vadd.f32 %v2749_v8, %v2402_v44  ;;  %v2915_v14 = vadd.f32 %v2751_v11, %v2403_v3  ;;  %v2424_v8 = vld [vmem:[%s3955_s16 + $0x380] sm:$0xff]  ;;  %v2425_v11 = vld [vmem:[%s3955_s16 + $0x388] sm:$0xff] }
 0x31b   : > { %3042 = vst.msk [vmem:[%s3955_s16 + $0x2d0] sm:$0xff] %vm212_vm1, %v2914_v25  ;;  %3043 = vst.msk [vmem:[%s3955_s16 + $0x2d8] sm:$0xff] %vm212_vm1, %v2915_v14 }
 0x31c   : > { %v2753_v58 = vpop.xlane.xlu0 %2752  ;;  %v2755_v60 = vpop.xlane.xlu1 %2754 }
 0x31d   : > { %v2916_v15 = vadd.f32 %v2753_v58, %v2404_v52  ;;  %v2917_v19 = vadd.f32 %v2755_v60, %v2405_v55  ;;  %v2426_v58 = vld [vmem:[%s3955_s16 + $0x390] sm:$0xff]  ;;  %v2427_v60 = vld [vmem:[%s3955_s16 + $0x398] sm:$0xff] }
 0x31f   : > { %3044 = vst.msk [vmem:[%s3955_s16 + $0x2e0] sm:$0xff] %vm212_vm1, %v2916_v15  ;;  %3045 = vst.msk [vmem:[%s3955_s16 + $0x2e8] sm:$0xff] %vm212_vm1, %v2917_v19 }
 0x320   : > { %v2757_v2 = vpop.xlane.xlu0 %2756  ;;  %v2759_v53 = vpop.xlane.xlu1 %2758 }
 0x321   : > { %v2918_v56 = vadd.f32 %v2757_v2, %v2406_v22  ;;  %v2919_v59 = vadd.f32 %v2759_v53, %v2407_v30  ;;  %v2428_v2 = vld [vmem:[%s3955_s16 + $0x3a0] sm:$0xff]  ;;  %v2429_v53 = vld [vmem:[%s3955_s16 + $0x3a8] sm:$0xff] }
 0x323   : > { %3046 = vst.msk [vmem:[%s3955_s16 + $0x2f0] sm:$0xff] %vm212_vm1, %v2918_v56  ;;  %3047 = vst.msk [vmem:[%s3955_s16 + $0x2f8] sm:$0xff] %vm212_vm1, %v2919_v59 }
 0x324   : > { %v2761_v40 = vpop.xlane.xlu0 %2760  ;;  %v2763_v17 = vpop.xlane.xlu1 %2762 }
 0x325   : > { %v2920_v20 = vadd.f32 %v2761_v40, %v2408_v51  ;;  %v2921_v4 = vadd.f32 %v2763_v17, %v2409_v47  ;;  %v2430_v40 = vld [vmem:[%s3955_s16 + $0x3b0] sm:$0xff]  ;;  %v2431_v17 = vld [vmem:[%s3955_s16 + $0x3b8] sm:$0xff] }
 0x327   : > { %3048 = vst.msk [vmem:[%s3955_s16 + $0x300] sm:$0xff] %vm212_vm1, %v2920_v20  ;;  %3049 = vst.msk [vmem:[%s3955_s16 + $0x308] sm:$0xff] %vm212_vm1, %v2921_v4 }
 0x328   : > { %v2765_v36 = vpop.xlane.xlu0 %2764  ;;  %v2767_v23 = vpop.xlane.xlu1 %2766 }
 0x329   : > { %v2922_v24 = vadd.f32 %v2765_v36, %v2410_v9  ;;  %v2923_v61 = vadd.f32 %v2767_v23, %v2411_v63  ;;  %v2432_v36 = vld [vmem:[%s3955_s16 + $0x3c0] sm:$0xff]  ;;  %v2433_v23 = vld [vmem:[%s3955_s16 + $0x3c8] sm:$0xff] }
 0x32b   : > { %3050 = vst.msk [vmem:[%s3955_s16 + $0x310] sm:$0xff] %vm212_vm1, %v2922_v24  ;;  %3051 = vst.msk [vmem:[%s3955_s16 + $0x318] sm:$0xff] %vm212_vm1, %v2923_v61 }
 0x32c   : > { %v2769_v1 = vpop.xlane.xlu0 %2768  ;;  %v2771_v5 = vpop.xlane.xlu1 %2770 }
 0x32d   : > { %v2924_v31 = vadd.f32 %v2769_v1, %v2412_v21  ;;  %v2925_v34 = vadd.f32 %v2771_v5, %v2413_v54  ;;  %v2434_v1 = vld [vmem:[%s3955_s16 + $0x3d0] sm:$0xff]  ;;  %v2435_v5 = vld [vmem:[%s3955_s16 + $0x3d8] sm:$0xff] }
 0x32f   : > { %3052 = vst.msk [vmem:[%s3955_s16 + $0x320] sm:$0xff] %vm212_vm1, %v2924_v31  ;;  %3053 = vst.msk [vmem:[%s3955_s16 + $0x328] sm:$0xff] %vm212_vm1, %v2925_v34 }
 0x330   : > { %v2773_v7 = vpop.xlane.xlu0 %2772  ;;  %v2775_v37 = vpop.xlane.xlu1 %2774 }
 0x331   : > { %v2926_v39 = vadd.f32 %v2773_v7, %v2414_v45  ;;  %v2927_v12 = vadd.f32 %v2775_v37, %v2415_v28  ;;  %v2436_v7 = vld [vmem:[%s3955_s16 + $0x3e0] sm:$0xff]  ;;  %v2437_v37 = vld [vmem:[%s3955_s16 + $0x3e8] sm:$0xff] }
 0x333   : > { %3054 = vst.msk [vmem:[%s3955_s16 + $0x330] sm:$0xff] %vm212_vm1, %v2926_v39  ;;  %3055 = vst.msk [vmem:[%s3955_s16 + $0x338] sm:$0xff] %vm212_vm1, %v2927_v12 }
 0x334   : > { %v2777_v29 = vpop.xlane.xlu0 %2776  ;;  %v2779_v32 = vpop.xlane.xlu1 %2778 }
 0x335   : > { %v2928_v13 = vadd.f32 %v2777_v29, %v2416_v62  ;;  %v2929_v18 = vadd.f32 %v2779_v32, %v2417_v26  ;;  %v2438_v29 = vld [vmem:[%s3955_s16 + $0x3f0] sm:$0xff]  ;;  %v2439_v32 = vld [vmem:[%s3955_s16 + $0x3f8] sm:$0xff] }
 0x337   : > { %3056 = vst.msk [vmem:[%s3955_s16 + $0x340] sm:$0xff] %vm212_vm1, %v2928_v13  ;;  %3057 = vst.msk [vmem:[%s3955_s16 + $0x348] sm:$0xff] %vm212_vm1, %v2929_v18 }
 0x338   : > { %v2781_v50 = vpop.xlane.xlu0 %2780  ;;  %v2783_v35 = vpop.xlane.xlu1 %2782 }
 0x339   : > { %v2930_v6 = vadd.f32 %v2781_v50, %v2418_v27  ;;  %v2931_v10 = vadd.f32 %v2783_v35, %v2419_v38 }
 0x33b   : > { %3058 = vst.msk [vmem:[%s3955_s16 + $0x350] sm:$0xff] %vm212_vm1, %v2930_v6  ;;  %3059 = vst.msk [vmem:[%s3955_s16 + $0x358] sm:$0xff] %vm212_vm1, %v2931_v10 }
 0x33c   : > { %v2785_v16 = vpop.xlane.xlu0 %2784  ;;  %v2787_v57 = vpop.xlane.xlu1 %2786 }
 0x33d   : > { %v2932_v33 = vadd.f32 %v2785_v16, %v2420_v43  ;;  %v2933_v49 = vadd.f32 %v2787_v57, %v2421_v46 }
 0x33f   : > { %3060 = vst.msk [vmem:[%s3955_s16 + $0x360] sm:$0xff] %vm212_vm1, %v2932_v33  ;;  %3061 = vst.msk [vmem:[%s3955_s16 + $0x368] sm:$0xff] %vm212_vm1, %v2933_v49 }
 0x340   : > { %v2789_v48 = vpop.xlane.xlu0 %2788  ;;  %v2791_v41 = vpop.xlane.xlu1 %2790 }
 0x341   : > { %v2934_v44 = vadd.f32 %v2789_v48, %v2422_v42  ;;  %v2935_v3 = vadd.f32 %v2791_v41, %v2423_v0 }
 0x343   : > { %3062 = vst.msk [vmem:[%s3955_s16 + $0x370] sm:$0xff] %vm212_vm1, %v2934_v44  ;;  %3063 = vst.msk [vmem:[%s3955_s16 + $0x378] sm:$0xff] %vm212_vm1, %v2935_v3 }
 0x344   : > { %v2793_v25 = vpop.xlane.xlu0 %2792  ;;  %v2795_v14 = vpop.xlane.xlu1 %2794 }
 0x345   : > { %v2936_v52 = vadd.f32 %v2793_v25, %v2424_v8  ;;  %v2937_v55 = vadd.f32 %v2795_v14, %v2425_v11 }
 0x347   : > { %3064 = vst.msk [vmem:[%s3955_s16 + $0x380] sm:$0xff] %vm212_vm1, %v2936_v52  ;;  %3065 = vst.msk [vmem:[%s3955_s16 + $0x388] sm:$0xff] %vm212_vm1, %v2937_v55 }
 0x348   : > { %v2797_v15 = vpop.xlane.xlu0 %2796  ;;  %v2799_v19 = vpop.xlane.xlu1 %2798 }
 0x349   : > { %v2938_v22 = vadd.f32 %v2797_v15, %v2426_v58  ;;  %v2939_v30 = vadd.f32 %v2799_v19, %v2427_v60 }
 0x34b   : > { %3066 = vst.msk [vmem:[%s3955_s16 + $0x390] sm:$0xff] %vm212_vm1, %v2938_v22  ;;  %3067 = vst.msk [vmem:[%s3955_s16 + $0x398] sm:$0xff] %vm212_vm1, %v2939_v30 }
 0x34c   : > { %v2801_v56 = vpop.xlane.xlu0 %2800  ;;  %v2803_v59 = vpop.xlane.xlu1 %2802 }
 0x34d   : > { %v2940_v51 = vadd.f32 %v2801_v56, %v2428_v2  ;;  %v2941_v47 = vadd.f32 %v2803_v59, %v2429_v53 }
 0x34f   : > { %3068 = vst.msk [vmem:[%s3955_s16 + $0x3a0] sm:$0xff] %vm212_vm1, %v2940_v51  ;;  %3069 = vst.msk [vmem:[%s3955_s16 + $0x3a8] sm:$0xff] %vm212_vm1, %v2941_v47 }
 0x350   : > { %v2805_v20 = vpop.xlane.xlu0 %2804  ;;  %v2807_v4 = vpop.xlane.xlu1 %2806 }
 0x351   : > { %v2942_v9 = vadd.f32 %v2805_v20, %v2430_v40  ;;  %v2943_v63 = vadd.f32 %v2807_v4, %v2431_v17 }
 0x353   : > { %3070 = vst.msk [vmem:[%s3955_s16 + $0x3b0] sm:$0xff] %vm212_vm1, %v2942_v9  ;;  %3071 = vst.msk [vmem:[%s3955_s16 + $0x3b8] sm:$0xff] %vm212_vm1, %v2943_v63 }
 0x354   : > { %v2809_v24 = vpop.xlane.xlu0 %2808  ;;  %v2811_v61 = vpop.xlane.xlu1 %2810 }
 0x355   : > { %v2944_v21 = vadd.f32 %v2809_v24, %v2432_v36  ;;  %v2945_v54 = vadd.f32 %v2811_v61, %v2433_v23 }
 0x357   : > { %3072 = vst.msk [vmem:[%s3955_s16 + $0x3c0] sm:$0xff] %vm212_vm1, %v2944_v21  ;;  %3073 = vst.msk [vmem:[%s3955_s16 + $0x3c8] sm:$0xff] %vm212_vm1, %v2945_v54 }
 0x358   : > { %v2813_v31 = vpop.xlane.xlu0 %2812  ;;  %v2815_v34 = vpop.xlane.xlu1 %2814 }
 0x359   : > { %v2946_v45 = vadd.f32 %v2813_v31, %v2434_v1  ;;  %v2947_v28 = vadd.f32 %v2815_v34, %v2435_v5 }
 0x35b   : > { %3074 = vst.msk [vmem:[%s3955_s16 + $0x3d0] sm:$0xff] %vm212_vm1, %v2946_v45  ;;  %3075 = vst.msk [vmem:[%s3955_s16 + $0x3d8] sm:$0xff] %vm212_vm1, %v2947_v28 }
 0x35c   : > { %v2817_v39 = vpop.xlane.xlu0 %2816  ;;  %v2819_v12 = vpop.xlane.xlu1 %2818 }
 0x35d   : > { %v2948_v62 = vadd.f32 %v2817_v39, %v2436_v7  ;;  %v2949_v26 = vadd.f32 %v2819_v12, %v2437_v37 }
 0x35f   : > { %3076 = vst.msk [vmem:[%s3955_s16 + $0x3e0] sm:$0xff] %vm212_vm1, %v2948_v62  ;;  %3077 = vst.msk [vmem:[%s3955_s16 + $0x3e8] sm:$0xff] %vm212_vm1, %v2949_v26 }
 0x360   : > { %v2821_v13 = vpop.xlane.xlu0 %2820  ;;  %v2823_v18 = vpop.xlane.xlu1 %2822 }
 0x361   : > { %v2950_v27 = vadd.f32 %v2821_v13, %v2438_v29  ;;  %v2951_v38 = vadd.f32 %v2823_v18, %v2439_v32 }
 0x363   : > { %3078 = vst.msk [vmem:[%s3955_s16 + $0x3f0] sm:$0xff] %vm212_vm1, %v2950_v27  ;;  %3079 = vst.msk [vmem:[%s3955_s16 + $0x3f8] sm:$0xff] %vm212_vm1, %v2951_v38 }
 0x364 PF: > { %s14_s14 = sadd.s32 1, %s3643_s14   ;;  %s6098_s12 = smov %s3639_s13 }
 0x365   : > { %p11_p5 = scmp.ge.s32.totalorder %s14_s14, 4   ;;  %s6099_s13 = smov %s6101_s15 }
 0x367   :  { %13 = sbr.rel (!%p11_p5) target bundleno = 2 (0x2), region = 74 }

</bundles_post_ra>
